<compile_context>
chip_gen: v7x
topology: tpu7x:2x2x1
jax: 0.10.0
libtpu: 0.0.40
codegen_flags: <defaults>
</compile_context>

<pallas_src>
import jax
import jax.numpy as jnp
import numpy as np
from jax.experimental import pallas as pl
from jax.experimental.pallas import tpu as pltpu

# fc1..fc6 dimensions from the module __init__
DIMS = [32 * 32 * 3, 256, 128, 64, 32, 16, 10]
LANE_PAD = 128           # all layer outputs except fc1 padded to 128 lanes
BIAS_ROWS = 8            # 6 layers padded to a full f32 sublane tile
BIAS_COLS = 256          # widest layer output
SUBLANE = 8              # f32 sublane


def _round_up(n, m):
    return ((n + m - 1) // m) * m


def _svhn_mlp_kernel(x_ref,
                     w1_ref, w2_ref, w3_ref, w4_ref, w5_ref, w6_ref,
                     b_ref, out_ref):
    """One batch tile of the 6-layer MLP. Weights arrive pre-clamped (relu(W)), bf16,
    zero-padded to 128-lane widths; bias pack is f32 with matching zero padding."""

    def layer(h, w_ref, row, width, apply_relu):
        # bf16 x bf16 MXU matmul with f32 accumulation.
        y = jnp.dot(h, w_ref[...], preferred_element_type=jnp.float32)
        y = y + b_ref[row:row + 1, :width]          # (1, width) f32 broadcast over rows
        if apply_relu:
            y = jnp.maximum(y, 0.0)                 # RobustReLu, epsilon_a = 0
            y = y.astype(jnp.bfloat16)              # bf16 operand for the next MXU call
        return y

    h = x_ref[...]                                   # bf16 (tb, 3072)
    h = layer(h, w1_ref, 0, 256, True)
    h = layer(h, w2_ref, 1, LANE_PAD, True)
    h = layer(h, w3_ref, 2, LANE_PAD, True)
    h = layer(h, w4_ref, 3, LANE_PAD, True)
    h = layer(h, w5_ref, 4, LANE_PAD, True)
    h = layer(h, w6_ref, 5, LANE_PAD, False)         # fc6 (padded to 128 lanes), f32, no activation
    out_ref[...] = h.astype(out_ref.dtype)


def _prep_weights(params):
    """ReLU-clamp once, zero-pad tail layers to 128-lane in/out dims, cast to bf16."""
    ws = []
    for li, (w, _) in enumerate(params):
        w_nn = jnp.maximum(w.astype(jnp.float32), 0.0)      # non_negative=True -> relu(W)
        d_in, d_out = w_nn.shape
        pad_in = max(0, (LANE_PAD if li > 0 else d_in) - d_in)   # fc1 keeps its 3072 input dim
        pad_in = 0 if d_in >= LANE_PAD or li == 0 else LANE_PAD - d_in
        pad_out = 0 if d_out >= LANE_PAD else LANE_PAD - d_out
        if pad_in or pad_out:
            # Zero padding keeps padded activation columns exactly zero (bias pad is zero too).
            w_nn = jnp.pad(w_nn, ((0, pad_in), (0, pad_out)))
        ws.append(w_nn.astype(jnp.bfloat16))
    return ws


def _pack_biases(params):
    """Merge the six biases into one (8, 256) f32 block: one DMA instead of six."""
    b_pack = jnp.zeros((BIAS_ROWS, BIAS_COLS), jnp.float32)
    for li, (_, b) in enumerate(params):
        b_pack = b_pack.at[li, :b.shape[-1]].set(b.reshape(-1).astype(jnp.float32))
    return b_pack


def svhn_mlp_forward(x, params, block_b=1024):
    """x: (B, 3, 32, 32) float32 (NCHW, as in PyTorch). Returns (B, 10) f32 logits."""
    B = x.shape[0]
    x_flat = x.reshape(B, -1).astype(jnp.bfloat16)   # matches x.view(x.shape[0], -1); bf16 stream

    # Batch tiling: pad to sublane multiple, choose tile, keep >= 2 grid steps for
    # moderate batches so the "parallel" axis shards across both v7x TensorCores.
    pad_b = _round_up(B, SUBLANE)
    tb = min(block_b, pad_b)
    if pad_b > SUBLANE and pad_b <= tb:
        tb = _round_up((pad_b + 1) // 2, SUBLANE)
    pad_b = _round_up(pad_b, tb)
    if pad_b != B:
        x_flat = jnp.pad(x_flat, ((0, pad_b - B), (0, 0)))
    n_tiles = pad_b // tb

    ws = _prep_weights(params)
    b_pack = _pack_biases(params)

    # bf16 in / f32 out byte traffic + weight/bias bytes.
    flops = 2 * pad_b * sum(DIMS[i] * DIMS[i + 1] for i in range(6))
    bytes_accessed = (sum(int(np.prod(w.shape)) for w in ws) * 2
                      + BIAS_ROWS * BIAS_COLS * 4
                      + pad_b * DIMS[0] * 2
                      + pad_b * LANE_PAD * 4)

    def build_and_run(weight_pipeline_mode):
        def const_map(i):
            return (0, 0)

        spec_kwargs = ({} if weight_pipeline_mode is None
                       else {"pipeline_mode": weight_pipeline_mode})
        # Weight / bias blocks are grid-invariant (constant index map) -> VMEM-resident,
        # single-buffered when supported.
        w_specs = [pl.BlockSpec(w.shape, const_map, **spec_kwargs) for w in ws]
        b_spec = pl.BlockSpec((BIAS_ROWS, BIAS_COLS), const_map, **spec_kwargs)
        in_specs = ([pl.BlockSpec((tb, DIMS[0]), lambda i: (i, 0))]
                    + w_specs + [b_spec])

        return pl.pallas_call(
            _svhn_mlp_kernel,
            out_shape=jax.ShapeDtypeStruct((pad_b, LANE_PAD), jnp.float32),
            grid=(n_tiles,),
            in_specs=in_specs,
            out_specs=pl.BlockSpec((tb, LANE_PAD), lambda i: (i, 0)),
            compiler_params=pltpu.CompilerParams(
                dimension_semantics=("parallel",),
                vmem_limit_bytes=48 << 20),   # within v7x's 64 MiB/TC; fine on v5e/v6e
            cost_estimate=pl.CostEstimate(flops=flops,
                                          transcendentals=0,
                                          bytes_accessed=bytes_accessed),
        )(x_flat, *ws, b_pack)

    try:
        out = build_and_run(pl.Buffered(1))
    except Exception:
        # Fallback if this JAX version rejects single-buffered pipeline_mode.
        out = build_and_run(None)

    return out[:B, :DIMS[-1]]


def init_params(key):
    """Deterministic init mimicking nn.Linear default: U(-1/sqrt(in), 1/sqrt(in))."""
    params = []
    for li in range(6):
        d_in, d_out = DIMS[li], DIMS[li + 1]
        key, kw, kb = jax.random.split(key, 3)
        bound = 1.0 / np.sqrt(d_in)
        # stored as (in, out) for the kernel (transpose of PyTorch's (out, in))
        w = jax.random.uniform(kw, (d_in, d_out), jnp.float32, -bound, bound)
        b = jax.random.uniform(kb, (1, d_out), jnp.float32, -bound, bound)
        params.append((w, b))
    return params


def reference_forward(x, params, operand_dtype=jnp.float32):
    """Pure-JAX reference; operand_dtype=bf16 matches the kernel's streamed precision."""
    h = x.reshape(x.shape[0], -1).astype(operand_dtype)
    for li, (w, b) in enumerate(params):
        w_nn = jnp.maximum(w.astype(jnp.float32), 0.0).astype(operand_dtype)
        h = jnp.dot(h, w_nn, preferred_element_type=jnp.float32) + b
        if li < 5:
            h = jnp.maximum(h, 0.0).astype(operand_dtype)
    return h.astype(jnp.float32)


if __name__ == "__main__":
    key = jax.random.PRNGKey(0)
    key, kx = jax.random.split(key)
    # SVHN input: batch=2, NCHW (2, 3, 32, 32) — fc1 requires the full 3072 flat dim.
    x = jax.random.normal(kx, (2, 3, 32, 32), jnp.float32)
    params = init_params(key)

    out = svhn_mlp_forward(x, params)
    out = jax.block_until_ready(out)
    assert out.shape == (2, 10)

    # Matching-precision reference (bf16 operands, f32 accumulation), per review note.
    ref = reference_forward(x, params, operand_dtype=jnp.bfloat16)
    assert np.allclose(np.asarray(out), np.asarray(ref), rtol=1e-2, atol=1e-2), (
        np.max(np.abs(np.asarray(out) - np.asarray(ref))))
    print("KERNEL_OK")
</pallas_src>

<mosaic_0001>
module attributes {stable_mosaic.version = 11 : i64} {
  func.func @_svhn_mlp_kernel(%arg0: i32, %arg1: memref<8x3072xbf16, #tpu.memory_space<vmem>>, %arg2: memref<3072x256xbf16, #tpu.memory_space<vmem>>, %arg3: memref<256x128xbf16, #tpu.memory_space<vmem>>, %arg4: memref<128x128xbf16, #tpu.memory_space<vmem>>, %arg5: memref<128x128xbf16, #tpu.memory_space<vmem>>, %arg6: memref<128x128xbf16, #tpu.memory_space<vmem>>, %arg7: memref<128x128xbf16, #tpu.memory_space<vmem>>, %arg8: memref<8x256xf32, #tpu.memory_space<vmem>>, %arg9: memref<8x128xf32, #tpu.memory_space<vmem>>) attributes {dimension_semantics = [#tpu.dimension_semantics<parallel>], iteration_bounds = array<i64: 1>, scalar_prefetch = 0 : i64, scratch_operands = 0 : i64, tpu.core_type = #tpu.core_type<tc>, window_params = [{transform_indices = @transform_0, window_bounds = array<i64: 8, 3072>}, {pipeline_mode = #tpu.pipeline_mode<synchronous>, transform_indices = @transform_1, window_bounds = array<i64: 3072, 256>}, {pipeline_mode = #tpu.pipeline_mode<synchronous>, transform_indices = @transform_2, window_bounds = array<i64: 256, 128>}, {pipeline_mode = #tpu.pipeline_mode<synchronous>, transform_indices = @transform_3, window_bounds = array<i64: 128, 128>}, {pipeline_mode = #tpu.pipeline_mode<synchronous>, transform_indices = @transform_4, window_bounds = array<i64: 128, 128>}, {pipeline_mode = #tpu.pipeline_mode<synchronous>, transform_indices = @transform_5, window_bounds = array<i64: 128, 128>}, {pipeline_mode = #tpu.pipeline_mode<synchronous>, transform_indices = @transform_6, window_bounds = array<i64: 128, 128>}, {pipeline_mode = #tpu.pipeline_mode<synchronous>, transform_indices = @transform_7, window_bounds = array<i64: 8, 256>}, {transform_indices = @transform_8, window_bounds = array<i64: 8, 128>}]} {
    %c0 = arith.constant 0 : index
    %c0_0 = arith.constant 0 : index
    %0 = vector.load %arg1[%c0, %c0_0] : memref<8x3072xbf16, #tpu.memory_space<vmem>>, vector<8x3072xbf16>
    %c0_1 = arith.constant 0 : index
    %c0_2 = arith.constant 0 : index
    %1 = vector.load %arg2[%c0_1, %c0_2] : memref<3072x256xbf16, #tpu.memory_space<vmem>>, vector<3072x256xbf16>
    %cst = arith.constant dense<0.000000e+00> : vector<8x256xf32>
    %2 = tpu.matmul %0, %1, %cst {dimension_numbers = #tpu.dot_dimension_numbers<[1], [0], [0], [1], [0, 0, 1, 1], [], []>} : vector<8x3072xbf16>, vector<3072x256xbf16>, vector<8x256xf32> -> vector<8x256xf32>
    %c0_3 = arith.constant 0 : index
    %c0_4 = arith.constant 0 : index
    %3 = vector.load %arg8[%c0_3, %c0_4] : memref<8x256xf32, #tpu.memory_space<vmem>>, vector<1x256xf32>
    %4 = vector.broadcast %3 : vector<1x256xf32> to vector<8x256xf32>
    %5 = arith.addf %2, %4 : vector<8x256xf32>
    %cst_5 = arith.constant 0.000000e+00 : f32
    %6 = vector.broadcast %cst_5 : f32 to vector<8x256xf32>
    %7 = arith.maximumf %5, %6 : vector<8x256xf32>
    %8 = arith.truncf %7 : vector<8x256xf32> to vector<8x256xbf16>
    %c0_6 = arith.constant 0 : index
    %c0_7 = arith.constant 0 : index
    %9 = vector.load %arg3[%c0_6, %c0_7] : memref<256x128xbf16, #tpu.memory_space<vmem>>, vector<256x128xbf16>
    %cst_8 = arith.constant dense<0.000000e+00> : vector<8x128xf32>
    %10 = tpu.matmul %8, %9, %cst_8 {dimension_numbers = #tpu.dot_dimension_numbers<[1], [0], [0], [1], [0, 0, 1, 1], [], []>} : vector<8x256xbf16>, vector<256x128xbf16>, vector<8x128xf32> -> vector<8x128xf32>
    %c1 = arith.constant 1 : index
    %c0_9 = arith.constant 0 : index
    %11 = vector.load %arg8[%c1, %c0_9] : memref<8x256xf32, #tpu.memory_space<vmem>>, vector<1x128xf32>
    %12 = vector.broadcast %11 : vector<1x128xf32> to vector<8x128xf32>
    %13 = arith.addf %10, %12 : vector<8x128xf32>
    %cst_10 = arith.constant 0.000000e+00 : f32
    %14 = vector.broadcast %cst_10 : f32 to vector<8x128xf32>
    %15 = arith.maximumf %13, %14 : vector<8x128xf32>
    %16 = arith.truncf %15 : vector<8x128xf32> to vector<8x128xbf16>
    %c0_11 = arith.constant 0 : index
    %c0_12 = arith.constant 0 : index
    %17 = vector.load %arg4[%c0_11, %c0_12] : memref<128x128xbf16, #tpu.memory_space<vmem>>, vector<128x128xbf16>
    %cst_13 = arith.constant dense<0.000000e+00> : vector<8x128xf32>
    %18 = tpu.matmul %16, %17, %cst_13 {dimension_numbers = #tpu.dot_dimension_numbers<[1], [0], [0], [1], [0, 0, 1, 1], [], []>} : vector<8x128xbf16>, vector<128x128xbf16>, vector<8x128xf32> -> vector<8x128xf32>
    %c2 = arith.constant 2 : index
    %c0_14 = arith.constant 0 : index
    %19 = vector.load %arg8[%c2, %c0_14] : memref<8x256xf32, #tpu.memory_space<vmem>>, vector<1x128xf32>
    %20 = vector.broadcast %19 : vector<1x128xf32> to vector<8x128xf32>
    %21 = arith.addf %18, %20 : vector<8x128xf32>
    %cst_15 = arith.constant 0.000000e+00 : f32
    %22 = vector.broadcast %cst_15 : f32 to vector<8x128xf32>
    %23 = arith.maximumf %21, %22 : vector<8x128xf32>
    %24 = arith.truncf %23 : vector<8x128xf32> to vector<8x128xbf16>
    %c0_16 = arith.constant 0 : index
    %c0_17 = arith.constant 0 : index
    %25 = vector.load %arg5[%c0_16, %c0_17] : memref<128x128xbf16, #tpu.memory_space<vmem>>, vector<128x128xbf16>
    %cst_18 = arith.constant dense<0.000000e+00> : vector<8x128xf32>
    %26 = tpu.matmul %24, %25, %cst_18 {dimension_numbers = #tpu.dot_dimension_numbers<[1], [0], [0], [1], [0, 0, 1, 1], [], []>} : vector<8x128xbf16>, vector<128x128xbf16>, vector<8x128xf32> -> vector<8x128xf32>
    %c3 = arith.constant 3 : index
    %c0_19 = arith.constant 0 : index
    %27 = vector.load %arg8[%c3, %c0_19] : memref<8x256xf32, #tpu.memory_space<vmem>>, vector<1x128xf32>
    %28 = vector.broadcast %27 : vector<1x128xf32> to vector<8x128xf32>
    %29 = arith.addf %26, %28 : vector<8x128xf32>
    %cst_20 = arith.constant 0.000000e+00 : f32
    %30 = vector.broadcast %cst_20 : f32 to vector<8x128xf32>
    %31 = arith.maximumf %29, %30 : vector<8x128xf32>
    %32 = arith.truncf %31 : vector<8x128xf32> to vector<8x128xbf16>
    %c0_21 = arith.constant 0 : index
    %c0_22 = arith.constant 0 : index
    %33 = vector.load %arg6[%c0_21, %c0_22] : memref<128x128xbf16, #tpu.memory_space<vmem>>, vector<128x128xbf16>
    %cst_23 = arith.constant dense<0.000000e+00> : vector<8x128xf32>
    %34 = tpu.matmul %32, %33, %cst_23 {dimension_numbers = #tpu.dot_dimension_numbers<[1], [0], [0], [1], [0, 0, 1, 1], [], []>} : vector<8x128xbf16>, vector<128x128xbf16>, vector<8x128xf32> -> vector<8x128xf32>
    %c4 = arith.constant 4 : index
    %c0_24 = arith.constant 0 : index
    %35 = vector.load %arg8[%c4, %c0_24] : memref<8x256xf32, #tpu.memory_space<vmem>>, vector<1x128xf32>
    %36 = vector.broadcast %35 : vector<1x128xf32> to vector<8x128xf32>
    %37 = arith.addf %34, %36 : vector<8x128xf32>
    %cst_25 = arith.constant 0.000000e+00 : f32
    %38 = vector.broadcast %cst_25 : f32 to vector<8x128xf32>
    %39 = arith.maximumf %37, %38 : vector<8x128xf32>
    %40 = arith.truncf %39 : vector<8x128xf32> to vector<8x128xbf16>
    %c0_26 = arith.constant 0 : index
    %c0_27 = arith.constant 0 : index
    %41 = vector.load %arg7[%c0_26, %c0_27] : memref<128x128xbf16, #tpu.memory_space<vmem>>, vector<128x128xbf16>
    %cst_28 = arith.constant dense<0.000000e+00> : vector<8x128xf32>
    %42 = tpu.matmul %40, %41, %cst_28 {dimension_numbers = #tpu.dot_dimension_numbers<[1], [0], [0], [1], [0, 0, 1, 1], [], []>} : vector<8x128xbf16>, vector<128x128xbf16>, vector<8x128xf32> -> vector<8x128xf32>
    %c5 = arith.constant 5 : index
    %c0_29 = arith.constant 0 : index
    %43 = vector.load %arg8[%c5, %c0_29] : memref<8x256xf32, #tpu.memory_space<vmem>>, vector<1x128xf32>
    %44 = vector.broadcast %43 : vector<1x128xf32> to vector<8x128xf32>
    %45 = arith.addf %42, %44 : vector<8x128xf32>
    %c0_30 = arith.constant 0 : index
    %c0_31 = arith.constant 0 : index
    %46 = vector.load %arg9[%c0_30, %c0_31] : memref<8x128xf32, #tpu.memory_space<vmem>>, vector<8x128xf32>
    tpu.vector_store %arg9[%c0_30, %c0_31], %45 {strides = array<i32>} : memref<8x128xf32, #tpu.memory_space<vmem>>, vector<8x128xf32>,
    return
  }
  func.func @transform_0(%arg0: i32) -> (i32, i32) {
    %c0_i32 = arith.constant 0 : i32
    %c0_i32_0 = arith.constant 0 : i32
    return %arg0, %c0_i32 : i32, i32
  }
  func.func @transform_1(%arg0: i32) -> (i32, i32) {
    %c0_i32 = arith.constant 0 : i32
    %c0_i32_0 = arith.constant 0 : i32
    %c0_i32_1 = arith.constant 0 : i32
    return %c0_i32, %c0_i32_0 : i32, i32
  }
  func.func @transform_2(%arg0: i32) -> (i32, i32) {
    %c0_i32 = arith.constant 0 : i32
    %c0_i32_0 = arith.constant 0 : i32
    %c0_i32_1 = arith.constant 0 : i32
    return %c0_i32, %c0_i32_0 : i32, i32
  }
  func.func @transform_3(%arg0: i32) -> (i32, i32) {
    %c0_i32 = arith.constant 0 : i32
    %c0_i32_0 = arith.constant 0 : i32
    %c0_i32_1 = arith.constant 0 : i32
    return %c0_i32, %c0_i32_0 : i32, i32
  }
  func.func @transform_4(%arg0: i32) -> (i32, i32) {
    %c0_i32 = arith.constant 0 : i32
    %c0_i32_0 = arith.constant 0 : i32
    %c0_i32_1 = arith.constant 0 : i32
    return %c0_i32, %c0_i32_0 : i32, i32
  }
  func.func @transform_5(%arg0: i32) -> (i32, i32) {
    %c0_i32 = arith.constant 0 : i32
    %c0_i32_0 = arith.constant 0 : i32
    %c0_i32_1 = arith.constant 0 : i32
    return %c0_i32, %c0_i32_0 : i32, i32
  }
  func.func @transform_6(%arg0: i32) -> (i32, i32) {
    %c0_i32 = arith.constant 0 : i32
    %c0_i32_0 = arith.constant 0 : i32
    %c0_i32_1 = arith.constant 0 : i32
    return %c0_i32, %c0_i32_0 : i32, i32
  }
  func.func @transform_7(%arg0: i32) -> (i32, i32) {
    %c0_i32 = arith.constant 0 : i32
    %c0_i32_0 = arith.constant 0 : i32
    %c0_i32_1 = arith.constant 0 : i32
    return %c0_i32, %c0_i32_0 : i32, i32
  }
  func.func @transform_8(%arg0: i32) -> (i32, i32) {
    %c0_i32 = arith.constant 0 : i32
    %c0_i32_0 = arith.constant 0 : i32
    return %arg0, %c0_i32 : i32, i32
  }
}

module attributes {stable_mosaic.version = 11 : i64} {
  func.func @_svhn_mlp_kernel(%arg0: i32, %arg1: memref<8x3072xbf16, #tpu.memory_space<vmem>>, %arg2: memref<3072x256xbf16, #tpu.memory_space<vmem>>, %arg3: memref<256x128xbf16, #tpu.memory_space<vmem>>, %arg4: memref<128x128xbf16, #tpu.memory_space<vmem>>, %arg5: memref<128x128xbf16, #tpu.memory_space<vmem>>, %arg6: memref<128x128xbf16, #tpu.memory_space<vmem>>, %arg7: memref<128x128xbf16, #tpu.memory_space<vmem>>, %arg8: memref<8x256xf32, #tpu.memory_space<vmem>>, %arg9: memref<8x128xf32, #tpu.memory_space<vmem>>) attributes {dimension_semantics = [#tpu.dimension_semantics<parallel>], iteration_bounds = array<i64: 1>, scalar_prefetch = 0 : i64, scratch_operands = 0 : i64, tpu.core_type = #tpu.core_type<tc>, window_params = [{transform_indices = @transform_0, window_bounds = array<i64: 8, 3072>}, {pipeline_mode = #tpu.pipeline_mode<synchronous>, transform_indices = @transform_1, window_bounds = array<i64: 3072, 256>}, {pipeline_mode = #tpu.pipeline_mode<synchronous>, transform_indices = @transform_2, window_bounds = array<i64: 256, 128>}, {pipeline_mode = #tpu.pipeline_mode<synchronous>, transform_indices = @transform_3, window_bounds = array<i64: 128, 128>}, {pipeline_mode = #tpu.pipeline_mode<synchronous>, transform_indices = @transform_4, window_bounds = array<i64: 128, 128>}, {pipeline_mode = #tpu.pipeline_mode<synchronous>, transform_indices = @transform_5, window_bounds = array<i64: 128, 128>}, {pipeline_mode = #tpu.pipeline_mode<synchronous>, transform_indices = @transform_6, window_bounds = array<i64: 128, 128>}, {pipeline_mode = #tpu.pipeline_mode<synchronous>, transform_indices = @transform_7, window_bounds = array<i64: 8, 256>}, {transform_indices = @transform_8, window_bounds = array<i64: 8, 128>}]} {
    %c0 = arith.constant 0 : index
    %c0_0 = arith.constant 0 : index
    %0 = vector.load %arg1[%c0, %c0_0] : memref<8x3072xbf16, #tpu.memory_space<vmem>>, vector<8x3072xbf16>
    %c0_1 = arith.constant 0 : index
    %c0_2 = arith.constant 0 : index
    %1 = vector.load %arg2[%c0_1, %c0_2] : memref<3072x256xbf16, #tpu.memory_space<vmem>>, vector<3072x256xbf16>
    %cst = arith.constant dense<0.000000e+00> : vector<8x256xf32>
    %2 = tpu.matmul %0, %1, %cst {dimension_numbers = #tpu.dot_dimension_numbers<[1], [0], [0], [1], [0, 0, 1, 1], [], []>} : vector<8x3072xbf16>, vector<3072x256xbf16>, vector<8x256xf32> -> vector<8x256xf32>
    %c0_3 = arith.constant 0 : index
    %c0_4 = arith.constant 0 : index
    %3 = vector.load %arg8[%c0_3, %c0_4] : memref<8x256xf32, #tpu.memory_space<vmem>>, vector<1x256xf32>
    %4 = vector.broadcast %3 : vector<1x256xf32> to vector<8x256xf32>
    %5 = arith.addf %2, %4 : vector<8x256xf32>
    %cst_5 = arith.constant 0.000000e+00 : f32
    %6 = vector.broadcast %cst_5 : f32 to vector<8x256xf32>
    %7 = arith.maximumf %5, %6 : vector<8x256xf32>
    %8 = arith.truncf %7 : vector<8x256xf32> to vector<8x256xbf16>
    %c0_6 = arith.constant 0 : index
    %c0_7 = arith.constant 0 : index
    %9 = vector.load %arg3[%c0_6, %c0_7] : memref<256x128xbf16, #tpu.memory_space<vmem>>, vector<256x128xbf16>
    %cst_8 = arith.constant dense<0.000000e+00> : vector<8x128xf32>
    %10 = tpu.matmul %8, %9, %cst_8 {dimension_numbers = #tpu.dot_dimension_numbers<[1], [0], [0], [1], [0, 0, 1, 1], [], []>} : vector<8x256xbf16>, vector<256x128xbf16>, vector<8x128xf32> -> vector<8x128xf32>
    %c1 = arith.constant 1 : index
    %c0_9 = arith.constant 0 : index
    %11 = vector.load %arg8[%c1, %c0_9] : memref<8x256xf32, #tpu.memory_space<vmem>>, vector<1x128xf32>
    %12 = vector.broadcast %11 : vector<1x128xf32> to vector<8x128xf32>
    %13 = arith.addf %10, %12 : vector<8x128xf32>
    %cst_10 = arith.constant 0.000000e+00 : f32
    %14 = vector.broadcast %cst_10 : f32 to vector<8x128xf32>
    %15 = arith.maximumf %13, %14 : vector<8x128xf32>
    %16 = arith.truncf %15 : vector<8x128xf32> to vector<8x128xbf16>
    %c0_11 = arith.constant 0 : index
    %c0_12 = arith.constant 0 : index
    %17 = vector.load %arg4[%c0_11, %c0_12] : memref<128x128xbf16, #tpu.memory_space<vmem>>, vector<128x128xbf16>
    %cst_13 = arith.constant dense<0.000000e+00> : vector<8x128xf32>
    %18 = tpu.matmul %16, %17, %cst_13 {dimension_numbers = #tpu.dot_dimension_numbers<[1], [0], [0], [1], [0, 0, 1, 1], [], []>} : vector<8x128xbf16>, vector<128x128xbf16>, vector<8x128xf32> -> vector<8x128xf32>
    %c2 = arith.constant 2 : index
    %c0_14 = arith.constant 0 : index
    %19 = vector.load %arg8[%c2, %c0_14] : memref<8x256xf32, #tpu.memory_space<vmem>>, vector<1x128xf32>
    %20 = vector.broadcast %19 : vector<1x128xf32> to vector<8x128xf32>
    %21 = arith.addf %18, %20 : vector<8x128xf32>
    %cst_15 = arith.constant 0.000000e+00 : f32
    %22 = vector.broadcast %cst_15 : f32 to vector<8x128xf32>
    %23 = arith.maximumf %21, %22 : vector<8x128xf32>
    %24 = arith.truncf %23 : vector<8x128xf32> to vector<8x128xbf16>
    %c0_16 = arith.constant 0 : index
    %c0_17 = arith.constant 0 : index
    %25 = vector.load %arg5[%c0_16, %c0_17] : memref<128x128xbf16, #tpu.memory_space<vmem>>, vector<128x128xbf16>
    %cst_18 = arith.constant dense<0.000000e+00> : vector<8x128xf32>
    %26 = tpu.matmul %24, %25, %cst_18 {dimension_numbers = #tpu.dot_dimension_numbers<[1], [0], [0], [1], [0, 0, 1, 1], [], []>} : vector<8x128xbf16>, vector<128x128xbf16>, vector<8x128xf32> -> vector<8x128xf32>
    %c3 = arith.constant 3 : index
    %c0_19 = arith.constant 0 : index
    %27 = vector.load %arg8[%c3, %c0_19] : memref<8x256xf32, #tpu.memory_space<vmem>>, vector<1x128xf32>
    %28 = vector.broadcast %27 : vector<1x128xf32> to vector<8x128xf32>
    %29 = arith.addf %26, %28 : vector<8x128xf32>
    %cst_20 = arith.constant 0.000000e+00 : f32
    %30 = vector.broadcast %cst_20 : f32 to vector<8x128xf32>
    %31 = arith.maximumf %29, %30 : vector<8x128xf32>
    %32 = arith.truncf %31 : vector<8x128xf32> to vector<8x128xbf16>
    %c0_21 = arith.constant 0 : index
    %c0_22 = arith.constant 0 : index
    %33 = vector.load %arg6[%c0_21, %c0_22] : memref<128x128xbf16, #tpu.memory_space<vmem>>, vector<128x128xbf16>
    %cst_23 = arith.constant dense<0.000000e+00> : vector<8x128xf32>
    %34 = tpu.matmul %32, %33, %cst_23 {dimension_numbers = #tpu.dot_dimension_numbers<[1], [0], [0], [1], [0, 0, 1, 1], [], []>} : vector<8x128xbf16>, vector<128x128xbf16>, vector<8x128xf32> -> vector<8x128xf32>
    %c4 = arith.constant 4 : index
    %c0_24 = arith.constant 0 : index
    %35 = vector.load %arg8[%c4, %c0_24] : memref<8x256xf32, #tpu.memory_space<vmem>>, vector<1x128xf32>
    %36 = vector.broadcast %35 : vector<1x128xf32> to vector<8x128xf32>
    %37 = arith.addf %34, %36 : vector<8x128xf32>
    %cst_25 = arith.constant 0.000000e+00 : f32
    %38 = vector.broadcast %cst_25 : f32 to vector<8x128xf32>
    %39 = arith.maximumf %37, %38 : vector<8x128xf32>
    %40 = arith.truncf %39 : vector<8x128xf32> to vector<8x128xbf16>
    %c0_26 = arith.constant 0 : index
    %c0_27 = arith.constant 0 : index
    %41 = vector.load %arg7[%c0_26, %c0_27] : memref<128x128xbf16, #tpu.memory_space<vmem>>, vector<128x128xbf16>
    %cst_28 = arith.constant dense<0.000000e+00> : vector<8x128xf32>
    %42 = tpu.matmul %40, %41, %cst_28 {dimension_numbers = #tpu.dot_dimension_numbers<[1], [0], [0], [1], [0, 0, 1, 1], [], []>} : vector<8x128xbf16>, vector<128x128xbf16>, vector<8x128xf32> -> vector<8x128xf32>
    %c5 = arith.constant 5 : index
    %c0_29 = arith.constant 0 : index
    %43 = vector.load %arg8[%c5, %c0_29] : memref<8x256xf32, #tpu.memory_space<vmem>>, vector<1x128xf32>
    %44 = vector.broadcast %43 : vector<1x128xf32> to vector<8x128xf32>
    %45 = arith.addf %42, %44 : vector<8x128xf32>
    %c0_30 = arith.constant 0 : index
    %c0_31 = arith.constant 0 : index
    %46 = vector.load %arg9[%c0_30, %c0_31] : memref<8x128xf32, #tpu.memory_space<vmem>>, vector<8x128xf32>
    tpu.vector_store %arg9[%c0_30, %c0_31], %45 {strides = array<i32>} : memref<8x128xf32, #tpu.memory_space<vmem>>, vector<8x128xf32>,
    return
  }
  func.func @transform_0(%arg0: i32) -> (i32, i32) {
    %c0_i32 = arith.constant 0 : i32
    %c0_i32_0 = arith.constant 0 : i32
    return %arg0, %c0_i32 : i32, i32
  }
  func.func @transform_1(%arg0: i32) -> (i32, i32) {
    %c0_i32 = arith.constant 0 : i32
    %c0_i32_0 = arith.constant 0 : i32
    %c0_i32_1 = arith.constant 0 : i32
    return %c0_i32, %c0_i32_0 : i32, i32
  }
  func.func @transform_2(%arg0: i32) -> (i32, i32) {
    %c0_i32 = arith.constant 0 : i32
    %c0_i32_0 = arith.constant 0 : i32
    %c0_i32_1 = arith.constant 0 : i32
    return %c0_i32, %c0_i32_0 : i32, i32
  }
  func.func @transform_3(%arg0: i32) -> (i32, i32) {
    %c0_i32 = arith.constant 0 : i32
    %c0_i32_0 = arith.constant 0 : i32
    %c0_i32_1 = arith.constant 0 : i32
    return %c0_i32, %c0_i32_0 : i32, i32
  }
  func.func @transform_4(%arg0: i32) -> (i32, i32) {
    %c0_i32 = arith.constant 0 : i32
    %c0_i32_0 = arith.constant 0 : i32
    %c0_i32_1 = arith.constant 0 : i32
    return %c0_i32, %c0_i32_0 : i32, i32
  }
  func.func @transform_5(%arg0: i32) -> (i32, i32) {
    %c0_i32 = arith.constant 0 : i32
    %c0_i32_0 = arith.constant 0 : i32
    %c0_i32_1 = arith.constant 0 : i32
    return %c0_i32, %c0_i32_0 : i32, i32
  }
  func.func @transform_6(%arg0: i32) -> (i32, i32) {
    %c0_i32 = arith.constant 0 : i32
    %c0_i32_0 = arith.constant 0 : i32
    %c0_i32_1 = arith.constant 0 : i32
    return %c0_i32, %c0_i32_0 : i32, i32
  }
  func.func @transform_7(%arg0: i32) -> (i32, i32) {
    %c0_i32 = arith.constant 0 : i32
    %c0_i32_0 = arith.constant 0 : i32
    %c0_i32_1 = arith.constant 0 : i32
    return %c0_i32, %c0_i32_0 : i32, i32
  }
  func.func @transform_8(%arg0: i32) -> (i32, i32) {
    %c0_i32 = arith.constant 0 : i32
    %c0_i32_0 = arith.constant 0 : i32
    return %arg0, %c0_i32 : i32, i32
  }
}

</mosaic_0001>

<bundles_post_ra>
// kernel: tpu_custom_call.1
= control target key start
LH: loop header
LB: loop body
LE: loop exit
PB: predicated region body
PF: predicated region fallthrough
CT: control target
= control target key end

     0   :  { %13 = vsyncpa [#allocation3], 0  ;;  %s5455_s0 = inlined_call_operand.hbm [shape: bf16[8,3072], index: 0, kind: input, shape index: {}]   ;;  %s5456_s1 = inlined_call_operand.hbm [shape: bf16[3072,256], index: 1, kind: input, shape index: {}]   ;;  %s5457_s2 = inlined_call_operand.hbm [shape: bf16[256,128], index: 2, kind: input, shape index: {}]   ;;  %s5458_s3 = inlined_call_operand.hbm [shape: bf16[128,128], index: 3, kind: input, shape index: {}]   ;;  %s5459_s4 = inlined_call_operand.hbm [shape: bf16[128,128], index: 4, kind: input, shape index: {}]   ;;  %s5460_s5 = inlined_call_operand.hbm [shape: bf16[128,128], index: 5, kind: input, shape index: {}]   ;;  %s5461_s6 = inlined_call_operand.hbm [shape: bf16[128,128], index: 6, kind: input, shape index: {}]   ;;  %s5462_s7 = inlined_call_operand.hbm [shape: f32[8,256], index: 7, kind: input, shape index: {}]   ;;  %s5463_s8 = inlined_call_operand.hbm [shape: f32[8,128], index: 8, kind: output, shape index: {}]  }
   0x1   :  { %14 = vsyncpa [#allocation6], 0 }
   0x2   :  { %15 = vsyncpa [#allocation9], 0 }
   0x3   :  { %16 = vsyncpa [#allocation12], 0 }
   0x4   :  { %17 = vsyncpa [#allocation15], 0 }
   0x5   :  { %18 = vsyncpa [#allocation4], 0  ;;  %s5172_s27 = smov [#allocation5]   ;;  %s4962_s9 = scalar_lea.hbm %s5456_s1, 49152 }
   0x6   :  { %s34_s28 = sshll.u32 %s5172_s27, 4  ;;  %p4963_p0 = scmp.ne.s32.totalorder %s5456_s1, %s4962_s9  ;;  %s35_s28 = int_to_ptr.vmem [resolvable:$true] %s34_s28 }
   0x7   :  { %p4966_p1 = scmp.lt.u32.totalorder %s4962_s9, %s5456_s1 }
   0x9   :  { %p4968_p2 = pnand %p4966_p1, %p4963_p0 }
   0xb   :  { %4971 = shalt.err (!%p4968_p2)
}
   0xc   :  { %s4972_s14 = scalar_lea.vmem %s35_s28, 49152  ;;  %p4977_p4 = scmp.lt.s32.totalorder %s35_s28, %s35_s28 }
   0xd   :  { %p4973_p3 = scmp.ne.s32.totalorder %s35_s28, %s4972_s14  ;;  %p4978_p5 = scmp.lt.s32.totalorder %s4972_s14, %s4972_s14 }
   0xf   :  { %p4979_p6 = por %p4978_p5, %p4977_p4 }
  0x11   :  { %p4980_p7 = pnand %p4979_p6, %p4973_p3 }
  0x13   :  { %4983 = shalt.err (!%p4980_p7)
}
  0x14   :  { %s5173_s15 = smov 128   ;;  %s5174_s16 = smov 8  }
  0x15   :  { %40 = dma.hbm_to_vmem [thread:$0]  %s5456_s1, 49152, %s35_s28, [#allocation6], %s5173_s15, %s5173_s15, %s5174_s16  }
  0x16   :  { %s5175_s19 = smov [#allocation8]   ;;  %s5176_s21 = smov [#allocation11]  }
  0x17   :  { %s58_s20 = sshll.u32 %s5175_s19, 4  ;;  %s82_s22 = sshll.u32 %s5176_s21, 4  ;;  %s59_s20 = int_to_ptr.vmem [resolvable:$true] %s58_s20  ;;  %s83_s22 = int_to_ptr.vmem [resolvable:$true] %s82_s22 }
  0x18   :  { %s4984_s25 = scalar_lea.hbm %s5458_s3, 1024 }
  0x19   :  { %p4985_p8 = scmp.ne.s32.totalorder %s5458_s3, %s4984_s25  ;;  %p4988_p9 = scmp.lt.u32.totalorder %s4984_s25, %s5458_s3 }
  0x1b   :  { %p4990_p10 = pnand %p4988_p9, %p4985_p8 }
  0x1d   :  { %4993 = shalt.err (!%p4990_p10)
}
  0x1e   :  { %s4994_s1 = scalar_lea.vmem %s59_s20, 1024  ;;  %p4999_p12 = scmp.lt.s32.totalorder %s59_s20, %s59_s20 }
  0x1f   :  { %p4995_p11 = scmp.ne.s32.totalorder %s59_s20, %s4994_s1  ;;  %p5000_p13 = scmp.lt.s32.totalorder %s4994_s1, %s4994_s1 }
  0x21   :  { %p5001_p0 = por %p5000_p13, %p4999_p12 }
  0x23   :  { %p5002_p1 = pnand %p5001_p0, %p4995_p11 }
  0x25   :  { %5005 = shalt.err (!%p5002_p1)
}
  0x26   :  { %s5177_s28 = smov 64   ;;  %s5178_s9 = smov 4  }
  0x27   :  { %64 = dma.hbm_to_vmem [thread:$0]  %s5458_s3, 1024, %s59_s20, [#allocation9], %s5177_s28, %s5177_s28, %s5178_s9  }
  0x28   :  { %s5006_s14 = scalar_lea.hbm %s5460_s5, 1024 }
  0x29   :  { %p5007_p2 = scmp.ne.s32.totalorder %s5460_s5, %s5006_s14  ;;  %p5010_p3 = scmp.lt.u32.totalorder %s5006_s14, %s5460_s5 }
  0x2b   :  { %p5012_p4 = pnand %p5010_p3, %p5007_p2 }
  0x2d   :  { %5015 = shalt.err (!%p5012_p4)
}
  0x2e   :  { %s5016_s19 = scalar_lea.vmem %s83_s22, 1024  ;;  %p5021_p6 = scmp.lt.s32.totalorder %s83_s22, %s83_s22 }
  0x2f   :  { %p5017_p5 = scmp.ne.s32.totalorder %s83_s22, %s5016_s19  ;;  %p5022_p7 = scmp.lt.s32.totalorder %s5016_s19, %s5016_s19 }
  0x31   :  { %p5023_p8 = por %p5022_p7, %p5021_p6 }
  0x33   :  { %p5024_p9 = pnand %p5023_p8, %p5017_p5 }
  0x35   :  { %5027 = shalt.err (!%p5024_p9)
}
  0x36   :  { %88 = dma.hbm_to_vmem [thread:$0]  %s5460_s5, 1024, %s83_s22, [#allocation12], %s5177_s28, %s5177_s28, %s5178_s9  }
  0x37   :  { %s5179_s21 = smov [#allocation2]   ;;  %s5180_s24 = smov [#allocation7]  }
  0x38   :  { %s25_s23 = sshll.u32 %s5179_s21, 4  ;;  %s46_s25 = sshll.u32 %s5180_s24, 4  ;;  %s26_s23 = int_to_ptr.vmem [resolvable:$true] %s25_s23  ;;  %s47_s25 = int_to_ptr.vmem [resolvable:$true] %s46_s25 }
  0x39   :  { %s5028_s29 = scalar_lea.hbm %s5455_s0, 1536 }
  0x3a   :  { %p5029_p10 = scmp.ne.s32.totalorder %s5455_s0, %s5028_s29  ;;  %p5032_p11 = scmp.lt.u32.totalorder %s5028_s29, %s5455_s0 }
  0x3c   :  { %p5034_p12 = pnand %p5032_p11, %p5029_p10 }
  0x3e   :  { %5037 = shalt.err (!%p5034_p12)
}
  0x3f   :  { %s5038_s5 = scalar_lea.vmem %s26_s23, 1536  ;;  %p5043_p0 = scmp.lt.s32.totalorder %s26_s23, %s26_s23 }
  0x40   :  { %p5039_p13 = scmp.ne.s32.totalorder %s26_s23, %s5038_s5  ;;  %p5044_p1 = scmp.lt.s32.totalorder %s5038_s5, %s5038_s5 }
  0x42   :  { %p5045_p2 = por %p5044_p1, %p5043_p0 }
  0x44   :  { %p5046_p3 = pnand %p5045_p2, %p5039_p13 }
  0x46   :  { %5049 = shalt.err (!%p5046_p3)
}
  0x47   :  { %28 = dma.hbm_to_vmem [thread:$0]  %s5455_s0, 1536, %s26_s23, [#allocation3]  }
  0x48   :  { %s5050_s15 = scalar_lea.hbm %s5457_s2, 2048 }
  0x49   :  { %p5051_p4 = scmp.ne.s32.totalorder %s5457_s2, %s5050_s15  ;;  %p5054_p5 = scmp.lt.u32.totalorder %s5050_s15, %s5457_s2 }
  0x4b   :  { %p5056_p6 = pnand %p5054_p5, %p5051_p4 }
  0x4d   :  { %5059 = shalt.err (!%p5056_p6)
}
  0x4e   :  { %s5060_s3 = scalar_lea.vmem %s47_s25, 2048  ;;  %p5065_p8 = scmp.lt.s32.totalorder %s47_s25, %s47_s25 }
  0x4f   :  { %p5061_p7 = scmp.ne.s32.totalorder %s47_s25, %s5060_s3  ;;  %p5066_p9 = scmp.lt.s32.totalorder %s5060_s3, %s5060_s3 }
  0x51   :  { %p5067_p10 = por %p5066_p9, %p5065_p8 }
  0x53   :  { %p5068_p11 = pnand %p5067_p10, %p5061_p7 }
  0x55   :  { %5071 = shalt.err (!%p5068_p11)
}
  0x56   :  { %52 = dma.hbm_to_vmem [thread:$0]  %s5457_s2, 2048, %s47_s25, [#allocation6], %s5177_s28, %s5177_s28, %s5178_s9  }
  0x57   :  { %s5181_s21 = smov [#allocation10]   ;;  %s5182_s24 = smov [#allocation13]  }
  0x58   :  { %s70_s23 = sshll.u32 %s5181_s21, 4  ;;  %s94_s26 = sshll.u32 %s5182_s24, 4  ;;  %s71_s23 = int_to_ptr.vmem [resolvable:$true] %s70_s23  ;;  %s95_s26 = int_to_ptr.vmem [resolvable:$true] %s94_s26 }
  0x59   :  { %s5072_s30 = scalar_lea.hbm %s5459_s4, 1024 }
  0x5a   :  { %p5073_p12 = scmp.ne.s32.totalorder %s5459_s4, %s5072_s30  ;;  %p5076_p13 = scmp.lt.u32.totalorder %s5072_s30, %s5459_s4 }
  0x5c   :  { %p5078_p0 = pnand %p5076_p13, %p5073_p12 }
  0x5e   :  { %5081 = shalt.err (!%p5078_p0)
}
  0x5f   :  { %s5082_s2 = scalar_lea.vmem %s71_s23, 1024  ;;  %p5087_p2 = scmp.lt.s32.totalorder %s71_s23, %s71_s23 }
  0x60   :  { %p5083_p1 = scmp.ne.s32.totalorder %s71_s23, %s5082_s2  ;;  %p5088_p3 = scmp.lt.s32.totalorder %s5082_s2, %s5082_s2 }
  0x62   :  { %p5089_p4 = por %p5088_p3, %p5087_p2 }
  0x64   :  { %p5090_p5 = pnand %p5089_p4, %p5083_p1 }
  0x66   :  { %5093 = shalt.err (!%p5090_p5)
}
  0x67   :  { %76 = dma.hbm_to_vmem [thread:$0]  %s5459_s4, 1024, %s71_s23, [#allocation9], %s5177_s28, %s5177_s28, %s5178_s9  }
  0x68   :  { %s5094_s14 = scalar_lea.hbm %s5461_s6, 1024 }
  0x69   :  { %p5095_p6 = scmp.ne.s32.totalorder %s5461_s6, %s5094_s14  ;;  %p5098_p7 = scmp.lt.u32.totalorder %s5094_s14, %s5461_s6 }
  0x6b   :  { %p5100_p8 = pnand %p5098_p7, %p5095_p6 }
  0x6d   :  { %5103 = shalt.err (!%p5100_p8)
}
  0x6e   :  { %s5104_s19 = scalar_lea.vmem %s95_s26, 1024  ;;  %p5109_p10 = scmp.lt.s32.totalorder %s95_s26, %s95_s26 }
  0x6f   :  { %p5105_p9 = scmp.ne.s32.totalorder %s95_s26, %s5104_s19  ;;  %p5110_p11 = scmp.lt.s32.totalorder %s5104_s19, %s5104_s19 }
  0x71   :  { %p5111_p12 = por %p5110_p11, %p5109_p10 }
  0x73   :  { %p5112_p13 = pnand %p5111_p12, %p5105_p9 }
  0x75   :  { %5115 = shalt.err (!%p5112_p13)
}
  0x76   :  { %100 = dma.hbm_to_vmem [thread:$0]  %s5461_s6, 1024, %s95_s26, [#allocation12], %s5177_s28, %s5177_s28, %s5178_s9  }
  0x77   :  { %s5183_s0 = smov [#allocation14]   ;;  %s5116_s24 = scalar_lea.hbm %s5462_s7, 256 }
  0x78   :  { %s107_s20 = sshll.u32 %s5183_s0, 4  ;;  %p5117_p0 = scmp.ne.s32.totalorder %s5462_s7, %s5116_s24  ;;  %s108_s20 = int_to_ptr.vmem [resolvable:$true] %s107_s20 }
  0x79   :  { %p5120_p1 = scmp.lt.u32.totalorder %s5116_s24, %s5462_s7 }
  0x7b   :  { %p5122_p2 = pnand %p5120_p1, %p5117_p0 }
  0x7d   :  { %5125 = shalt.err (!%p5122_p2)
}
  0x7e   :  { %s5126_s10 = scalar_lea.vmem %s108_s20, 256  ;;  %p5131_p4 = scmp.lt.s32.totalorder %s108_s20, %s108_s20 }
  0x7f   :  { %p5127_p3 = scmp.ne.s32.totalorder %s108_s20, %s5126_s10  ;;  %p5132_p5 = scmp.lt.s32.totalorder %s5126_s10, %s5126_s10 }
  0x81   :  { %p5133_p6 = por %p5132_p5, %p5131_p4 }
  0x83   :  { %p5134_p7 = pnand %p5133_p6, %p5127_p3 }
  0x85   :  { %5137 = shalt.err (!%p5134_p7)
}
  0x86   :  { %110 = dma.hbm_to_vmem [thread:$0]  %s5462_s7, 256, %s108_s20, [#allocation15]  }
  0x87   :  { %5160 = dma.done.wait [#allocation3], 1536  }
  0x88   :  { %5161 = vsyncadd [#allocation3], 4294965760 }
  0x89   :  { %5162 = dma.done.wait [#allocation6], 51200  }
  0x8a   :  { %5163 = vsyncadd [#allocation6], 4294916096 }
  0x8b   :  { %5164 = dma.done.wait [#allocation9], 2048  }
  0x8c   :  { %5165 = vsyncadd [#allocation9], 4294965248 }
  0x8d   :  { %5166 = dma.done.wait [#allocation12], 2048  }
  0x8e   :  { %5167 = vsyncadd [#allocation12], 4294965248 }
  0x8f   :  { %5168 = dma.done.wait [#allocation15], 256  }
  0x90   :  { %5169 = vsyncadd [#allocation15], 4294967040  ;;  %v4314_v0 = vld [vmem:[#allocation5 + $0x4] ss:$8 sps:$4 sm:$0xff]   ;;  %v4318_v2 = vld [vmem:[#allocation5] ss:$8 sps:$4 sm:$0xff]  }
  0x91   :  { %v4316_v1 = vld [vmem:[#allocation5 + $0x504] ss:$8 sps:$4 sm:$0xff]   ;;  %2548 = vmatprep.subr.bf16.mxu1 %v4314_v0  ;;  %v4319_v3 = vld [vmem:[#allocation5 + $0x500] ss:$8 sps:$4 sm:$0xff]   ;;  %v4320_v4 = vld [vmem:[#allocation5 + $0x14] ss:$8 sps:$4 sm:$0xff]  }
  0x92   :  { %2753 = vmatprep.subr.bf16.mxu0 %v4316_v1  ;;  %2549 = vmatpush1.bf16.msra.mxu1 %v4318_v2  ;;  %v4322_v5 = vld [vmem:[#allocation5 + $0x514] ss:$8 sps:$4 sm:$0xff]   ;;  %v4324_v6 = vld [vmem:[#allocation5 + $0x10] ss:$8 sps:$4 sm:$0xff]   ;;  %v4326_v8 = vld [vmem:[#allocation5 + $0x24] ss:$8 sps:$4 sm:$0xff]  }
  0x93   :  { %2754 = vmatpush1.bf16.msra.mxu0 %v4319_v3  ;;  %2550 = vmatprep.subr.bf16.mxu1 %v4320_v4  ;;  %v4325_v7 = vld [vmem:[#allocation5 + $0x510] ss:$8 sps:$4 sm:$0xff]   ;;  %v4328_v9 = vld [vmem:[#allocation5 + $0x524] ss:$8 sps:$4 sm:$0xff]   ;;  %v4330_v10 = vld [vmem:[#allocation5 + $0x20] ss:$8 sps:$4 sm:$0xff]  }
  0x94   :  { %2755 = vmatprep.subr.bf16.mxu0 %v4322_v5  ;;  %v4331_v11 = vld [vmem:[#allocation5 + $0x520] ss:$8 sps:$4 sm:$0xff]   ;;  %v4332_v12 = vld [vmem:[#allocation5 + $0x34] ss:$8 sps:$4 sm:$0xff]   ;;  %v4336_v14 = vld [vmem:[#allocation5 + $0x30] ss:$8 sps:$4 sm:$0xff]  }
  0x95   :  { %v4334_v13 = vld [vmem:[#allocation5 + $0x534] ss:$8 sps:$4 sm:$0xff]   ;;  %v4337_v15 = vld [vmem:[#allocation5 + $0x530] ss:$8 sps:$4 sm:$0xff]   ;;  %v4338_v16 = vld [vmem:[#allocation5 + $0x44] ss:$8 sps:$4 sm:$0xff]  }
  0x96   :  { %2551 = vmatpush1.bf16.msra.mxu1 %v4324_v6  ;;  %v4340_v17 = vld [vmem:[#allocation5 + $0x544] ss:$8 sps:$4 sm:$0xff]   ;;  %v4342_v18 = vld [vmem:[#allocation5 + $0x40] ss:$8 sps:$4 sm:$0xff]   ;;  %v4344_v20 = vld [vmem:[#allocation5 + $0x54] ss:$8 sps:$4 sm:$0xff]  }
  0x97   :  { %2756 = vmatpush1.bf16.msra.mxu0 %v4325_v7  ;;  %2552 = vmatprep.subr.bf16.mxu1 %v4326_v8  ;;  %v4343_v19 = vld [vmem:[#allocation5 + $0x540] ss:$8 sps:$4 sm:$0xff]   ;;  %v4346_v21 = vld [vmem:[#allocation5 + $0x554] ss:$8 sps:$4 sm:$0xff]   ;;  %v4348_v22 = vld [vmem:[#allocation5 + $0x50] ss:$8 sps:$4 sm:$0xff]  }
  0x98   :  { %2757 = vmatprep.subr.bf16.mxu0 %v4328_v9  ;;  %v4349_v23 = vld [vmem:[#allocation5 + $0x550] ss:$8 sps:$4 sm:$0xff]   ;;  %v4350_v24 = vld [vmem:[#allocation5 + $0x64] ss:$8 sps:$4 sm:$0xff]   ;;  %v4354_v26 = vld [vmem:[#allocation5 + $0x60] ss:$8 sps:$4 sm:$0xff]  }
  0x99   :  { %v4352_v25 = vld [vmem:[#allocation5 + $0x564] ss:$8 sps:$4 sm:$0xff]   ;;  %v4355_v27 = vld [vmem:[#allocation5 + $0x560] ss:$8 sps:$4 sm:$0xff]   ;;  %v4356_v28 = vld [vmem:[#allocation5 + $0x74] ss:$8 sps:$4 sm:$0xff]  }
  0x9a   :  { %2553 = vmatpush1.bf16.msra.mxu1 %v4330_v10  ;;  %v4358_v29 = vld [vmem:[#allocation5 + $0x574] ss:$8 sps:$4 sm:$0xff]   ;;  %v4360_v30 = vld [vmem:[#allocation5 + $0x70] ss:$8 sps:$4 sm:$0xff]   ;;  %v4362_v32 = vld [vmem:[#allocation5 + $0x84] ss:$8 sps:$4 sm:$0xff]  }
  0x9b   :  { %2758 = vmatpush1.bf16.msra.mxu0 %v4331_v11  ;;  %2554 = vmatprep.subr.bf16.mxu1 %v4332_v12  ;;  %v4361_v31 = vld [vmem:[#allocation5 + $0x570] ss:$8 sps:$4 sm:$0xff]   ;;  %v4364_v33 = vld [vmem:[#allocation5 + $0x584] ss:$8 sps:$4 sm:$0xff]   ;;  %v4366_v34 = vld [vmem:[#allocation5 + $0x80] ss:$8 sps:$4 sm:$0xff]  }
  0x9c   :  { %2759 = vmatprep.subr.bf16.mxu0 %v4334_v13  ;;  %v4367_v35 = vld [vmem:[#allocation5 + $0x580] ss:$8 sps:$4 sm:$0xff]   ;;  %v4368_v36 = vld [vmem:[#allocation5 + $0x94] ss:$8 sps:$4 sm:$0xff]   ;;  %v4372_v38 = vld [vmem:[#allocation5 + $0x90] ss:$8 sps:$4 sm:$0xff]  }
  0x9d   :  { %v4370_v37 = vld [vmem:[#allocation5 + $0x594] ss:$8 sps:$4 sm:$0xff]   ;;  %v4373_v39 = vld [vmem:[#allocation5 + $0x590] ss:$8 sps:$4 sm:$0xff]   ;;  %v4374_v40 = vld [vmem:[#allocation5 + $0xa4] ss:$8 sps:$4 sm:$0xff]  }
  0x9e   :  { %2555 = vmatpush1.bf16.msra.mxu1 %v4336_v14  ;;  %v4376_v41 = vld [vmem:[#allocation5 + $0x5a4] ss:$8 sps:$4 sm:$0xff]   ;;  %v4378_v42 = vld [vmem:[#allocation5 + $0xa0] ss:$8 sps:$4 sm:$0xff]   ;;  %v4380_v44 = vld [vmem:[#allocation5 + $0xb4] ss:$8 sps:$4 sm:$0xff]  }
  0x9f   :  { %2760 = vmatpush1.bf16.msra.mxu0 %v4337_v15  ;;  %2556 = vmatprep.subr.bf16.mxu1 %v4338_v16  ;;  %v4379_v43 = vld [vmem:[#allocation5 + $0x5a0] ss:$8 sps:$4 sm:$0xff]   ;;  %v4382_v45 = vld [vmem:[#allocation5 + $0x5b4] ss:$8 sps:$4 sm:$0xff]   ;;  %v4384_v47 = vld [vmem:[#allocation5 + $0xb0] ss:$8 sps:$4 sm:$0xff]  }
  0xa0   :  { %2761 = vmatprep.subr.bf16.mxu0 %v4340_v17  ;;  %v136_v46 = vld [vmem:[#allocation2] sm:$0xff]  ;;  %v4385_v49 = vld [vmem:[#allocation5 + $0x5b0] ss:$8 sps:$4 sm:$0xff]   ;;  %v141_v50 = vld [vmem:[#allocation2 + $0x28] sm:$0xff]  ;;  %vm5185_vm0 = vmmov 0   ;;  %s5186_s7 = smov [#allocation16]  }
  0xa1   :  { %v3662_v48 = vcombine.high %v136_v46, %v136_v46  ;;  %v4386_v51 = vld [vmem:[#allocation5 + $0xc4] ss:$8 sps:$4 sm:$0xff]   ;;  %v3672_v53 = vcombine.high %v141_v50, %v141_v50  ;;  %v4390_v54 = vld [vmem:[#allocation5 + $0xc0] ss:$8 sps:$4 sm:$0xff]   ;;  %v4392_v56 = vld [vmem:[#allocation5 + $0xd4] ss:$8 sps:$4 sm:$0xff]   ;;  %v3661_v6 = vcombine.low %v136_v46, %v136_v46  ;;  %v3671_v7 = vcombine.low %v141_v50, %v141_v50 }
  0xa2   :  { %2557 = vmatpush1.bf16.msra.mxu1 %v4342_v18  ;;  %v4388_v52 = vld [vmem:[#allocation5 + $0x5c4] ss:$8 sps:$4 sm:$0xff]   ;;  %v4391_v55 = vld [vmem:[#allocation5 + $0x5c0] ss:$8 sps:$4 sm:$0xff]   ;;  %v4394_v57 = vld [vmem:[#allocation5 + $0x5d4] ss:$8 sps:$4 sm:$0xff]  }
  0xa3   :  { %2762 = vmatpush1.bf16.msra.mxu0 %v4343_v19  ;;  %2558 = vmatprep.subr.bf16.mxu1 %v4344_v20  ;;  %v4396_v58 = vld [vmem:[#allocation5 + $0xd0] ss:$8 sps:$4 sm:$0xff]   ;;  %v4398_v60 = vld [vmem:[#allocation5 + $0xe4] ss:$8 sps:$4 sm:$0xff]   ;;  %v4402_v62 = vld [vmem:[#allocation5 + $0xe0] ss:$8 sps:$4 sm:$0xff]  }
  0xa4   :  { %2763 = vmatprep.subr.bf16.mxu0 %v4346_v21  ;;  %2580 = vmatprep.mubr.bf16.mxu1 %v3662_v48  ;;  %v4397_v59 = vld [vmem:[#allocation5 + $0x5d0] ss:$8 sps:$4 sm:$0xff]   ;;  %v4400_v61 = vld [vmem:[#allocation5 + $0x5e4] ss:$8 sps:$4 sm:$0xff]   ;;  %v4403_v63 = vld [vmem:[#allocation5 + $0x5e0] ss:$8 sps:$4 sm:$0xff]  }
  0xa5   :  { %2785 = vmatprep.mubr.bf16.mxu0 %v3672_v53  ;;  %v4404_v0 = vld [vmem:[#allocation5 + $0xf4] ss:$8 sps:$4 sm:$0xff]   ;;  %v4408_v2 = vld [vmem:[#allocation5 + $0xf0] ss:$8 sps:$4 sm:$0xff]   ;;  %v4414_v4 = vld [vmem:[#allocation5 + $0x104] ss:$8 sps:$4 sm:$0xff]  }
  0xa6   :  { %2559 = vmatpush1.bf16.msra.mxu1 %v4348_v22  ;;  %v4406_v1 = vld [vmem:[#allocation5 + $0x5f4] ss:$8 sps:$4 sm:$0xff]   ;;  %v4409_v3 = vld [vmem:[#allocation5 + $0x5f0] ss:$8 sps:$4 sm:$0xff]   ;;  %v4419_v5 = vld [vmem:[#allocation5 + $0x604] ss:$8 sps:$4 sm:$0xff]  }
  0xa7   :  { %2764 = vmatpush1.bf16.msra.mxu0 %v4349_v23  ;;  %2560 = vmatprep.subr.bf16.mxu1 %v4350_v24  ;;  %v4412_v8 = vld [vmem:[#allocation5 + $0x100] ss:$8 sps:$4 sm:$0xff]   ;;  %v4422_v10 = vld [vmem:[#allocation5 + $0x114] ss:$8 sps:$4 sm:$0xff]   ;;  %v4420_v12 = vld [vmem:[#allocation5 + $0x110] ss:$8 sps:$4 sm:$0xff]  }
  0xa8   :  { %2765 = vmatprep.subr.bf16.mxu0 %v4352_v25  ;;  %v4417_v9 = vld [vmem:[#allocation5 + $0x600] ss:$8 sps:$4 sm:$0xff]   ;;  %v4425_v11 = vld [vmem:[#allocation5 + $0x614] ss:$8 sps:$4 sm:$0xff]   ;;  %v4423_v13 = vld [vmem:[#allocation5 + $0x610] ss:$8 sps:$4 sm:$0xff]  }
  0xa9   :  { %v4428_v14 = vld [vmem:[#allocation5 + $0x124] ss:$8 sps:$4 sm:$0xff]   ;;  %v4426_v16 = vld [vmem:[#allocation5 + $0x120] ss:$8 sps:$4 sm:$0xff]   ;;  %v4434_v18 = vld [vmem:[#allocation5 + $0x134] ss:$8 sps:$4 sm:$0xff]  }
  0xaa   :  { %2561 = vmatpush1.bf16.msra.mxu1 %v4354_v26  ;;  %v4431_v15 = vld [vmem:[#allocation5 + $0x624] ss:$8 sps:$4 sm:$0xff]   ;;  %v4429_v17 = vld [vmem:[#allocation5 + $0x620] ss:$8 sps:$4 sm:$0xff]   ;;  %v4437_v19 = vld [vmem:[#allocation5 + $0x634] ss:$8 sps:$4 sm:$0xff]  }
  0xab   :  { %2766 = vmatpush1.bf16.msra.mxu0 %v4355_v27  ;;  %2562 = vmatprep.subr.bf16.mxu1 %v4356_v28  ;;  %v4432_v20 = vld [vmem:[#allocation5 + $0x130] ss:$8 sps:$4 sm:$0xff]   ;;  %v4440_v22 = vld [vmem:[#allocation5 + $0x144] ss:$8 sps:$4 sm:$0xff]   ;;  %v4438_v24 = vld [vmem:[#allocation5 + $0x140] ss:$8 sps:$4 sm:$0xff]  }
  0xac   :  { %2767 = vmatprep.subr.bf16.mxu0 %v4358_v29  ;;  %v4435_v21 = vld [vmem:[#allocation5 + $0x630] ss:$8 sps:$4 sm:$0xff]   ;;  %v4443_v23 = vld [vmem:[#allocation5 + $0x644] ss:$8 sps:$4 sm:$0xff]   ;;  %v4441_v25 = vld [vmem:[#allocation5 + $0x640] ss:$8 sps:$4 sm:$0xff]  }
  0xad   :  { %v4446_v26 = vld [vmem:[#allocation5 + $0x154] ss:$8 sps:$4 sm:$0xff]   ;;  %v4444_v28 = vld [vmem:[#allocation5 + $0x150] ss:$8 sps:$4 sm:$0xff]   ;;  %v4476_v50 = vld [vmem:[#allocation5 + $0x1a4] ss:$8 sps:$4 sm:$0xff]  }
  0xae   :  { %2563 = vmatpush1.bf16.msra.mxu1 %v4360_v30  ;;  %v4449_v27 = vld [vmem:[#allocation5 + $0x654] ss:$8 sps:$4 sm:$0xff]   ;;  %v4447_v29 = vld [vmem:[#allocation5 + $0x650] ss:$8 sps:$4 sm:$0xff]   ;;  %v4452_v30 = vld [vmem:[#allocation5 + $0x164] ss:$8 sps:$4 sm:$0xff]  }
  0xaf   :  { %2768 = vmatpush1.bf16.msra.mxu0 %v4361_v31  ;;  %2564 = vmatprep.subr.bf16.mxu1 %v4362_v32  ;;  %v4455_v31 = vld [vmem:[#allocation5 + $0x664] ss:$8 sps:$4 sm:$0xff]   ;;  %v4470_v46 = vld [vmem:[#allocation5 + $0x194] ss:$8 sps:$4 sm:$0xff]   ;;  %v4468_v48 = vld [vmem:[#allocation5 + $0x190] ss:$8 sps:$4 sm:$0xff]  }
  0xb0   :  { %2769 = vmatprep.subr.bf16.mxu0 %v4364_v33  ;;  %v5343_v32 = vld [vmem:[#allocation2 + $0x8] sm:$0xff]  ;;  %s3648_s9 = sshll.u32 %s5186_s7, 4  ;;  %s3649_s9 = int_to_ptr.vmem [resolvable:$true] %s3648_s9 }
  0xb1   :  { %v4450_v33 = vld [vmem:[#allocation5 + $0x160] ss:$8 sps:$4 sm:$0xff]   ;;  %s5138_s26 = scalar_lea.vmem %s3649_s9, 128  ;;  %p5143_p9 = scmp.lt.s32.totalorder %s3649_s9, %s3649_s9 }
  0xb2   :  { %2565 = vmatpush1.bf16.msra.mxu1 %v4366_v34  ;;  %v4453_v34 = vld [vmem:[#allocation5 + $0x660] ss:$8 sps:$4 sm:$0xff]   ;;  %p5139_p8 = scmp.ne.s32.totalorder %s3649_s9, %s5138_s26  ;;  %p5144_p10 = scmp.lt.s32.totalorder %s5138_s26, %s5138_s26 }
  0xb3   :  { %2770 = vmatpush1.bf16.msra.mxu0 %v4367_v35  ;;  %2566 = vmatprep.subr.bf16.mxu1 %v4368_v36  ;;  %v3664_v35 = vcombine.high %v5343_v32, %v5343_v32  ;;  %v5347_v36 = vld [vmem:[#allocation2 + $0x30] sm:$0xff]  ;;  %v4477_v53 = vld [vmem:[#allocation5 + $0x6a0] ss:$8 sps:$4 sm:$0xff]  }
  0xb4   :  { %2771 = vmatprep.subr.bf16.mxu0 %v4370_v37  ;;  %v4458_v37 = vld [vmem:[#allocation5 + $0x174] ss:$8 sps:$4 sm:$0xff]   ;;  %p5145_p11 = por %p5144_p10, %p5143_p9 }
  0xb6   :  { %2567 = vmatpush1.bf16.msra.mxu1 %v4372_v38  ;;  %v3674_v38 = vcombine.high %v5347_v36, %v5347_v36  ;;  %p5146_p12 = pnand %p5145_p11, %p5139_p8 }
  0xb7   :  { %2772 = vmatpush1.bf16.msra.mxu0 %v4373_v39  ;;  %2568 = vmatprep.subr.bf16.mxu1 %v4374_v40  ;;  %v4461_v39 = vld [vmem:[#allocation5 + $0x674] ss:$8 sps:$4 sm:$0xff]   ;;  %v4456_v40 = vld [vmem:[#allocation5 + $0x170] ss:$8 sps:$4 sm:$0xff]  }
  0xb8   :  { %2773 = vmatprep.subr.bf16.mxu0 %v4376_v41  ;;  %v4459_v41 = vld [vmem:[#allocation5 + $0x670] ss:$8 sps:$4 sm:$0xff]  }
  0xba   :  { %2569 = vmatpush1.bf16.msra.mxu1 %v4378_v42  ;;  %v4464_v42 = vld [vmem:[#allocation5 + $0x184] ss:$8 sps:$4 sm:$0xff]  }
  0xbb   :  { %2774 = vmatpush1.bf16.msra.mxu0 %v4379_v43  ;;  %2570 = vmatprep.subr.bf16.mxu1 %v4380_v44  ;;  %v4467_v43 = vld [vmem:[#allocation5 + $0x684] ss:$8 sps:$4 sm:$0xff]   ;;  %v4462_v44 = vld [vmem:[#allocation5 + $0x180] ss:$8 sps:$4 sm:$0xff]  }
  0xbc   :  { %2775 = vmatprep.subr.bf16.mxu0 %v4382_v45  ;;  %v4465_v45 = vld [vmem:[#allocation5 + $0x680] ss:$8 sps:$4 sm:$0xff]  }
  0xbe   :  { %2571 = vmatpush1.bf16.msra.mxu1 %v4384_v47  ;;  %v4473_v47 = vld [vmem:[#allocation5 + $0x694] ss:$8 sps:$4 sm:$0xff]  }
  0xbf   :  { %2776 = vmatpush1.bf16.msra.mxu0 %v4385_v49  ;;  %2572 = vmatprep.subr.bf16.mxu1 %v4386_v51  ;;  %v4471_v49 = vld [vmem:[#allocation5 + $0x690] ss:$8 sps:$4 sm:$0xff]   ;;  %v4479_v51 = vld [vmem:[#allocation5 + $0x6a4] ss:$8 sps:$4 sm:$0xff]  }
  0xc0   :  { %2777 = vmatprep.subr.bf16.mxu0 %v4388_v52  ;;  %v4474_v52 = vld [vmem:[#allocation5 + $0x1a0] ss:$8 sps:$4 sm:$0xff]  }
  0xc2   :  { %2573 = vmatpush1.bf16.msra.mxu1 %v4390_v54  ;;  %v4482_v54 = vld [vmem:[#allocation5 + $0x1b4] ss:$8 sps:$4 sm:$0xff]  }
  0xc3   :  { %2778 = vmatpush1.bf16.msra.mxu0 %v4391_v55  ;;  %2574 = vmatprep.subr.bf16.mxu1 %v4392_v56  ;;  %v4485_v55 = vld [vmem:[#allocation5 + $0x6b4] ss:$8 sps:$4 sm:$0xff]   ;;  %v4480_v56 = vld [vmem:[#allocation5 + $0x1b0] ss:$8 sps:$4 sm:$0xff]  }
  0xc4   :  { %2779 = vmatprep.subr.bf16.mxu0 %v4394_v57  ;;  %v4483_v57 = vld [vmem:[#allocation5 + $0x6b0] ss:$8 sps:$4 sm:$0xff]  }
  0xc6   :  { %2575 = vmatpush1.bf16.msra.mxu1 %v4396_v58  ;;  %v4488_v58 = vld [vmem:[#allocation5 + $0x1c4] ss:$8 sps:$4 sm:$0xff]  }
  0xc7   :  { %2780 = vmatpush1.bf16.msra.mxu0 %v4397_v59  ;;  %2576 = vmatprep.subr.bf16.mxu1 %v4398_v60  ;;  %v4491_v59 = vld [vmem:[#allocation5 + $0x6c4] ss:$8 sps:$4 sm:$0xff]   ;;  %v4486_v60 = vld [vmem:[#allocation5 + $0x1c0] ss:$8 sps:$4 sm:$0xff]  }
  0xc8   :  { %2781 = vmatprep.subr.bf16.mxu0 %v4400_v61  ;;  %v4489_v61 = vld [vmem:[#allocation5 + $0x6c0] ss:$8 sps:$4 sm:$0xff]  }
  0xca   :  { %2577 = vmatpush1.bf16.msra.mxu1 %v4402_v62  ;;  %v4494_v62 = vld [vmem:[#allocation5 + $0x1d4] ss:$8 sps:$4 sm:$0xff]  }
  0xcb   :  { %2782 = vmatpush1.bf16.msra.mxu0 %v4403_v63  ;;  %2578 = vmatprep.subr.bf16.mxu1 %v4404_v0  ;;  %v4497_v63 = vld [vmem:[#allocation5 + $0x6d4] ss:$8 sps:$4 sm:$0xff]   ;;  %v4492_v0 = vld [vmem:[#allocation5 + $0x1d0] ss:$8 sps:$4 sm:$0xff]  }
  0xcc   :  { %2783 = vmatprep.subr.bf16.mxu0 %v4406_v1  ;;  %v4495_v1 = vld [vmem:[#allocation5 + $0x6d0] ss:$8 sps:$4 sm:$0xff]  }
  0xce   :  { %2579 = vmatpush1.bf16.msra.mxu1 %v4408_v2  ;;  %v4500_v2 = vld [vmem:[#allocation5 + $0x1e4] ss:$8 sps:$4 sm:$0xff]  }
  0xcf   :  { %2784 = vmatpush1.bf16.msra.mxu0 %v4409_v3  ;;  %2589 = vmatprep.subr.bf16.mxu1 %v4414_v4  ;;  %v4503_v3 = vld [vmem:[#allocation5 + $0x6e4] ss:$8 sps:$4 sm:$0xff]   ;;  %v4498_v4 = vld [vmem:[#allocation5 + $0x1e0] ss:$8 sps:$4 sm:$0xff]  }
  0xd0   :  { %2794 = vmatprep.subr.bf16.mxu0 %v4419_v5  ;;  %v4501_v5 = vld [vmem:[#allocation5 + $0x6e0] ss:$8 sps:$4 sm:$0xff]  }
  0xd1   :  { %2581 = vmatmul.mubr.bf16.vlgmr.msra.gmra.mrb[0].mxu1 %v3661_v6  ;;  %v4506_v6 = vld [vmem:[#allocation5 + $0x1f4] ss:$8 sps:$4 sm:$0xff]  }
  0xd2   :  { %2786 = vmatmul.mubr.bf16.vlgmr.msra.gmra.mrb[0].mxu0 %v3671_v7  ;;  %2590 = vmatpush1.bf16.msra.mxu1 %v4412_v8  ;;  %v4509_v7 = vld [vmem:[#allocation5 + $0x6f4] ss:$8 sps:$4 sm:$0xff]   ;;  %v4504_v8 = vld [vmem:[#allocation5 + $0x1f0] ss:$8 sps:$4 sm:$0xff]  }
  0xd3   :  { %2795 = vmatpush1.bf16.msra.mxu0 %v4417_v9  ;;  %2591 = vmatprep.subr.bf16.mxu1 %v4422_v10  ;;  %v4507_v9 = vld [vmem:[#allocation5 + $0x6f0] ss:$8 sps:$4 sm:$0xff]   ;;  %v4514_v10 = vld [vmem:[#allocation5 + $0x204] ss:$8 sps:$4 sm:$0xff]  }
  0xd4   :  { %2796 = vmatprep.subr.bf16.mxu0 %v4425_v11  ;;  %2621 = vmatprep.mubr.bf16.mxu1 %v3664_v35  ;;  %v4519_v11 = vld [vmem:[#allocation5 + $0x704] ss:$8 sps:$4 sm:$0xff]   ;;  %v4541_v35 = vld [vmem:[#allocation5 + $0x740] ss:$8 sps:$4 sm:$0xff]  }
  0xd5   :  { %2826 = vmatprep.mubr.bf16.mxu0 %v3674_v38  ;;  %v4544_v38 = vld [vmem:[#allocation5 + $0x250] ss:$8 sps:$4 sm:$0xff]  }
  0xd6   :  { %2592 = vmatpush1.bf16.msra.mxu1 %v4420_v12  ;;  %v3663_v12 = vcombine.low %v5343_v32, %v5343_v32  ;;  %v4540_v32 = vld [vmem:[#allocation5 + $0x244] ss:$8 sps:$4 sm:$0xff]  }
  0xd7   :  { %2797 = vmatpush1.bf16.msra.mxu0 %v4423_v13  ;;  %2593 = vmatprep.subr.bf16.mxu1 %v4428_v14  ;;  %v4512_v13 = vld [vmem:[#allocation5 + $0x200] ss:$8 sps:$4 sm:$0xff]   ;;  %v3673_v14 = vcombine.low %v5347_v36, %v5347_v36  ;;  %v4546_v36 = vld [vmem:[#allocation5 + $0x254] ss:$8 sps:$4 sm:$0xff]  }
  0xd8   :  { %2798 = vmatprep.subr.bf16.mxu0 %v4431_v15  ;;  %v4517_v15 = vld [vmem:[#allocation5 + $0x700] ss:$8 sps:$4 sm:$0xff]  }
  0xda   :  { %2594 = vmatpush1.bf16.msra.mxu1 %v4426_v16  ;;  %v4522_v16 = vld [vmem:[#allocation5 + $0x214] ss:$8 sps:$4 sm:$0xff]  }
  0xdb   :  { %2799 = vmatpush1.bf16.msra.mxu0 %v4429_v17  ;;  %2595 = vmatprep.subr.bf16.mxu1 %v4434_v18  ;;  %v4525_v17 = vld [vmem:[#allocation5 + $0x714] ss:$8 sps:$4 sm:$0xff]  }
  0xdc   :  { %2800 = vmatprep.subr.bf16.mxu0 %v4437_v19  ;;  %v5355_v18 = vld [vmem:[#allocation2 + $0x10] sm:$0xff] }
  0xdd   :  { %v3666_v19 = vcombine.high %v5355_v18, %v5355_v18 }
  0xde   :  { %2596 = vmatpush1.bf16.msra.mxu1 %v4432_v20  ;;  %v5359_v20 = vld [vmem:[#allocation2 + $0x38] sm:$0xff] }
  0xdf   :  { %2801 = vmatpush1.bf16.msra.mxu0 %v4435_v21  ;;  %2597 = vmatprep.subr.bf16.mxu1 %v4440_v22  ;;  %v4520_v21 = vld [vmem:[#allocation5 + $0x210] ss:$8 sps:$4 sm:$0xff]  }
  0xe0   :  { %2802 = vmatprep.subr.bf16.mxu0 %v4443_v23  ;;  %v4523_v22 = vld [vmem:[#allocation5 + $0x710] ss:$8 sps:$4 sm:$0xff]   ;;  %v3676_v23 = vcombine.high %v5359_v20, %v5359_v20 }
  0xe2   :  { %2598 = vmatpush1.bf16.msra.mxu1 %v4438_v24  ;;  %v4528_v24 = vld [vmem:[#allocation5 + $0x224] ss:$8 sps:$4 sm:$0xff]  }
  0xe3   :  { %2803 = vmatpush1.bf16.msra.mxu0 %v4441_v25  ;;  %2599 = vmatprep.subr.bf16.mxu1 %v4446_v26  ;;  %v4531_v25 = vld [vmem:[#allocation5 + $0x724] ss:$8 sps:$4 sm:$0xff]   ;;  %v4526_v26 = vld [vmem:[#allocation5 + $0x220] ss:$8 sps:$4 sm:$0xff]  }
  0xe4   :  { %2804 = vmatprep.subr.bf16.mxu0 %v4449_v27  ;;  %v4529_v27 = vld [vmem:[#allocation5 + $0x720] ss:$8 sps:$4 sm:$0xff]  }
  0xe6   :  { %2600 = vmatpush1.bf16.msra.mxu1 %v4444_v28  ;;  %v4534_v28 = vld [vmem:[#allocation5 + $0x234] ss:$8 sps:$4 sm:$0xff]  }
  0xe7   :  { %2805 = vmatpush1.bf16.msra.mxu0 %v4447_v29  ;;  %2601 = vmatprep.subr.bf16.mxu1 %v4452_v30  ;;  %v4537_v29 = vld [vmem:[#allocation5 + $0x734] ss:$8 sps:$4 sm:$0xff]   ;;  %v4532_v30 = vld [vmem:[#allocation5 + $0x230] ss:$8 sps:$4 sm:$0xff]  }
  0xe8   :  { %2806 = vmatprep.subr.bf16.mxu0 %v4455_v31  ;;  %v4535_v31 = vld [vmem:[#allocation5 + $0x730] ss:$8 sps:$4 sm:$0xff]  }
  0xea   :  { %2602 = vmatpush1.bf16.msra.mxu1 %v4450_v33  ;;  %v4543_v33 = vld [vmem:[#allocation5 + $0x744] ss:$8 sps:$4 sm:$0xff]  }
  0xeb   :  { %2807 = vmatpush1.bf16.msra.mxu0 %v4453_v34  ;;  %2603 = vmatprep.subr.bf16.mxu1 %v4458_v37  ;;  %v4538_v34 = vld [vmem:[#allocation5 + $0x240] ss:$8 sps:$4 sm:$0xff]   ;;  %v4549_v37 = vld [vmem:[#allocation5 + $0x754] ss:$8 sps:$4 sm:$0xff]  }
  0xec   :  { %2808 = vmatprep.subr.bf16.mxu0 %v4461_v39  ;;  %v4547_v39 = vld [vmem:[#allocation5 + $0x750] ss:$8 sps:$4 sm:$0xff]  }
  0xee   :  { %2604 = vmatpush1.bf16.msra.mxu1 %v4456_v40  ;;  %v4552_v40 = vld [vmem:[#allocation5 + $0x264] ss:$8 sps:$4 sm:$0xff]  }
  0xef   :  { %2809 = vmatpush1.bf16.msra.mxu0 %v4459_v41  ;;  %2605 = vmatprep.subr.bf16.mxu1 %v4464_v42  ;;  %v4555_v41 = vld [vmem:[#allocation5 + $0x764] ss:$8 sps:$4 sm:$0xff]   ;;  %v4550_v42 = vld [vmem:[#allocation5 + $0x260] ss:$8 sps:$4 sm:$0xff]  }
  0xf0   :  { %2810 = vmatprep.subr.bf16.mxu0 %v4467_v43  ;;  %v4553_v43 = vld [vmem:[#allocation5 + $0x760] ss:$8 sps:$4 sm:$0xff]  }
  0xf2   :  { %2606 = vmatpush1.bf16.msra.mxu1 %v4462_v44  ;;  %v4558_v44 = vld [vmem:[#allocation5 + $0x274] ss:$8 sps:$4 sm:$0xff]  }
  0xf3   :  { %2811 = vmatpush1.bf16.msra.mxu0 %v4465_v45  ;;  %2607 = vmatprep.subr.bf16.mxu1 %v4470_v46  ;;  %v4561_v45 = vld [vmem:[#allocation5 + $0x774] ss:$8 sps:$4 sm:$0xff]   ;;  %v4556_v46 = vld [vmem:[#allocation5 + $0x270] ss:$8 sps:$4 sm:$0xff]  }
  0xf4   :  { %2812 = vmatprep.subr.bf16.mxu0 %v4473_v47  ;;  %v4559_v47 = vld [vmem:[#allocation5 + $0x770] ss:$8 sps:$4 sm:$0xff]  }
  0xf6   :  { %2608 = vmatpush1.bf16.msra.mxu1 %v4468_v48  ;;  %v4564_v48 = vld [vmem:[#allocation5 + $0x284] ss:$8 sps:$4 sm:$0xff]  }
  0xf7   :  { %2813 = vmatpush1.bf16.msra.mxu0 %v4471_v49  ;;  %2609 = vmatprep.subr.bf16.mxu1 %v4476_v50  ;;  %v4567_v49 = vld [vmem:[#allocation5 + $0x784] ss:$8 sps:$4 sm:$0xff]   ;;  %v4562_v50 = vld [vmem:[#allocation5 + $0x280] ss:$8 sps:$4 sm:$0xff]  }
  0xf8   :  { %2814 = vmatprep.subr.bf16.mxu0 %v4479_v51  ;;  %v4565_v51 = vld [vmem:[#allocation5 + $0x780] ss:$8 sps:$4 sm:$0xff]  }
  0xfa   :  { %2610 = vmatpush1.bf16.msra.mxu1 %v4474_v52  ;;  %v4570_v52 = vld [vmem:[#allocation5 + $0x294] ss:$8 sps:$4 sm:$0xff]  }
  0xfb   :  { %2815 = vmatpush1.bf16.msra.mxu0 %v4477_v53  ;;  %2611 = vmatprep.subr.bf16.mxu1 %v4482_v54  ;;  %v4573_v53 = vld [vmem:[#allocation5 + $0x794] ss:$8 sps:$4 sm:$0xff]   ;;  %v4568_v54 = vld [vmem:[#allocation5 + $0x290] ss:$8 sps:$4 sm:$0xff]  }
  0xfc   :  { %2816 = vmatprep.subr.bf16.mxu0 %v4485_v55  ;;  %v4571_v55 = vld [vmem:[#allocation5 + $0x790] ss:$8 sps:$4 sm:$0xff]  }
  0xfe   :  { %2612 = vmatpush1.bf16.msra.mxu1 %v4480_v56  ;;  %v4576_v56 = vld [vmem:[#allocation5 + $0x2a4] ss:$8 sps:$4 sm:$0xff]  }
  0xff   :  { %2817 = vmatpush1.bf16.msra.mxu0 %v4483_v57  ;;  %2613 = vmatprep.subr.bf16.mxu1 %v4488_v58  ;;  %v4579_v57 = vld [vmem:[#allocation5 + $0x7a4] ss:$8 sps:$4 sm:$0xff]   ;;  %v4574_v58 = vld [vmem:[#allocation5 + $0x2a0] ss:$8 sps:$4 sm:$0xff]  }
 0x100   :  { %2818 = vmatprep.subr.bf16.mxu0 %v4491_v59  ;;  %v4577_v59 = vld [vmem:[#allocation5 + $0x7a0] ss:$8 sps:$4 sm:$0xff]  }
 0x102   :  { %2614 = vmatpush1.bf16.msra.mxu1 %v4486_v60  ;;  %v4582_v60 = vld [vmem:[#allocation5 + $0x2b4] ss:$8 sps:$4 sm:$0xff]  }
 0x103   :  { %2819 = vmatpush1.bf16.msra.mxu0 %v4489_v61  ;;  %2615 = vmatprep.subr.bf16.mxu1 %v4494_v62  ;;  %v4585_v61 = vld [vmem:[#allocation5 + $0x7b4] ss:$8 sps:$4 sm:$0xff]   ;;  %v4580_v62 = vld [vmem:[#allocation5 + $0x2b0] ss:$8 sps:$4 sm:$0xff]  }
 0x104   :  { %2820 = vmatprep.subr.bf16.mxu0 %v4497_v63  ;;  %v4583_v63 = vld [vmem:[#allocation5 + $0x7b0] ss:$8 sps:$4 sm:$0xff]  }
 0x106   :  { %2616 = vmatpush1.bf16.msra.mxu1 %v4492_v0  ;;  %v4588_v0 = vld [vmem:[#allocation5 + $0x2c4] ss:$8 sps:$4 sm:$0xff]  }
 0x107   :  { %2821 = vmatpush1.bf16.msra.mxu0 %v4495_v1  ;;  %2617 = vmatprep.subr.bf16.mxu1 %v4500_v2  ;;  %v4591_v1 = vld [vmem:[#allocation5 + $0x7c4] ss:$8 sps:$4 sm:$0xff]   ;;  %v4586_v2 = vld [vmem:[#allocation5 + $0x2c0] ss:$8 sps:$4 sm:$0xff]  }
 0x108   :  { %2822 = vmatprep.subr.bf16.mxu0 %v4503_v3  ;;  %v4589_v3 = vld [vmem:[#allocation5 + $0x7c0] ss:$8 sps:$4 sm:$0xff]  }
 0x10a   :  { %2618 = vmatpush1.bf16.msra.mxu1 %v4498_v4  ;;  %v4594_v4 = vld [vmem:[#allocation5 + $0x2d4] ss:$8 sps:$4 sm:$0xff]  }
 0x10b   :  { %2823 = vmatpush1.bf16.msra.mxu0 %v4501_v5  ;;  %2619 = vmatprep.subr.bf16.mxu1 %v4506_v6  ;;  %v4597_v5 = vld [vmem:[#allocation5 + $0x7d4] ss:$8 sps:$4 sm:$0xff]   ;;  %v4592_v6 = vld [vmem:[#allocation5 + $0x2d0] ss:$8 sps:$4 sm:$0xff]  }
 0x10c   :  { %2824 = vmatprep.subr.bf16.mxu0 %v4509_v7  ;;  %v4595_v7 = vld [vmem:[#allocation5 + $0x7d0] ss:$8 sps:$4 sm:$0xff]  }
 0x10e   :  { %2620 = vmatpush1.bf16.msra.mxu1 %v4504_v8  ;;  %v4600_v8 = vld [vmem:[#allocation5 + $0x2e4] ss:$8 sps:$4 sm:$0xff]  }
 0x10f   :  { %2825 = vmatpush1.bf16.msra.mxu0 %v4507_v9  ;;  %2630 = vmatprep.subr.bf16.mxu1 %v4514_v10  ;;  %v4603_v9 = vld [vmem:[#allocation5 + $0x7e4] ss:$8 sps:$4 sm:$0xff]   ;;  %v4598_v10 = vld [vmem:[#allocation5 + $0x2e0] ss:$8 sps:$4 sm:$0xff]  }
 0x110   :  { %2835 = vmatprep.subr.bf16.mxu0 %v4519_v11  ;;  %v4601_v11 = vld [vmem:[#allocation5 + $0x7e0] ss:$8 sps:$4 sm:$0xff]  }
 0x111   :  { %2622 = vmatmul.mubr.bf16.vlgmr.msra.gmra.mrb[0].mxu1 %v3663_v12  ;;  %v4606_v12 = vld [vmem:[#allocation5 + $0x2f4] ss:$8 sps:$4 sm:$0xff]  }
 0x112   :  { %2827 = vmatmul.mubr.bf16.vlgmr.msra.gmra.mrb[0].mxu0 %v3673_v14  ;;  %2631 = vmatpush1.bf16.msra.mxu1 %v4512_v13  ;;  %v4609_v13 = vld [vmem:[#allocation5 + $0x7f4] ss:$8 sps:$4 sm:$0xff]   ;;  %v4604_v14 = vld [vmem:[#allocation5 + $0x2f0] ss:$8 sps:$4 sm:$0xff]  }
 0x113   :  { %2836 = vmatpush1.bf16.msra.mxu0 %v4517_v15  ;;  %2632 = vmatprep.subr.bf16.mxu1 %v4522_v16  ;;  %v4607_v15 = vld [vmem:[#allocation5 + $0x7f0] ss:$8 sps:$4 sm:$0xff]   ;;  %v4614_v16 = vld [vmem:[#allocation5 + $0x304] ss:$8 sps:$4 sm:$0xff]  }
 0x114   :  { %2837 = vmatprep.subr.bf16.mxu0 %v4525_v17  ;;  %2662 = vmatprep.mubr.bf16.mxu1 %v3666_v19  ;;  %v4619_v17 = vld [vmem:[#allocation5 + $0x804] ss:$8 sps:$4 sm:$0xff]   ;;  %v4612_v19 = vld [vmem:[#allocation5 + $0x300] ss:$8 sps:$4 sm:$0xff]  }
 0x115   :  { %2867 = vmatprep.mubr.bf16.mxu0 %v3676_v23  ;;  %v3675_v23 = vcombine.low %v5359_v20, %v5359_v20  ;;  %v4623_v20 = vld [vmem:[#allocation5 + $0x810] ss:$8 sps:$4 sm:$0xff]  }
 0x116   :  { %2633 = vmatpush1.bf16.msra.mxu1 %v4520_v21  ;;  %v4617_v21 = vld [vmem:[#allocation5 + $0x800] ss:$8 sps:$4 sm:$0xff]  }
 0x117   :  { %2838 = vmatpush1.bf16.msra.mxu0 %v4523_v22  ;;  %2634 = vmatprep.subr.bf16.mxu1 %v4528_v24  ;;  %v3665_v22 = vcombine.low %v5355_v18, %v5355_v18  ;;  %v5367_v24 = vld [vmem:[#allocation2 + $0x18] sm:$0xff] }
 0x118   :  { %2839 = vmatprep.subr.bf16.mxu0 %v4531_v25  ;;  %v5369_v25 = vld [vmem:[#allocation2 + $0x40] sm:$0xff]  ;;  %v4620_v18 = vld [vmem:[#allocation5 + $0x310] ss:$8 sps:$4 sm:$0xff]  }
 0x11a   :  { %2635 = vmatpush1.bf16.msra.mxu1 %v4526_v26  ;;  %v4622_v26 = vld [vmem:[#allocation5 + $0x314] ss:$8 sps:$4 sm:$0xff]  }
 0x11b   :  { %2840 = vmatpush1.bf16.msra.mxu0 %v4529_v27  ;;  %2636 = vmatprep.subr.bf16.mxu1 %v4534_v28  ;;  %v4625_v27 = vld [vmem:[#allocation5 + $0x814] ss:$8 sps:$4 sm:$0xff]   ;;  %v3668_v28 = vcombine.high %v5367_v24, %v5367_v24 }
 0x11c   :  { %2841 = vmatprep.subr.bf16.mxu0 %v4537_v29  ;;  %v3678_v29 = vcombine.high %v5369_v25, %v5369_v25 }
 0x11e   :  { %2637 = vmatpush1.bf16.msra.mxu1 %v4532_v30  ;;  %v4628_v30 = vld [vmem:[#allocation5 + $0x324] ss:$8 sps:$4 sm:$0xff]  }
 0x11f   :  { %2842 = vmatpush1.bf16.msra.mxu0 %v4535_v31  ;;  %2638 = vmatprep.subr.bf16.mxu1 %v4540_v32  ;;  %v4631_v31 = vld [vmem:[#allocation5 + $0x824] ss:$8 sps:$4 sm:$0xff]   ;;  %v4626_v32 = vld [vmem:[#allocation5 + $0x320] ss:$8 sps:$4 sm:$0xff]  }
 0x120   :  { %2843 = vmatprep.subr.bf16.mxu0 %v4543_v33  ;;  %v4629_v33 = vld [vmem:[#allocation5 + $0x820] ss:$8 sps:$4 sm:$0xff]  }
 0x122   :  { %2639 = vmatpush1.bf16.msra.mxu1 %v4538_v34  ;;  %v4634_v34 = vld [vmem:[#allocation5 + $0x334] ss:$8 sps:$4 sm:$0xff]  }
 0x123   :  { %2844 = vmatpush1.bf16.msra.mxu0 %v4541_v35  ;;  %2640 = vmatprep.subr.bf16.mxu1 %v4546_v36  ;;  %v4637_v35 = vld [vmem:[#allocation5 + $0x834] ss:$8 sps:$4 sm:$0xff]   ;;  %v4632_v36 = vld [vmem:[#allocation5 + $0x330] ss:$8 sps:$4 sm:$0xff]  }
 0x124   :  { %2845 = vmatprep.subr.bf16.mxu0 %v4549_v37  ;;  %v4635_v37 = vld [vmem:[#allocation5 + $0x830] ss:$8 sps:$4 sm:$0xff]  }
 0x126   :  { %2641 = vmatpush1.bf16.msra.mxu1 %v4544_v38  ;;  %v4640_v38 = vld [vmem:[#allocation5 + $0x344] ss:$8 sps:$4 sm:$0xff]  }
 0x127   :  { %2846 = vmatpush1.bf16.msra.mxu0 %v4547_v39  ;;  %2642 = vmatprep.subr.bf16.mxu1 %v4552_v40  ;;  %v4643_v39 = vld [vmem:[#allocation5 + $0x844] ss:$8 sps:$4 sm:$0xff]   ;;  %v4638_v40 = vld [vmem:[#allocation5 + $0x340] ss:$8 sps:$4 sm:$0xff]  }
 0x128   :  { %2847 = vmatprep.subr.bf16.mxu0 %v4555_v41  ;;  %v4641_v41 = vld [vmem:[#allocation5 + $0x840] ss:$8 sps:$4 sm:$0xff]  }
 0x12a   :  { %2643 = vmatpush1.bf16.msra.mxu1 %v4550_v42  ;;  %v4646_v42 = vld [vmem:[#allocation5 + $0x354] ss:$8 sps:$4 sm:$0xff]  }
 0x12b   :  { %2848 = vmatpush1.bf16.msra.mxu0 %v4553_v43  ;;  %2644 = vmatprep.subr.bf16.mxu1 %v4558_v44  ;;  %v4649_v43 = vld [vmem:[#allocation5 + $0x854] ss:$8 sps:$4 sm:$0xff]   ;;  %v4644_v44 = vld [vmem:[#allocation5 + $0x350] ss:$8 sps:$4 sm:$0xff]  }
 0x12c   :  { %2849 = vmatprep.subr.bf16.mxu0 %v4561_v45  ;;  %v4647_v45 = vld [vmem:[#allocation5 + $0x850] ss:$8 sps:$4 sm:$0xff]  }
 0x12e   :  { %2645 = vmatpush1.bf16.msra.mxu1 %v4556_v46  ;;  %v4652_v46 = vld [vmem:[#allocation5 + $0x364] ss:$8 sps:$4 sm:$0xff]  }
 0x12f   :  { %2850 = vmatpush1.bf16.msra.mxu0 %v4559_v47  ;;  %2646 = vmatprep.subr.bf16.mxu1 %v4564_v48  ;;  %v4655_v47 = vld [vmem:[#allocation5 + $0x864] ss:$8 sps:$4 sm:$0xff]   ;;  %v4650_v48 = vld [vmem:[#allocation5 + $0x360] ss:$8 sps:$4 sm:$0xff]  }
 0x130   :  { %2851 = vmatprep.subr.bf16.mxu0 %v4567_v49  ;;  %v4653_v49 = vld [vmem:[#allocation5 + $0x860] ss:$8 sps:$4 sm:$0xff]  }
 0x132   :  { %2647 = vmatpush1.bf16.msra.mxu1 %v4562_v50  ;;  %v4658_v50 = vld [vmem:[#allocation5 + $0x374] ss:$8 sps:$4 sm:$0xff]  }
 0x133   :  { %2852 = vmatpush1.bf16.msra.mxu0 %v4565_v51  ;;  %2648 = vmatprep.subr.bf16.mxu1 %v4570_v52  ;;  %v4661_v51 = vld [vmem:[#allocation5 + $0x874] ss:$8 sps:$4 sm:$0xff]   ;;  %v4656_v52 = vld [vmem:[#allocation5 + $0x370] ss:$8 sps:$4 sm:$0xff]  }
 0x134   :  { %2853 = vmatprep.subr.bf16.mxu0 %v4573_v53  ;;  %v4659_v53 = vld [vmem:[#allocation5 + $0x870] ss:$8 sps:$4 sm:$0xff]  }
 0x136   :  { %2649 = vmatpush1.bf16.msra.mxu1 %v4568_v54  ;;  %v4664_v54 = vld [vmem:[#allocation5 + $0x384] ss:$8 sps:$4 sm:$0xff]  }
 0x137   :  { %2854 = vmatpush1.bf16.msra.mxu0 %v4571_v55  ;;  %2650 = vmatprep.subr.bf16.mxu1 %v4576_v56  ;;  %v4667_v55 = vld [vmem:[#allocation5 + $0x884] ss:$8 sps:$4 sm:$0xff]   ;;  %v4662_v56 = vld [vmem:[#allocation5 + $0x380] ss:$8 sps:$4 sm:$0xff]  }
 0x138   :  { %2855 = vmatprep.subr.bf16.mxu0 %v4579_v57  ;;  %v4665_v57 = vld [vmem:[#allocation5 + $0x880] ss:$8 sps:$4 sm:$0xff]  }
 0x13a   :  { %2651 = vmatpush1.bf16.msra.mxu1 %v4574_v58  ;;  %v4670_v58 = vld [vmem:[#allocation5 + $0x394] ss:$8 sps:$4 sm:$0xff]  }
 0x13b   :  { %2856 = vmatpush1.bf16.msra.mxu0 %v4577_v59  ;;  %2652 = vmatprep.subr.bf16.mxu1 %v4582_v60  ;;  %v4673_v59 = vld [vmem:[#allocation5 + $0x894] ss:$8 sps:$4 sm:$0xff]   ;;  %v4668_v60 = vld [vmem:[#allocation5 + $0x390] ss:$8 sps:$4 sm:$0xff]  }
 0x13c   :  { %2857 = vmatprep.subr.bf16.mxu0 %v4585_v61  ;;  %v4671_v61 = vld [vmem:[#allocation5 + $0x890] ss:$8 sps:$4 sm:$0xff]  }
 0x13e   :  { %2653 = vmatpush1.bf16.msra.mxu1 %v4580_v62  ;;  %v4676_v62 = vld [vmem:[#allocation5 + $0x3a4] ss:$8 sps:$4 sm:$0xff]  }
 0x13f   :  { %2858 = vmatpush1.bf16.msra.mxu0 %v4583_v63  ;;  %2654 = vmatprep.subr.bf16.mxu1 %v4588_v0  ;;  %v4679_v63 = vld [vmem:[#allocation5 + $0x8a4] ss:$8 sps:$4 sm:$0xff]   ;;  %v4674_v0 = vld [vmem:[#allocation5 + $0x3a0] ss:$8 sps:$4 sm:$0xff]  }
 0x140   :  { %2859 = vmatprep.subr.bf16.mxu0 %v4591_v1  ;;  %v4677_v1 = vld [vmem:[#allocation5 + $0x8a0] ss:$8 sps:$4 sm:$0xff]  }
 0x142   :  { %2655 = vmatpush1.bf16.msra.mxu1 %v4586_v2  ;;  %v4682_v2 = vld [vmem:[#allocation5 + $0x3b4] ss:$8 sps:$4 sm:$0xff]  }
 0x143   :  { %2860 = vmatpush1.bf16.msra.mxu0 %v4589_v3  ;;  %2656 = vmatprep.subr.bf16.mxu1 %v4594_v4  ;;  %v4685_v3 = vld [vmem:[#allocation5 + $0x8b4] ss:$8 sps:$4 sm:$0xff]   ;;  %v4680_v4 = vld [vmem:[#allocation5 + $0x3b0] ss:$8 sps:$4 sm:$0xff]  }
 0x144   :  { %2861 = vmatprep.subr.bf16.mxu0 %v4597_v5  ;;  %v4683_v5 = vld [vmem:[#allocation5 + $0x8b0] ss:$8 sps:$4 sm:$0xff]  }
 0x146   :  { %2657 = vmatpush1.bf16.msra.mxu1 %v4592_v6  ;;  %v4688_v6 = vld [vmem:[#allocation5 + $0x3c4] ss:$8 sps:$4 sm:$0xff]  }
 0x147   :  { %2862 = vmatpush1.bf16.msra.mxu0 %v4595_v7  ;;  %2658 = vmatprep.subr.bf16.mxu1 %v4600_v8  ;;  %v4691_v7 = vld [vmem:[#allocation5 + $0x8c4] ss:$8 sps:$4 sm:$0xff]   ;;  %v4686_v8 = vld [vmem:[#allocation5 + $0x3c0] ss:$8 sps:$4 sm:$0xff]  }
 0x148   :  { %2863 = vmatprep.subr.bf16.mxu0 %v4603_v9  ;;  %v4689_v9 = vld [vmem:[#allocation5 + $0x8c0] ss:$8 sps:$4 sm:$0xff]  }
 0x14a   :  { %2659 = vmatpush1.bf16.msra.mxu1 %v4598_v10  ;;  %v4694_v10 = vld [vmem:[#allocation5 + $0x3d4] ss:$8 sps:$4 sm:$0xff]  }
 0x14b   :  { %2864 = vmatpush1.bf16.msra.mxu0 %v4601_v11  ;;  %2660 = vmatprep.subr.bf16.mxu1 %v4606_v12  ;;  %v4697_v11 = vld [vmem:[#allocation5 + $0x8d4] ss:$8 sps:$4 sm:$0xff]   ;;  %v4692_v12 = vld [vmem:[#allocation5 + $0x3d0] ss:$8 sps:$4 sm:$0xff]  }
 0x14c   :  { %2865 = vmatprep.subr.bf16.mxu0 %v4609_v13  ;;  %v4695_v13 = vld [vmem:[#allocation5 + $0x8d0] ss:$8 sps:$4 sm:$0xff]  }
 0x14e   :  { %2661 = vmatpush1.bf16.msra.mxu1 %v4604_v14  ;;  %v4700_v14 = vld [vmem:[#allocation5 + $0x3e4] ss:$8 sps:$4 sm:$0xff]  }
 0x14f   :  { %2866 = vmatpush1.bf16.msra.mxu0 %v4607_v15  ;;  %2671 = vmatprep.subr.bf16.mxu1 %v4614_v16  ;;  %v4703_v15 = vld [vmem:[#allocation5 + $0x8e4] ss:$8 sps:$4 sm:$0xff]   ;;  %v4698_v16 = vld [vmem:[#allocation5 + $0x3e0] ss:$8 sps:$4 sm:$0xff]  }
 0x150   :  { %2876 = vmatprep.subr.bf16.mxu0 %v4619_v17  ;;  %v4701_v17 = vld [vmem:[#allocation5 + $0x8e0] ss:$8 sps:$4 sm:$0xff]  }
 0x151   :  { %2663 = vmatmul.mubr.bf16.vlgmr.msra.gmra.mrb[0].mxu1 %v3665_v22  ;;  %v4704_v22 = vld [vmem:[#allocation5 + $0x3f0] ss:$8 sps:$4 sm:$0xff]  }
 0x152   :  { %2868 = vmatmul.mubr.bf16.vlgmr.msra.gmra.mrb[0].mxu0 %v3675_v23  ;;  %2672 = vmatpush1.bf16.msra.mxu1 %v4612_v19  ;;  %v4706_v19 = vld [vmem:[#allocation5 + $0x3f4] ss:$8 sps:$4 sm:$0xff]   ;;  %v4707_v23 = vld [vmem:[#allocation5 + $0x8f0] ss:$8 sps:$4 sm:$0xff]  }
 0x153   :  { %2877 = vmatpush1.bf16.msra.mxu0 %v4617_v21  ;;  %2673 = vmatprep.subr.bf16.mxu1 %v4622_v26  ;;  %v4709_v21 = vld [vmem:[#allocation5 + $0x8f4] ss:$8 sps:$4 sm:$0xff]   ;;  %v4714_v26 = vld [vmem:[#allocation5 + $0x404] ss:$8 sps:$4 sm:$0xff]  }
 0x154   :  { %2878 = vmatprep.subr.bf16.mxu0 %v4625_v27  ;;  %2703 = vmatprep.mubr.bf16.mxu1 %v3668_v28  ;;  %v4719_v27 = vld [vmem:[#allocation5 + $0x904] ss:$8 sps:$4 sm:$0xff]  }
 0x155   :  { %2908 = vmatprep.mubr.bf16.mxu0 %v3678_v29  ;;  %v5375_v28 = vld [vmem:[#allocation2 + $0x20] sm:$0xff]  ;;  %v5377_v29 = vld [vmem:[#allocation2 + $0x48] sm:$0xff] }
 0x156   :  { %2674 = vmatpush1.bf16.msra.mxu1 %v4620_v18  ;;  %v4712_v18 = vld [vmem:[#allocation5 + $0x400] ss:$8 sps:$4 sm:$0xff]  }
 0x157   :  { %2879 = vmatpush1.bf16.msra.mxu0 %v4623_v20  ;;  %2675 = vmatprep.subr.bf16.mxu1 %v4628_v30  ;;  %v3667_v20 = vcombine.low %v5367_v24, %v5367_v24  ;;  %v3677_v30 = vcombine.low %v5369_v25, %v5369_v25  ;;  %v4728_v24 = vld [vmem:[#allocation5 + $0x424] ss:$8 sps:$4 sm:$0xff]  }
 0x158   :  { %2880 = vmatprep.subr.bf16.mxu0 %v4631_v31  ;;  %v4717_v31 = vld [vmem:[#allocation5 + $0x900] ss:$8 sps:$4 sm:$0xff]   ;;  %v4731_v25 = vld [vmem:[#allocation5 + $0x924] ss:$8 sps:$4 sm:$0xff]  }
 0x15a   :  { %2676 = vmatpush1.bf16.msra.mxu1 %v4626_v32  ;;  %v4722_v32 = vld [vmem:[#allocation5 + $0x414] ss:$8 sps:$4 sm:$0xff]  }
 0x15b   :  { %2881 = vmatpush1.bf16.msra.mxu0 %v4629_v33  ;;  %2677 = vmatprep.subr.bf16.mxu1 %v4634_v34  ;;  %v4725_v33 = vld [vmem:[#allocation5 + $0x914] ss:$8 sps:$4 sm:$0xff]   ;;  %v4720_v34 = vld [vmem:[#allocation5 + $0x410] ss:$8 sps:$4 sm:$0xff]  }
 0x15c   :  { %2882 = vmatprep.subr.bf16.mxu0 %v4637_v35  ;;  %v4723_v35 = vld [vmem:[#allocation5 + $0x910] ss:$8 sps:$4 sm:$0xff]  }
 0x15e   :  { %2678 = vmatpush1.bf16.msra.mxu1 %v4632_v36  ;;  %v3670_v36 = vcombine.high %v5375_v28, %v5375_v28 }
 0x15f   :  { %2883 = vmatpush1.bf16.msra.mxu0 %v4635_v37  ;;  %2679 = vmatprep.subr.bf16.mxu1 %v4640_v38  ;;  %v3680_v37 = vcombine.high %v5377_v29, %v5377_v29  ;;  %v4726_v38 = vld [vmem:[#allocation5 + $0x420] ss:$8 sps:$4 sm:$0xff]  }
 0x160   :  { %2884 = vmatprep.subr.bf16.mxu0 %v4643_v39  ;;  %v4729_v39 = vld [vmem:[#allocation5 + $0x920] ss:$8 sps:$4 sm:$0xff]  }
 0x162   :  { %2680 = vmatpush1.bf16.msra.mxu1 %v4638_v40  ;;  %v4734_v40 = vld [vmem:[#allocation5 + $0x434] ss:$8 sps:$4 sm:$0xff]  }
 0x163   :  { %2885 = vmatpush1.bf16.msra.mxu0 %v4641_v41  ;;  %2681 = vmatprep.subr.bf16.mxu1 %v4646_v42  ;;  %v4737_v41 = vld [vmem:[#allocation5 + $0x934] ss:$8 sps:$4 sm:$0xff]   ;;  %v4732_v42 = vld [vmem:[#allocation5 + $0x430] ss:$8 sps:$4 sm:$0xff]  }
 0x164   :  { %2886 = vmatprep.subr.bf16.mxu0 %v4649_v43  ;;  %v4735_v43 = vld [vmem:[#allocation5 + $0x930] ss:$8 sps:$4 sm:$0xff]  }
 0x166   :  { %2682 = vmatpush1.bf16.msra.mxu1 %v4644_v44  ;;  %v4740_v44 = vld [vmem:[#allocation5 + $0x444] ss:$8 sps:$4 sm:$0xff]  }
 0x167   :  { %2887 = vmatpush1.bf16.msra.mxu0 %v4647_v45  ;;  %2683 = vmatprep.subr.bf16.mxu1 %v4652_v46  ;;  %v4743_v45 = vld [vmem:[#allocation5 + $0x944] ss:$8 sps:$4 sm:$0xff]   ;;  %v4738_v46 = vld [vmem:[#allocation5 + $0x440] ss:$8 sps:$4 sm:$0xff]  }
 0x168   :  { %2888 = vmatprep.subr.bf16.mxu0 %v4655_v47  ;;  %v4741_v47 = vld [vmem:[#allocation5 + $0x940] ss:$8 sps:$4 sm:$0xff]  }
 0x16a   :  { %2684 = vmatpush1.bf16.msra.mxu1 %v4650_v48  ;;  %v4746_v48 = vld [vmem:[#allocation5 + $0x454] ss:$8 sps:$4 sm:$0xff]  }
 0x16b   :  { %2889 = vmatpush1.bf16.msra.mxu0 %v4653_v49  ;;  %2685 = vmatprep.subr.bf16.mxu1 %v4658_v50  ;;  %v4749_v49 = vld [vmem:[#allocation5 + $0x954] ss:$8 sps:$4 sm:$0xff]   ;;  %v4744_v50 = vld [vmem:[#allocation5 + $0x450] ss:$8 sps:$4 sm:$0xff]  }
 0x16c   :  { %2890 = vmatprep.subr.bf16.mxu0 %v4661_v51  ;;  %v4747_v51 = vld [vmem:[#allocation5 + $0x950] ss:$8 sps:$4 sm:$0xff]  }
 0x16e   :  { %2686 = vmatpush1.bf16.msra.mxu1 %v4656_v52  ;;  %v4752_v52 = vld [vmem:[#allocation5 + $0x464] ss:$8 sps:$4 sm:$0xff]  }
 0x16f   :  { %2891 = vmatpush1.bf16.msra.mxu0 %v4659_v53  ;;  %2687 = vmatprep.subr.bf16.mxu1 %v4664_v54  ;;  %v4755_v53 = vld [vmem:[#allocation5 + $0x964] ss:$8 sps:$4 sm:$0xff]   ;;  %v4750_v54 = vld [vmem:[#allocation5 + $0x460] ss:$8 sps:$4 sm:$0xff]  }
 0x170   :  { %2892 = vmatprep.subr.bf16.mxu0 %v4667_v55  ;;  %v4753_v55 = vld [vmem:[#allocation5 + $0x960] ss:$8 sps:$4 sm:$0xff]  }
 0x172   :  { %2688 = vmatpush1.bf16.msra.mxu1 %v4662_v56  ;;  %v4758_v56 = vld [vmem:[#allocation5 + $0x474] ss:$8 sps:$4 sm:$0xff]  }
 0x173   :  { %2893 = vmatpush1.bf16.msra.mxu0 %v4665_v57  ;;  %2689 = vmatprep.subr.bf16.mxu1 %v4670_v58  ;;  %v4761_v57 = vld [vmem:[#allocation5 + $0x974] ss:$8 sps:$4 sm:$0xff]   ;;  %v4756_v58 = vld [vmem:[#allocation5 + $0x470] ss:$8 sps:$4 sm:$0xff]  }
 0x174   :  { %2894 = vmatprep.subr.bf16.mxu0 %v4673_v59  ;;  %v4759_v59 = vld [vmem:[#allocation5 + $0x970] ss:$8 sps:$4 sm:$0xff]  }
 0x176   :  { %2690 = vmatpush1.bf16.msra.mxu1 %v4668_v60  ;;  %v4764_v60 = vld [vmem:[#allocation5 + $0x484] ss:$8 sps:$4 sm:$0xff]  }
 0x177   :  { %2895 = vmatpush1.bf16.msra.mxu0 %v4671_v61  ;;  %2691 = vmatprep.subr.bf16.mxu1 %v4676_v62  ;;  %v4767_v61 = vld [vmem:[#allocation5 + $0x984] ss:$8 sps:$4 sm:$0xff]   ;;  %v4762_v62 = vld [vmem:[#allocation5 + $0x480] ss:$8 sps:$4 sm:$0xff]  }
 0x178   :  { %2896 = vmatprep.subr.bf16.mxu0 %v4679_v63  ;;  %v4765_v63 = vld [vmem:[#allocation5 + $0x980] ss:$8 sps:$4 sm:$0xff]  }
 0x17a   :  { %2692 = vmatpush1.bf16.msra.mxu1 %v4674_v0  ;;  %v4770_v0 = vld [vmem:[#allocation5 + $0x494] ss:$8 sps:$4 sm:$0xff]  }
 0x17b   :  { %2897 = vmatpush1.bf16.msra.mxu0 %v4677_v1  ;;  %2693 = vmatprep.subr.bf16.mxu1 %v4682_v2  ;;  %v4773_v1 = vld [vmem:[#allocation5 + $0x994] ss:$8 sps:$4 sm:$0xff]   ;;  %v4768_v2 = vld [vmem:[#allocation5 + $0x490] ss:$8 sps:$4 sm:$0xff]  }
 0x17c   :  { %2898 = vmatprep.subr.bf16.mxu0 %v4685_v3  ;;  %v4771_v3 = vld [vmem:[#allocation5 + $0x990] ss:$8 sps:$4 sm:$0xff]  }
 0x17e   :  { %2694 = vmatpush1.bf16.msra.mxu1 %v4680_v4  ;;  %v4776_v4 = vld [vmem:[#allocation5 + $0x4a4] ss:$8 sps:$4 sm:$0xff]  }
 0x17f   :  { %2899 = vmatpush1.bf16.msra.mxu0 %v4683_v5  ;;  %2695 = vmatprep.subr.bf16.mxu1 %v4688_v6  ;;  %v4779_v5 = vld [vmem:[#allocation5 + $0x9a4] ss:$8 sps:$4 sm:$0xff]   ;;  %v4774_v6 = vld [vmem:[#allocation5 + $0x4a0] ss:$8 sps:$4 sm:$0xff]  }
 0x180   :  { %2900 = vmatprep.subr.bf16.mxu0 %v4691_v7  ;;  %v4777_v7 = vld [vmem:[#allocation5 + $0x9a0] ss:$8 sps:$4 sm:$0xff]  }
 0x182   :  { %2696 = vmatpush1.bf16.msra.mxu1 %v4686_v8  ;;  %v4782_v8 = vld [vmem:[#allocation5 + $0x4b4] ss:$8 sps:$4 sm:$0xff]  }
 0x183   :  { %2901 = vmatpush1.bf16.msra.mxu0 %v4689_v9  ;;  %2697 = vmatprep.subr.bf16.mxu1 %v4694_v10  ;;  %v4785_v9 = vld [vmem:[#allocation5 + $0x9b4] ss:$8 sps:$4 sm:$0xff]   ;;  %v4780_v10 = vld [vmem:[#allocation5 + $0x4b0] ss:$8 sps:$4 sm:$0xff]  }
 0x184   :  { %2902 = vmatprep.subr.bf16.mxu0 %v4697_v11  ;;  %v4783_v11 = vld [vmem:[#allocation5 + $0x9b0] ss:$8 sps:$4 sm:$0xff]  }
 0x186   :  { %2698 = vmatpush1.bf16.msra.mxu1 %v4692_v12  ;;  %v4788_v12 = vld [vmem:[#allocation5 + $0x4c4] ss:$8 sps:$4 sm:$0xff]  }
 0x187   :  { %2903 = vmatpush1.bf16.msra.mxu0 %v4695_v13  ;;  %2699 = vmatprep.subr.bf16.mxu1 %v4700_v14  ;;  %v4791_v13 = vld [vmem:[#allocation5 + $0x9c4] ss:$8 sps:$4 sm:$0xff]   ;;  %v4786_v14 = vld [vmem:[#allocation5 + $0x4c0] ss:$8 sps:$4 sm:$0xff]  }
 0x188   :  { %2904 = vmatprep.subr.bf16.mxu0 %v4703_v15  ;;  %v4789_v15 = vld [vmem:[#allocation5 + $0x9c0] ss:$8 sps:$4 sm:$0xff]  }
 0x18a   :  { %2700 = vmatpush1.bf16.msra.mxu1 %v4698_v16  ;;  %v4794_v16 = vld [vmem:[#allocation5 + $0x4d4] ss:$8 sps:$4 sm:$0xff]  }
 0x18b   :  { %2905 = vmatpush1.bf16.msra.mxu0 %v4701_v17  ;;  %2701 = vmatprep.subr.bf16.mxu1 %v4706_v19  ;;  %v4797_v17 = vld [vmem:[#allocation5 + $0x9d4] ss:$8 sps:$4 sm:$0xff]   ;;  %v4792_v19 = vld [vmem:[#allocation5 + $0x4d0] ss:$8 sps:$4 sm:$0xff]  }
 0x18c   :  { %2906 = vmatprep.subr.bf16.mxu0 %v4709_v21  ;;  %v4795_v21 = vld [vmem:[#allocation5 + $0x9d0] ss:$8 sps:$4 sm:$0xff]  }
 0x18e   :  { %2702 = vmatpush1.bf16.msra.mxu1 %v4704_v22  ;;  %v4800_v22 = vld [vmem:[#allocation5 + $0x4e4] ss:$8 sps:$4 sm:$0xff]  }
 0x18f   :  { %2907 = vmatpush1.bf16.msra.mxu0 %v4707_v23  ;;  %2712 = vmatprep.subr.bf16.mxu1 %v4714_v26  ;;  %v4803_v23 = vld [vmem:[#allocation5 + $0x9e4] ss:$8 sps:$4 sm:$0xff]   ;;  %v4798_v26 = vld [vmem:[#allocation5 + $0x4e0] ss:$8 sps:$4 sm:$0xff]  }
 0x190   :  { %2917 = vmatprep.subr.bf16.mxu0 %v4719_v27  ;;  %v4801_v27 = vld [vmem:[#allocation5 + $0x9e0] ss:$8 sps:$4 sm:$0xff]  }
 0x191   :  { %2704 = vmatmul.mubr.bf16.vlgmr.msra.gmra.mrb[0].mxu1 %v3667_v20  ;;  %v4809_v20 = vld [vmem:[#allocation5 + $0x9f4] ss:$8 sps:$4 sm:$0xff]  }
 0x192   :  { %2909 = vmatmul.mubr.bf16.vlgmr.msra.gmra.mrb[0].mxu0 %v3677_v30  ;;  %2713 = vmatpush1.bf16.msra.mxu1 %v4712_v18  ;;  %v4806_v18 = vld [vmem:[#allocation5 + $0x4f4] ss:$8 sps:$4 sm:$0xff]   ;;  %v4804_v30 = vld [vmem:[#allocation5 + $0x4f0] ss:$8 sps:$4 sm:$0xff]  }
 0x193   :  { %2918 = vmatpush1.bf16.msra.mxu0 %v4717_v31  ;;  %2714 = vmatprep.subr.bf16.mxu1 %v4722_v32  ;;  %v4807_v31 = vld [vmem:[#allocation5 + $0x9f0] ss:$8 sps:$4 sm:$0xff]   ;;  %v4816_v32 = vld [vmem:[#allocation5 + $0xa04] ss:$8 sps:$4 sm:$0xff]  }
 0x194   :  { %2919 = vmatprep.subr.bf16.mxu0 %v4725_v33  ;;  %2744 = vmatprep.mubr.bf16.mxu1 %v3670_v36  ;;  %v5387_v33 = vld [vmem:[#allocation2 + $0x50] sm:$0xff]  ;;  %v4814_v36 = vld [vmem:[#allocation5 + $0xa00] ss:$8 sps:$4 sm:$0xff]  }
 0x195   :  { %2949 = vmatprep.mubr.bf16.mxu0 %v3680_v37  ;;  %v3682_v37 = vcombine.high %v5387_v33, %v5387_v33 }
 0x196   :  { %2715 = vmatpush1.bf16.msra.mxu1 %v4720_v34  ;;  %v3669_v34 = vcombine.low %v5375_v28, %v5375_v28  ;;  %v4820_v28 = vld [vmem:[#allocation5 + $0xa20] ss:$8 sps:$4 sm:$0xff]  }
 0x197   :  { %2920 = vmatpush1.bf16.msra.mxu0 %v4723_v35  ;;  %2716 = vmatprep.subr.bf16.mxu1 %v4728_v24  ;;  %v3679_v35 = vcombine.low %v5377_v29, %v5377_v29  ;;  %v4819_v24 = vld [vmem:[#allocation5 + $0xa14] ss:$8 sps:$4 sm:$0xff]   ;;  %v4823_v29 = vld [vmem:[#allocation5 + $0xa30] ss:$8 sps:$4 sm:$0xff]  }
 0x198   :  { %2921 = vmatprep.subr.bf16.mxu0 %v4731_v25  ;;  %v4817_v25 = vld [vmem:[#allocation5 + $0xa10] ss:$8 sps:$4 sm:$0xff]  }
 0x19a   :  { %2717 = vmatpush1.bf16.msra.mxu1 %v4726_v38  ;;  %v4822_v38 = vld [vmem:[#allocation5 + $0xa24] ss:$8 sps:$4 sm:$0xff]  }
 0x19b   :  { %2922 = vmatpush1.bf16.msra.mxu0 %v4729_v39  ;;  %2718 = vmatprep.subr.bf16.mxu1 %v4734_v40  ;;  %v4825_v39 = vld [vmem:[#allocation5 + $0xa34] ss:$8 sps:$4 sm:$0xff]   ;;  %v4828_v40 = vld [vmem:[#allocation5 + $0xa44] ss:$8 sps:$4 sm:$0xff]  }
 0x19c   :  { %2923 = vmatprep.subr.bf16.mxu0 %v4737_v41  ;;  %v4826_v41 = vld [vmem:[#allocation5 + $0xa40] ss:$8 sps:$4 sm:$0xff]  }
 0x19e   :  { %2719 = vmatpush1.bf16.msra.mxu1 %v4732_v42  ;;  %v4831_v42 = vld [vmem:[#allocation5 + $0xa54] ss:$8 sps:$4 sm:$0xff]  }
 0x19f   :  { %2924 = vmatpush1.bf16.msra.mxu0 %v4735_v43  ;;  %2720 = vmatprep.subr.bf16.mxu1 %v4740_v44  ;;  %v4829_v43 = vld [vmem:[#allocation5 + $0xa50] ss:$8 sps:$4 sm:$0xff]   ;;  %v4834_v44 = vld [vmem:[#allocation5 + $0xa64] ss:$8 sps:$4 sm:$0xff]  }
 0x1a0   :  { %2925 = vmatprep.subr.bf16.mxu0 %v4743_v45  ;;  %v4832_v45 = vld [vmem:[#allocation5 + $0xa60] ss:$8 sps:$4 sm:$0xff]  }
 0x1a2   :  { %2721 = vmatpush1.bf16.msra.mxu1 %v4738_v46  ;;  %v4837_v46 = vld [vmem:[#allocation5 + $0xa74] ss:$8 sps:$4 sm:$0xff]  }
 0x1a3   :  { %2926 = vmatpush1.bf16.msra.mxu0 %v4741_v47  ;;  %2722 = vmatprep.subr.bf16.mxu1 %v4746_v48  ;;  %v4835_v47 = vld [vmem:[#allocation5 + $0xa70] ss:$8 sps:$4 sm:$0xff]   ;;  %v4840_v48 = vld [vmem:[#allocation5 + $0xa84] ss:$8 sps:$4 sm:$0xff]  }
 0x1a4   :  { %2927 = vmatprep.subr.bf16.mxu0 %v4749_v49  ;;  %v4838_v49 = vld [vmem:[#allocation5 + $0xa80] ss:$8 sps:$4 sm:$0xff]  }
 0x1a6   :  { %2723 = vmatpush1.bf16.msra.mxu1 %v4744_v50  ;;  %v4843_v50 = vld [vmem:[#allocation5 + $0xa94] ss:$8 sps:$4 sm:$0xff]  }
 0x1a7   :  { %2928 = vmatpush1.bf16.msra.mxu0 %v4747_v51  ;;  %2724 = vmatprep.subr.bf16.mxu1 %v4752_v52  ;;  %v4841_v51 = vld [vmem:[#allocation5 + $0xa90] ss:$8 sps:$4 sm:$0xff]   ;;  %v4846_v52 = vld [vmem:[#allocation5 + $0xaa4] ss:$8 sps:$4 sm:$0xff]  }
 0x1a8   :  { %2929 = vmatprep.subr.bf16.mxu0 %v4755_v53  ;;  %v4844_v53 = vld [vmem:[#allocation5 + $0xaa0] ss:$8 sps:$4 sm:$0xff]  }
 0x1aa   :  { %2725 = vmatpush1.bf16.msra.mxu1 %v4750_v54  ;;  %v4849_v54 = vld [vmem:[#allocation5 + $0xab4] ss:$8 sps:$4 sm:$0xff]  }
 0x1ab   :  { %2930 = vmatpush1.bf16.msra.mxu0 %v4753_v55  ;;  %2726 = vmatprep.subr.bf16.mxu1 %v4758_v56  ;;  %v4847_v55 = vld [vmem:[#allocation5 + $0xab0] ss:$8 sps:$4 sm:$0xff]   ;;  %v4852_v56 = vld [vmem:[#allocation5 + $0xac4] ss:$8 sps:$4 sm:$0xff]  }
 0x1ac   :  { %2931 = vmatprep.subr.bf16.mxu0 %v4761_v57  ;;  %v4850_v57 = vld [vmem:[#allocation5 + $0xac0] ss:$8 sps:$4 sm:$0xff]  }
 0x1ae   :  { %2727 = vmatpush1.bf16.msra.mxu1 %v4756_v58  ;;  %v4855_v58 = vld [vmem:[#allocation5 + $0xad4] ss:$8 sps:$4 sm:$0xff]  }
 0x1af   :  { %2932 = vmatpush1.bf16.msra.mxu0 %v4759_v59  ;;  %2728 = vmatprep.subr.bf16.mxu1 %v4764_v60  ;;  %v4853_v59 = vld [vmem:[#allocation5 + $0xad0] ss:$8 sps:$4 sm:$0xff]   ;;  %v4858_v60 = vld [vmem:[#allocation5 + $0xae4] ss:$8 sps:$4 sm:$0xff]  }
 0x1b0   :  { %2933 = vmatprep.subr.bf16.mxu0 %v4767_v61  ;;  %v4856_v61 = vld [vmem:[#allocation5 + $0xae0] ss:$8 sps:$4 sm:$0xff]  }
 0x1b2   :  { %2729 = vmatpush1.bf16.msra.mxu1 %v4762_v62  ;;  %v4861_v62 = vld [vmem:[#allocation5 + $0xaf4] ss:$8 sps:$4 sm:$0xff]  }
 0x1b3   :  { %2934 = vmatpush1.bf16.msra.mxu0 %v4765_v63  ;;  %2730 = vmatprep.subr.bf16.mxu1 %v4770_v0  ;;  %v4859_v63 = vld [vmem:[#allocation5 + $0xaf0] ss:$8 sps:$4 sm:$0xff]   ;;  %v4866_v0 = vld [vmem:[#allocation5 + $0xb04] ss:$8 sps:$4 sm:$0xff]  }
 0x1b4   :  { %2935 = vmatprep.subr.bf16.mxu0 %v4773_v1  ;;  %v5395_v1 = vld [vmem:[#allocation2 + $0x58] sm:$0xff] }
 0x1b6   :  { %2731 = vmatpush1.bf16.msra.mxu1 %v4768_v2  ;;  %v3681_v2 = vcombine.low %v5387_v33, %v5387_v33  ;;  %v4891_v33 = vld [vmem:[#allocation5 + $0xb90] ss:$8 sps:$4 sm:$0xff]  }
 0x1b7   :  { %2936 = vmatpush1.bf16.msra.mxu0 %v4771_v3  ;;  %2732 = vmatprep.subr.bf16.mxu1 %v4776_v4  ;;  %v4864_v3 = vld [vmem:[#allocation5 + $0xb00] ss:$8 sps:$4 sm:$0xff]   ;;  %v3684_v4 = vcombine.high %v5395_v1, %v5395_v1 }
 0x1b8   :  { %2937 = vmatprep.subr.bf16.mxu0 %v4779_v5  ;;  %v4869_v5 = vld [vmem:[#allocation5 + $0xb14] ss:$8 sps:$4 sm:$0xff]  }
 0x1ba   :  { %2733 = vmatpush1.bf16.msra.mxu1 %v4774_v6  ;;  %v4867_v6 = vld [vmem:[#allocation5 + $0xb10] ss:$8 sps:$4 sm:$0xff]  }
 0x1bb   :  { %2938 = vmatpush1.bf16.msra.mxu0 %v4777_v7  ;;  %2734 = vmatprep.subr.bf16.mxu1 %v4782_v8  ;;  %v4872_v7 = vld [vmem:[#allocation5 + $0xb24] ss:$8 sps:$4 sm:$0xff]   ;;  %v4870_v8 = vld [vmem:[#allocation5 + $0xb20] ss:$8 sps:$4 sm:$0xff]  }
 0x1bc   :  { %2939 = vmatprep.subr.bf16.mxu0 %v4785_v9  ;;  %v4875_v9 = vld [vmem:[#allocation5 + $0xb34] ss:$8 sps:$4 sm:$0xff]  }
 0x1be   :  { %2735 = vmatpush1.bf16.msra.mxu1 %v4780_v10  ;;  %v4873_v10 = vld [vmem:[#allocation5 + $0xb30] ss:$8 sps:$4 sm:$0xff]  }
 0x1bf   :  { %2940 = vmatpush1.bf16.msra.mxu0 %v4783_v11  ;;  %2736 = vmatprep.subr.bf16.mxu1 %v4788_v12  ;;  %v4878_v11 = vld [vmem:[#allocation5 + $0xb44] ss:$8 sps:$4 sm:$0xff]   ;;  %v4876_v12 = vld [vmem:[#allocation5 + $0xb40] ss:$8 sps:$4 sm:$0xff]  }
 0x1c0   :  { %2941 = vmatprep.subr.bf16.mxu0 %v4791_v13  ;;  %v4881_v13 = vld [vmem:[#allocation5 + $0xb54] ss:$8 sps:$4 sm:$0xff]  }
 0x1c2   :  { %2737 = vmatpush1.bf16.msra.mxu1 %v4786_v14  ;;  %v4879_v14 = vld [vmem:[#allocation5 + $0xb50] ss:$8 sps:$4 sm:$0xff]  }
 0x1c3   :  { %2942 = vmatpush1.bf16.msra.mxu0 %v4789_v15  ;;  %2738 = vmatprep.subr.bf16.mxu1 %v4794_v16  ;;  %v4884_v15 = vld [vmem:[#allocation5 + $0xb64] ss:$8 sps:$4 sm:$0xff]   ;;  %v4882_v16 = vld [vmem:[#allocation5 + $0xb60] ss:$8 sps:$4 sm:$0xff]  }
 0x1c4   :  { %2943 = vmatprep.subr.bf16.mxu0 %v4797_v17  ;;  %v4887_v17 = vld [vmem:[#allocation5 + $0xb74] ss:$8 sps:$4 sm:$0xff]  }
 0x1c6   :  { %2739 = vmatpush1.bf16.msra.mxu1 %v4792_v19  ;;  %v4914_v19 = vld [vmem:[#allocation7 + $0x40] sm:$0xff]  }
 0x1c7   :  { %2944 = vmatpush1.bf16.msra.mxu0 %v4795_v21  ;;  %2740 = vmatprep.subr.bf16.mxu1 %v4800_v22  ;;  %v4915_v21 = vld [vmem:[#allocation7] sm:$0xff]   ;;  %v4916_v22 = vld [vmem:[#allocation7 + $0x48] sm:$0xff]  }
 0x1c8   :  { %2945 = vmatprep.subr.bf16.mxu0 %v4803_v23  ;;  %v4885_v23 = vld [vmem:[#allocation5 + $0xb70] ss:$8 sps:$4 sm:$0xff]  }
 0x1ca   :  { %2741 = vmatpush1.bf16.msra.mxu1 %v4798_v26  ;;  %v4917_v26 = vld [vmem:[#allocation7 + $0x8] sm:$0xff]  }
 0x1cb   :  { %2946 = vmatpush1.bf16.msra.mxu0 %v4801_v27  ;;  %2742 = vmatprep.subr.bf16.mxu1 %v4806_v18  ;;  %v4890_v27 = vld [vmem:[#allocation5 + $0xb84] ss:$8 sps:$4 sm:$0xff]   ;;  %v4918_v18 = vld [vmem:[#allocation7 + $0x50] sm:$0xff]  }
 0x1cc   :  { %2947 = vmatprep.subr.bf16.mxu0 %v4809_v20  ;;  %v4888_v20 = vld [vmem:[#allocation5 + $0xb80] ss:$8 sps:$4 sm:$0xff]  }
 0x1ce   :  { %2743 = vmatpush1.bf16.msra.mxu1 %v4804_v30  ;;  %v4919_v30 = vld [vmem:[#allocation7 + $0x10] sm:$0xff]  }
 0x1cf   :  { %2948 = vmatpush1.bf16.msra.mxu0 %v4807_v31  ;;  %4117 = vmatprep.subr.bf16.mxu1 %v4914_v19  ;;  %v4893_v31 = vld [vmem:[#allocation5 + $0xb94] ss:$8 sps:$4 sm:$0xff]  }
 0x1d0   :  { %2958 = vmatprep.subr.bf16.mxu0 %v4816_v32  ;;  %v4920_v32 = vld [vmem:[#allocation7 + $0x58] sm:$0xff]   ;;  %v4936_v19 = vld [vmem:[#allocation8 + $0x30] sm:$0xff]  }
 0x1d1   :  { %2745 = vmatmul.mubr.bf16.vlgmr.msra.gmra.mrb[0].mxu1 %v3669_v34  ;;  %v4921_v34 = vld [vmem:[#allocation7 + $0x18] sm:$0xff]  }
 0x1d2   :  { %2950 = vmatmul.mubr.bf16.vlgmr.msra.gmra.mrb[0].mxu0 %v3679_v35  ;;  %4118 = vmatpush3.bf16.msra.mxu1 %v4915_v21  ;;  %v4896_v35 = vld [vmem:[#allocation5 + $0xba4] ss:$8 sps:$4 sm:$0xff]   ;;  %v4937_v21 = vld [vmem:[#allocation8 + $0x38] sm:$0xff]  }
 0x1d3   :  { %2959 = vmatpush1.bf16.msra.mxu0 %v4814_v36  ;;  %2990 = vmatprep.mubr.bf16.mxu0 %v3682_v37  ;;  %v4922_v36 = vld [vmem:[#allocation7 + $0x60] sm:$0xff]  }
 0x1d4   :  { %2960 = vmatprep.subr.bf16.mxu0 %v4819_v24  ;;  %4119 = vmatprep.subr.bf16.mxu1 %v4916_v22  ;;  %v4894_v37 = vld [vmem:[#allocation5 + $0xba0] ss:$8 sps:$4 sm:$0xff]  }
 0x1d5   :  { %v4923_v24 = vld [vmem:[#allocation7 + $0x20] sm:$0xff]  }
 0x1d6   :  { %4120 = vmatpush3.bf16.msra.mxu1 %v4917_v26 }
 0x1d7   :  { %2961 = vmatpush1.bf16.msra.mxu0 %v4817_v25  ;;  %4121 = vmatprep.subr.bf16.mxu1 %v4918_v18  ;;  %v4899_v25 = vld [vmem:[#allocation5 + $0xbb4] ss:$8 sps:$4 sm:$0xff]  }
 0x1d8   :  { %2962 = vmatprep.subr.bf16.mxu0 %v4822_v38  ;;  %v4924_v38 = vld [vmem:[#allocation7 + $0x68] sm:$0xff]  }
 0x1da   :  { %4122 = vmatpush3.bf16.msra.mxu1 %v4919_v30 }
 0x1db   :  { %2963 = vmatpush1.bf16.msra.mxu0 %v4820_v28  ;;  %4123 = vmatprep.subr.bf16.mxu1 %v4920_v32  ;;  %v4897_v28 = vld [vmem:[#allocation5 + $0xbb0] ss:$8 sps:$4 sm:$0xff]   ;;  %v4938_v32 = vld [vmem:[#allocation10] sm:$0xff]  }
 0x1dc   :  { %2964 = vmatprep.subr.bf16.mxu0 %v4825_v39  ;;  %v4925_v39 = vld [vmem:[#allocation7 + $0x28] sm:$0xff]  }
 0x1de   :  { %4124 = vmatpush3.bf16.msra.mxu1 %v4921_v34  ;;  %v4939_v34 = vld [vmem:[#allocation10 + $0x8] sm:$0xff]  }
 0x1df   :  { %2965 = vmatpush1.bf16.msra.mxu0 %v4823_v29  ;;  %4125 = vmatprep.subr.bf16.mxu1 %v4922_v36  ;;  %v4902_v29 = vld [vmem:[#allocation5 + $0xbc4] ss:$8 sps:$4 sm:$0xff]   ;;  %v4941_v36 = vld [vmem:[#allocation10 + $0x18] sm:$0xff]  }
 0x1e0   :  { %2966 = vmatprep.subr.bf16.mxu0 %v4828_v40  ;;  %v4900_v40 = vld [vmem:[#allocation5 + $0xbc0] ss:$8 sps:$4 sm:$0xff]  }
 0x1e2   :  { %4126 = vmatpush3.bf16.msra.mxu1 %v4923_v24  ;;  %v4943_v24 = vld [vmem:[#allocation10 + $0x28] sm:$0xff]  }
 0x1e3   :  { %2967 = vmatpush1.bf16.msra.mxu0 %v4826_v41  ;;  %4127 = vmatprep.subr.bf16.mxu1 %v4924_v38  ;;  %v4905_v41 = vld [vmem:[#allocation5 + $0xbd4] ss:$8 sps:$4 sm:$0xff]  }
 0x1e4   :  { %2968 = vmatprep.subr.bf16.mxu0 %v4831_v42  ;;  %v4903_v42 = vld [vmem:[#allocation5 + $0xbd0] ss:$8 sps:$4 sm:$0xff]  }
 0x1e5   :  { %v4945_v38 = vld [vmem:[#allocation10 + $0x38] sm:$0xff]  }
 0x1e6   :  { %4128 = vmatpush3.bf16.msra.mxu1 %v4925_v39 }
 0x1e7   :  { %2969 = vmatpush1.bf16.msra.mxu0 %v4829_v43  ;;  %v4908_v43 = vld [vmem:[#allocation5 + $0xbe4] ss:$8 sps:$4 sm:$0xff]  }
 0x1e8   :  { %2970 = vmatprep.subr.bf16.mxu0 %v4834_v44  ;;  %v4906_v44 = vld [vmem:[#allocation5 + $0xbe0] ss:$8 sps:$4 sm:$0xff]  }
 0x1eb   :  { %2971 = vmatpush1.bf16.msra.mxu0 %v4832_v45  ;;  %v4911_v45 = vld [vmem:[#allocation5 + $0xbf4] ss:$8 sps:$4 sm:$0xff]  }
 0x1ec   :  { %2972 = vmatprep.subr.bf16.mxu0 %v4837_v46  ;;  %v4909_v46 = vld [vmem:[#allocation5 + $0xbf0] ss:$8 sps:$4 sm:$0xff]  }
 0x1ef   :  { %2973 = vmatpush1.bf16.msra.mxu0 %v4835_v47  ;;  %v3683_v47 = vcombine.low %v5395_v1, %v5395_v1 }
 0x1f0   :  { %2974 = vmatprep.subr.bf16.mxu0 %v4840_v48  ;;  %v4926_v48 = vld [vmem:[#allocation7 + $0x70] sm:$0xff]  }
 0x1f1   :  { %4129 = vmatprep.subr.bf16.mxu1 %v4926_v48  ;;  %v4949_v48 = vld [vmem:[#allocation11 + $0x18] sm:$0xff]  }
 0x1f3   :  { %2975 = vmatpush1.bf16.msra.mxu0 %v4838_v49 }
 0x1f4   :  { %2976 = vmatprep.subr.bf16.mxu0 %v4843_v50  ;;  %v4927_v50 = vld [vmem:[#allocation7 + $0x30] sm:$0xff]  }
 0x1f5   :  { %4130 = vmatpush3.bf16.msra.mxu1 %v4927_v50  ;;  %v4951_v50 = vld [vmem:[#allocation11 + $0x28] sm:$0xff]  }
 0x1f7   :  { %2977 = vmatpush1.bf16.msra.mxu0 %v4841_v51 }
 0x1f8   :  { %2978 = vmatprep.subr.bf16.mxu0 %v4846_v52 }
 0x1fb   :  { %2979 = vmatpush1.bf16.msra.mxu0 %v4844_v53 }
 0x1fc   :  { %2980 = vmatprep.subr.bf16.mxu0 %v4849_v54  ;;  %v4928_v54 = vld [vmem:[#allocation7 + $0x78] sm:$0xff]  }
 0x1fd   :  { %4131 = vmatprep.subr.bf16.mxu1 %v4928_v54 }
 0x1ff   :  { %2981 = vmatpush1.bf16.msra.mxu0 %v4847_v55  ;;  %v4929_v55 = vld [vmem:[#allocation7 + $0x38] sm:$0xff]  }
 0x200   :  { %2982 = vmatprep.subr.bf16.mxu0 %v4852_v56  ;;  %4132 = vmatpush3.bf16.msra.mxu1 %v4929_v55  ;;  %v5184_v56 = vmov 0.0  }
 0x201   :  { %4175 = vmatprep.subr.bf16.mxu1 %v5184_v56 }
 0x203   :  { %2983 = vmatpush1.bf16.msra.mxu0 %v4850_v57  ;;  %v534_v57 = vlaneseq }
 0x204   :  { %2984 = vmatprep.subr.bf16.mxu0 %v4855_v58 }
 0x205   :  { %v535_v58 = vshrl.u32 %v534_v57, 7 }
 0x207   :  { %2985 = vmatpush1.bf16.msra.mxu0 %v4853_v59  ;;  %v536_v59 = vsub.s32 0, %v535_v58 }
 0x208   :  { %2986 = vmatprep.subr.bf16.mxu0 %v4858_v60  ;;  %v532_v60 = vld [vmem:[#allocation14] ss:$8 sm:$0x3] }
 0x20b   :  { %2987 = vmatpush1.bf16.msra.mxu0 %v4856_v61  ;;  %v540_v61 = vsub.s32 1, %v535_v58 }
 0x20c   :  { %2988 = vmatprep.subr.bf16.mxu0 %v4861_v62  ;;  %v537_v62 = vrot.slane %v532_v60, %v536_v59 }
 0x20f   :  { %2989 = vmatpush1.bf16.msra.mxu0 %v4859_v63  ;;  %v541_v63 = vrot.slane %v532_v60, %v540_v61  ;;  %v4954_v61 = vld [vmem:[#allocation13] sm:$0xff]  }
 0x210   :  { %2999 = vmatprep.subr.bf16.mxu0 %v4866_v0 }
 0x212   :  { %2991 = vmatmul.mubr.bf16.vlgmr.msra.gmra.mrb[0].mxu0 %v3681_v2 }
 0x213   :  { %3000 = vmatpush1.bf16.msra.mxu0 %v4864_v3  ;;  %3031 = vmatprep.mubr.bf16.mxu0 %v3684_v4 }
 0x214   :  { %3001 = vmatprep.subr.bf16.mxu0 %v4869_v5 }
 0x217   :  { %3002 = vmatpush1.bf16.msra.mxu0 %v4867_v6 }
 0x218   :  { %3003 = vmatprep.subr.bf16.mxu0 %v4872_v7 }
 0x21b   :  { %3004 = vmatpush1.bf16.msra.mxu0 %v4870_v8 }
 0x21c   :  { %3005 = vmatprep.subr.bf16.mxu0 %v4875_v9 }
 0x21f   :  { %3006 = vmatpush1.bf16.msra.mxu0 %v4873_v10 }
 0x220   :  { %3007 = vmatprep.subr.bf16.mxu0 %v4878_v11  ;;  %v4930_v11 = vld [vmem:[#allocation8] sm:$0xff]  }
 0x223   :  { %3008 = vmatpush1.bf16.msra.mxu0 %v4876_v12 }
 0x224   :  { %3009 = vmatprep.subr.bf16.mxu0 %v4881_v13  ;;  %v4931_v13 = vld [vmem:[#allocation8 + $0x8] sm:$0xff]  }
 0x227   :  { %3010 = vmatpush1.bf16.msra.mxu0 %v4879_v14  ;;  %v4932_v14 = vld [vmem:[#allocation8 + $0x10] sm:$0xff]  }
 0x228   :  { %3011 = vmatprep.subr.bf16.mxu0 %v4884_v15  ;;  %v4933_v15 = vld [vmem:[#allocation8 + $0x18] sm:$0xff]  }
 0x22b   :  { %3012 = vmatpush1.bf16.msra.mxu0 %v4882_v16  ;;  %v4934_v16 = vld [vmem:[#allocation8 + $0x20] sm:$0xff]  }
 0x22c   :  { %3013 = vmatprep.subr.bf16.mxu0 %v4887_v17  ;;  %v4935_v17 = vld [vmem:[#allocation8 + $0x28] sm:$0xff]  }
 0x22f   :  { %3014 = vmatpush1.bf16.msra.mxu0 %v4885_v23  ;;  %v3076_v23 = vld [vmem:[#allocation14 + $0x1] ss:$0 sm:$0xff] }
 0x230   :  { %3015 = vmatprep.subr.bf16.mxu0 %v4890_v27 }
 0x233   :  { %3016 = vmatpush1.bf16.msra.mxu0 %v4888_v20 }
 0x234   :  { %3017 = vmatprep.subr.bf16.mxu0 %v4893_v31 }
 0x237   :  { %3018 = vmatpush1.bf16.msra.mxu0 %v4891_v33 }
 0x238   :  { %3019 = vmatprep.subr.bf16.mxu0 %v4896_v35  ;;  %v4940_v35 = vld [vmem:[#allocation10 + $0x10] sm:$0xff]  }
 0x23b   :  { %3020 = vmatpush1.bf16.msra.mxu0 %v4894_v37  ;;  %v4942_v37 = vld [vmem:[#allocation10 + $0x20] sm:$0xff]  }
 0x23c   :  { %3021 = vmatprep.subr.bf16.mxu0 %v4899_v25  ;;  %v4944_v25 = vld [vmem:[#allocation10 + $0x30] sm:$0xff]  }
 0x23f   :  { %3022 = vmatpush1.bf16.msra.mxu0 %v4897_v28  ;;  %v3231_v28 = vld [vmem:[#allocation14 + $0x2] ss:$0 sm:$0xff] }
 0x240   :  { %3023 = vmatprep.subr.bf16.mxu0 %v4902_v29 }
 0x243   :  { %3024 = vmatpush1.bf16.msra.mxu0 %v4900_v40 }
 0x244   :  { %3025 = vmatprep.subr.bf16.mxu0 %v4905_v41 }
 0x247   :  { %3026 = vmatpush1.bf16.msra.mxu0 %v4903_v42 }
 0x248   :  { %3027 = vmatprep.subr.bf16.mxu0 %v4908_v43 }
 0x24b   :  { %3028 = vmatpush1.bf16.msra.mxu0 %v4906_v44  ;;  %v4946_v44 = vld [vmem:[#allocation11] sm:$0xff]  }
 0x24c   :  { %3029 = vmatprep.subr.bf16.mxu0 %v4911_v45 }
 0x24f   :  { %3030 = vmatpush1.bf16.msra.mxu0 %v4909_v46  ;;  %v4947_v46 = vld [vmem:[#allocation11 + $0x8] sm:$0xff]  }
 0x252   :  { %3032 = vmatmul.mubr.bf16.vlgmr.msra.gmra.mrb[0].mxu0 %v3683_v47  ;;  %v4948_v47 = vld [vmem:[#allocation11 + $0x10] sm:$0xff]  }
 0x2a4   :  { %v2746_v49 = vpop.f32.mrb[0].mxu1 }
 0x2a5   :  { %v2748_v51 = vpop.f32.mrb[1].mxu1  ;;  %v4255_v0 = vadd.f32 %v2746_v49, %v537_v62  ;;  %v4950_v49 = vld [vmem:[#allocation11 + $0x20] sm:$0xff]  }
 0x2a6   :  { %v2750_v52 = vpop.f32.mrb[2].mxu1  ;;  %v4257_v1 = vadd.f32 %v2748_v51, %v541_v63  ;;  %v4952_v51 = vld [vmem:[#allocation11 + $0x30] sm:$0xff]   ;;  %v4955_v63 = vld [vmem:[#allocation13 + $0x8] sm:$0xff]  }
 0x2a7   :  { %v2751_v53 = vpop.f32.mrb[3].mxu1  ;;  %v4953_v52 = vld [vmem:[#allocation11 + $0x38] sm:$0xff]  }
 0x2a8   :  { %v3338_v53 = vld [vmem:[#allocation14 + $0x3] ss:$0 sm:$0xff] }
 0x325   :  { %v3033_v2 = vpop.f32.mrb[0].mxu0 }
 0x326   :  { %v4256_v3 = vadd.f32 %v4255_v0, %v3033_v2  ;;  %v3035_v4 = vpop.f32.mrb[1].mxu0  ;;  %v4956_v0 = vld [vmem:[#allocation13 + $0x10] sm:$0xff]   ;;  %v4958_v2 = vld [vmem:[#allocation13 + $0x20] sm:$0xff]  }
 0x327   :  { %v4258_v5 = vadd.f32 %v4257_v1, %v3035_v4  ;;  %v3037_v6 = vpop.f32.mrb[2].mxu0  ;;  %v4957_v1 = vld [vmem:[#allocation13 + $0x18] sm:$0xff]   ;;  %v4960_v4 = vld [vmem:[#allocation13 + $0x30] sm:$0xff]  }
 0x328   :  { %v3040_v7 = vmax.f32 %v4256_v3, 0.0  ;;  %v3038_v8 = vpop.f32.mrb[3].mxu0  ;;  %v4959_v3 = vld [vmem:[#allocation13 + $0x28] sm:$0xff]   ;;  %v3445_v6 = vld [vmem:[#allocation14 + $0x4] ss:$0 sm:$0xff] }
 0x329   :  { %v3041_v9 = vmax.f32 %v4258_v5, 0.0  ;;  %v4961_v5 = vld [vmem:[#allocation13 + $0x38] sm:$0xff]  }
 0x32a   :  { %v3042_v12 = vpack.c.bf16 %v3040_v7, %v3040_v7 }
 0x32b   :  { %v3043_v10 = vpack.c.bf16 %v3041_v9, %v3041_v9 }
 0x32d   :  { %3205 = vmatprep.mubr.bf16.mxu1 %v3043_v10 }
 0x32e   :  { %3206 = vmatmul.mubr.bf16.vlgmr.msra.gmra.mrb[4].mxu1 %v3042_v12 }
 0x32f   :  { %4176 = vmatpush3.bf16.msra.mxu1 %v4930_v11  ;;  %4191 = vmatprep.mubr.msk.bf16.mxu1 %vm5185_vm0, %v5184_v56 }
 0x330   :  { %4177 = vmatprep.subr.bf16.mxu1 %v5184_v56 }
 0x333   :  { %4178 = vmatpush3.bf16.msra.mxu1 %v4931_v13 }
 0x334   :  { %4179 = vmatprep.subr.bf16.mxu1 %v5184_v56 }
 0x337   :  { %4180 = vmatpush3.bf16.msra.mxu1 %v4932_v14  ;;  %v3552_v14 = vld [vmem:[#allocation14 + $0x5] ss:$0 sm:$0xff] }
 0x338   :  { %4181 = vmatprep.subr.bf16.mxu1 %v5184_v56 }
 0x33b   :  { %4182 = vmatpush3.bf16.msra.mxu1 %v4933_v15 }
 0x33c   :  { %4183 = vmatprep.subr.bf16.mxu1 %v5184_v56 }
 0x33f   :  { %4184 = vmatpush3.bf16.msra.mxu1 %v4934_v16 }
 0x340   :  { %4185 = vmatprep.subr.bf16.mxu1 %v5184_v56 }
 0x343   :  { %4186 = vmatpush3.bf16.msra.mxu1 %v4935_v17 }
 0x344   :  { %4187 = vmatprep.subr.bf16.mxu1 %v5184_v56 }
 0x347   :  { %4188 = vmatpush3.bf16.msra.mxu1 %v4936_v19 }
 0x348   :  { %4189 = vmatprep.subr.bf16.mxu1 %v5184_v56 }
 0x34b   :  { %4190 = vmatpush3.bf16.msra.mxu1 %v4937_v21 }
 0x34c   :  { %4195 = vmatprep.subr.bf16.mxu1 %v5184_v56 }
 0x401   :  { %v4133_v22 = vpop.f32.mrb[4].mxu1 }
 0x402   :  { %v4134_v26 = vpop.f32.mrb[5].mxu1 }
 0x403   :  { %v4135_v27 = vadd.f32 %v4134_v26, %v4133_v22  ;;  %v4136_v18 = vpop.f32.mrb[6].mxu1 }
 0x404   :  { %v4137_v20 = vpop.f32.mrb[7].mxu1 }
 0x405   :  { %v3208_v30 = vadd.f32 %v4135_v27, %v3076_v23 }
 0x407   :  { %v3213_v31 = vmax.f32 %v3208_v30, 0.0 }
 0x409   :  { %v3214_v33 = vpack.c.bf16 %v3213_v31, %v3213_v31 }
 0x40b   :  { %4192 = vmatmul.mubr.bf16.vlgmr.msra.gmra.mrb[8].mxu1 %v3214_v33 }
 0x40c   :  { %4196 = vmatpush3.bf16.msra.mxu1 %v4938_v32  ;;  %4211 = vmatprep.mubr.msk.bf16.mxu1 %vm5185_vm0, %v5184_v56 }
 0x40d   :  { %4197 = vmatprep.subr.bf16.mxu1 %v5184_v56 }
 0x410   :  { %4198 = vmatpush3.bf16.msra.mxu1 %v4939_v34 }
 0x411   :  { %4199 = vmatprep.subr.bf16.mxu1 %v5184_v56 }
 0x414   :  { %4200 = vmatpush3.bf16.msra.mxu1 %v4940_v35 }
 0x415   :  { %4201 = vmatprep.subr.bf16.mxu1 %v5184_v56 }
 0x418   :  { %4202 = vmatpush3.bf16.msra.mxu1 %v4941_v36 }
 0x419   :  { %4203 = vmatprep.subr.bf16.mxu1 %v5184_v56 }
 0x41c   :  { %4204 = vmatpush3.bf16.msra.mxu1 %v4942_v37 }
 0x41d   :  { %4205 = vmatprep.subr.bf16.mxu1 %v5184_v56 }
 0x420   :  { %4206 = vmatpush3.bf16.msra.mxu1 %v4943_v24 }
 0x421   :  { %4207 = vmatprep.subr.bf16.mxu1 %v5184_v56 }
 0x424   :  { %4208 = vmatpush3.bf16.msra.mxu1 %v4944_v25 }
 0x425   :  { %4209 = vmatprep.subr.bf16.mxu1 %v5184_v56 }
 0x428   :  { %4210 = vmatpush3.bf16.msra.mxu1 %v4945_v38 }
 0x429   :  { %4215 = vmatprep.subr.bf16.mxu1 %v5184_v56 }
 0x4de   :  { %v3314_v39 = vpop.f32.mrb[8].mxu1 }
 0x4df   :  { %v3315_v29 = vadd.f32 %v3314_v39, %v3231_v28  ;;  %v4193_v40 = vpop.f32.mrb[9].mxu1 }
 0x4e0   :  { %v3317_v41 = vpop.f32.mrb[10].mxu1 }
 0x4e1   :  { %v3320_v42 = vmax.f32 %v3315_v29, 0.0  ;;  %v4194_v43 = vpop.f32.mrb[11].mxu1 }
 0x4e3   :  { %v3321_v45 = vpack.c.bf16 %v3320_v42, %v3320_v42 }
 0x4e5   :  { %4212 = vmatmul.mubr.bf16.vlgmr.msra.gmra.mrb[12].mxu1 %v3321_v45 }
 0x4e6   :  { %4216 = vmatpush3.bf16.msra.mxu1 %v4946_v44  ;;  %4231 = vmatprep.mubr.msk.bf16.mxu1 %vm5185_vm0, %v5184_v56 }
 0x4e7   :  { %4217 = vmatprep.subr.bf16.mxu1 %v5184_v56 }
 0x4ea   :  { %4218 = vmatpush3.bf16.msra.mxu1 %v4947_v46 }
 0x4eb   :  { %4219 = vmatprep.subr.bf16.mxu1 %v5184_v56 }
 0x4ee   :  { %4220 = vmatpush3.bf16.msra.mxu1 %v4948_v47 }
 0x4ef   :  { %4221 = vmatprep.subr.bf16.mxu1 %v5184_v56 }
 0x4f2   :  { %4222 = vmatpush3.bf16.msra.mxu1 %v4949_v48 }
 0x4f3   :  { %4223 = vmatprep.subr.bf16.mxu1 %v5184_v56 }
 0x4f6   :  { %4224 = vmatpush3.bf16.msra.mxu1 %v4950_v49 }
 0x4f7   :  { %4225 = vmatprep.subr.bf16.mxu1 %v5184_v56 }
 0x4fa   :  { %4226 = vmatpush3.bf16.msra.mxu1 %v4951_v50 }
 0x4fb   :  { %4227 = vmatprep.subr.bf16.mxu1 %v5184_v56 }
 0x4fe   :  { %4228 = vmatpush3.bf16.msra.mxu1 %v4952_v51 }
 0x4ff   :  { %4229 = vmatprep.subr.bf16.mxu1 %v5184_v56 }
 0x502   :  { %4230 = vmatpush3.bf16.msra.mxu1 %v4953_v52 }
 0x503   :  { %4235 = vmatprep.subr.bf16.mxu1 %v5184_v56 }
 0x5b8   :  { %v3421_v54 = vpop.f32.mrb[12].mxu1 }
 0x5b9   :  { %v3422_v55 = vadd.f32 %v3421_v54, %v3338_v53  ;;  %v4213_v57 = vpop.f32.mrb[13].mxu1 }
 0x5ba   :  { %v3424_v58 = vpop.f32.mrb[14].mxu1 }
 0x5bb   :  { %v3427_v59 = vmax.f32 %v3422_v55, 0.0  ;;  %v4214_v60 = vpop.f32.mrb[15].mxu1 }
 0x5bd   :  { %v3428_v62 = vpack.c.bf16 %v3427_v59, %v3427_v59 }
 0x5bf   :  { %4232 = vmatmul.mubr.bf16.vlgmr.msra.gmra.mrb[16].mxu1 %v3428_v62 }
 0x5c0   :  { %4236 = vmatpush3.bf16.msra.mxu1 %v4954_v61  ;;  %4251 = vmatprep.mubr.msk.bf16.mxu1 %vm5185_vm0, %v5184_v56 }
 0x5c1   :  { %4237 = vmatprep.subr.bf16.mxu1 %v5184_v56 }
 0x5c4   :  { %4238 = vmatpush3.bf16.msra.mxu1 %v4955_v63 }
 0x5c5   :  { %4239 = vmatprep.subr.bf16.mxu1 %v5184_v56 }
 0x5c8   :  { %4240 = vmatpush3.bf16.msra.mxu1 %v4956_v0 }
 0x5c9   :  { %4241 = vmatprep.subr.bf16.mxu1 %v5184_v56 }
 0x5cc   :  { %4242 = vmatpush3.bf16.msra.mxu1 %v4957_v1 }
 0x5cd   :  { %4243 = vmatprep.subr.bf16.mxu1 %v5184_v56 }
 0x5d0   :  { %4244 = vmatpush3.bf16.msra.mxu1 %v4958_v2 }
 0x5d1   :  { %4245 = vmatprep.subr.bf16.mxu1 %v5184_v56 }
 0x5d4   :  { %4246 = vmatpush3.bf16.msra.mxu1 %v4959_v3 }
 0x5d5   :  { %4247 = vmatprep.subr.bf16.mxu1 %v5184_v56 }
 0x5d8   :  { %4248 = vmatpush3.bf16.msra.mxu1 %v4960_v4 }
 0x5d9   :  { %4249 = vmatprep.subr.bf16.mxu1 %v5184_v56 }
 0x5dc   :  { %4250 = vmatpush3.bf16.msra.mxu1 %v4961_v5 }
 0x692   :  { %v3528_v7 = vpop.f32.mrb[16].mxu1 }
 0x693   :  { %v3529_v8 = vadd.f32 %v3528_v7, %v3445_v6  ;;  %v4233_v9 = vpop.f32.mrb[17].mxu1 }
 0x694   :  { %v3531_v10 = vpop.f32.mrb[18].mxu1 }
 0x695   :  { %v3534_v11 = vmax.f32 %v3529_v8, 0.0  ;;  %v4234_v12 = vpop.f32.mrb[19].mxu1 }
 0x697   :  { %v3535_v13 = vpack.c.bf16 %v3534_v11, %v3534_v11 }
 0x699   :  { %4252 = vmatmul.mubr.bf16.vlgmr.msra.gmra.mrb[20].mxu1 %v3535_v13 }
 0x76c   :  { %v3635_v15 = vpop.f32.mrb[20].mxu1 }
 0x76d   :  { %v3636_v16 = vadd.f32 %v3635_v15, %v3552_v14  ;;  %v4253_v17 = vpop.f32.mrb[21].mxu1 }
 0x76e   :  { %v3638_v19 = vpop.f32.mrb[22].mxu1 }
 0x76f   :  { %3641 = vst [vmem:[#allocation16] sm:$0xff] %v3636_v16  ;;  %v4254_v56 = vpop.f32.mrb[23].mxu1 }
 0x770   :  { %5149 = shalt.err (!%p5146_p12)
}
 0x771   :  { %s5150_s2 = scalar_lea.hbm %s5463_s8, 128 }
 0x772   :  { %p5151_p13 = scmp.ne.s32.totalorder %s5463_s8, %s5150_s2  ;;  %p5154_p0 = scmp.lt.u32.totalorder %s5150_s2, %s5463_s8 }
 0x774   :  { %p5156_p1 = pnand %p5154_p0, %p5151_p13 }
 0x776   :  { %5159 = shalt.err (!%p5156_p1)
}
 0x777   :  { %3651 = dma.vmem_to_hbm [thread:$0]  %s3649_s9, 128, %s5463_s8, [#allocation4]  }
 0x778   :  { %5170 = dma.done.wait [#allocation4], 128  }
 0x779   :  { %5171 = vsyncadd [#allocation4], 4294967168 }
 0x77a   :  { %3655 = vsyncpa [#allocation3], 1 }
 0x77b   :  { %3656 = vsyncpa [#allocation6], 1 }
 0x77c   :  { %3657 = vsyncpa [#allocation9], 1 }
 0x77d   :  { %3658 = vsyncpa [#allocation12], 1 }
 0x77e   :  { %3659 = vsyncpa [#allocation15], 1 }
 0x77f   :  { %3660 = vsyncpa [#allocation4], 1 }

// kernel: tpu_custom_call.1
= control target key start
LH: loop header
LB: loop body
LE: loop exit
PB: predicated region body
PF: predicated region fallthrough
CT: control target
= control target key end

     0   :  { %13 = vsyncpa [#allocation3], 0  ;;  %s5455_s0 = inlined_call_operand.hbm [shape: bf16[8,3072], index: 0, kind: input, shape index: {}]   ;;  %s5456_s1 = inlined_call_operand.hbm [shape: bf16[3072,256], index: 1, kind: input, shape index: {}]   ;;  %s5457_s2 = inlined_call_operand.hbm [shape: bf16[256,128], index: 2, kind: input, shape index: {}]   ;;  %s5458_s3 = inlined_call_operand.hbm [shape: bf16[128,128], index: 3, kind: input, shape index: {}]   ;;  %s5459_s4 = inlined_call_operand.hbm [shape: bf16[128,128], index: 4, kind: input, shape index: {}]   ;;  %s5460_s5 = inlined_call_operand.hbm [shape: bf16[128,128], index: 5, kind: input, shape index: {}]   ;;  %s5461_s6 = inlined_call_operand.hbm [shape: bf16[128,128], index: 6, kind: input, shape index: {}]   ;;  %s5462_s7 = inlined_call_operand.hbm [shape: f32[8,256], index: 7, kind: input, shape index: {}]   ;;  %s5463_s8 = inlined_call_operand.hbm [shape: f32[8,128], index: 8, kind: output, shape index: {}]  }
   0x1   :  { %14 = vsyncpa [#allocation6], 0 }
   0x2   :  { %15 = vsyncpa [#allocation9], 0 }
   0x3   :  { %16 = vsyncpa [#allocation12], 0 }
   0x4   :  { %17 = vsyncpa [#allocation15], 0 }
   0x5   :  { %18 = vsyncpa [#allocation4], 0  ;;  %s5172_s27 = smov [#allocation5]   ;;  %s4962_s9 = scalar_lea.hbm %s5456_s1, 49152 }
   0x6   :  { %s34_s28 = sshll.u32 %s5172_s27, 4  ;;  %p4963_p0 = scmp.ne.s32.totalorder %s5456_s1, %s4962_s9  ;;  %s35_s28 = int_to_ptr.vmem [resolvable:$true] %s34_s28 }
   0x7   :  { %p4966_p1 = scmp.lt.u32.totalorder %s4962_s9, %s5456_s1 }
   0x9   :  { %p4968_p2 = pnand %p4966_p1, %p4963_p0 }
   0xb   :  { %4971 = shalt.err (!%p4968_p2)
}
   0xc   :  { %s4972_s14 = scalar_lea.vmem %s35_s28, 49152  ;;  %p4977_p4 = scmp.lt.s32.totalorder %s35_s28, %s35_s28 }
   0xd   :  { %p4973_p3 = scmp.ne.s32.totalorder %s35_s28, %s4972_s14  ;;  %p4978_p5 = scmp.lt.s32.totalorder %s4972_s14, %s4972_s14 }
   0xf   :  { %p4979_p6 = por %p4978_p5, %p4977_p4 }
  0x11   :  { %p4980_p7 = pnand %p4979_p6, %p4973_p3 }
  0x13   :  { %4983 = shalt.err (!%p4980_p7)
}
  0x14   :  { %s5173_s15 = smov 128   ;;  %s5174_s16 = smov 8  }
  0x15   :  { %40 = dma.hbm_to_vmem [thread:$0]  %s5456_s1, 49152, %s35_s28, [#allocation6], %s5173_s15, %s5173_s15, %s5174_s16  }
  0x16   :  { %s5175_s19 = smov [#allocation8]   ;;  %s5176_s21 = smov [#allocation11]  }
  0x17   :  { %s58_s20 = sshll.u32 %s5175_s19, 4  ;;  %s82_s22 = sshll.u32 %s5176_s21, 4  ;;  %s59_s20 = int_to_ptr.vmem [resolvable:$true] %s58_s20  ;;  %s83_s22 = int_to_ptr.vmem [resolvable:$true] %s82_s22 }
  0x18   :  { %s4984_s25 = scalar_lea.hbm %s5458_s3, 1024 }
  0x19   :  { %p4985_p8 = scmp.ne.s32.totalorder %s5458_s3, %s4984_s25  ;;  %p4988_p9 = scmp.lt.u32.totalorder %s4984_s25, %s5458_s3 }
  0x1b   :  { %p4990_p10 = pnand %p4988_p9, %p4985_p8 }
  0x1d   :  { %4993 = shalt.err (!%p4990_p10)
}
  0x1e   :  { %s4994_s1 = scalar_lea.vmem %s59_s20, 1024  ;;  %p4999_p12 = scmp.lt.s32.totalorder %s59_s20, %s59_s20 }
  0x1f   :  { %p4995_p11 = scmp.ne.s32.totalorder %s59_s20, %s4994_s1  ;;  %p5000_p13 = scmp.lt.s32.totalorder %s4994_s1, %s4994_s1 }
  0x21   :  { %p5001_p0 = por %p5000_p13, %p4999_p12 }
  0x23   :  { %p5002_p1 = pnand %p5001_p0, %p4995_p11 }
  0x25   :  { %5005 = shalt.err (!%p5002_p1)
}
  0x26   :  { %s5177_s28 = smov 64   ;;  %s5178_s9 = smov 4  }
  0x27   :  { %64 = dma.hbm_to_vmem [thread:$0]  %s5458_s3, 1024, %s59_s20, [#allocation9], %s5177_s28, %s5177_s28, %s5178_s9  }
  0x28   :  { %s5006_s14 = scalar_lea.hbm %s5460_s5, 1024 }
  0x29   :  { %p5007_p2 = scmp.ne.s32.totalorder %s5460_s5, %s5006_s14  ;;  %p5010_p3 = scmp.lt.u32.totalorder %s5006_s14, %s5460_s5 }
  0x2b   :  { %p5012_p4 = pnand %p5010_p3, %p5007_p2 }
  0x2d   :  { %5015 = shalt.err (!%p5012_p4)
}
  0x2e   :  { %s5016_s19 = scalar_lea.vmem %s83_s22, 1024  ;;  %p5021_p6 = scmp.lt.s32.totalorder %s83_s22, %s83_s22 }
  0x2f   :  { %p5017_p5 = scmp.ne.s32.totalorder %s83_s22, %s5016_s19  ;;  %p5022_p7 = scmp.lt.s32.totalorder %s5016_s19, %s5016_s19 }
  0x31   :  { %p5023_p8 = por %p5022_p7, %p5021_p6 }
  0x33   :  { %p5024_p9 = pnand %p5023_p8, %p5017_p5 }
  0x35   :  { %5027 = shalt.err (!%p5024_p9)
}
  0x36   :  { %88 = dma.hbm_to_vmem [thread:$0]  %s5460_s5, 1024, %s83_s22, [#allocation12], %s5177_s28, %s5177_s28, %s5178_s9  }
  0x37   :  { %s5179_s21 = smov [#allocation2]   ;;  %s5180_s24 = smov [#allocation7]  }
  0x38   :  { %s25_s23 = sshll.u32 %s5179_s21, 4  ;;  %s46_s25 = sshll.u32 %s5180_s24, 4  ;;  %s26_s23 = int_to_ptr.vmem [resolvable:$true] %s25_s23  ;;  %s47_s25 = int_to_ptr.vmem [resolvable:$true] %s46_s25 }
  0x39   :  { %s5028_s29 = scalar_lea.hbm %s5455_s0, 1536 }
  0x3a   :  { %p5029_p10 = scmp.ne.s32.totalorder %s5455_s0, %s5028_s29  ;;  %p5032_p11 = scmp.lt.u32.totalorder %s5028_s29, %s5455_s0 }
  0x3c   :  { %p5034_p12 = pnand %p5032_p11, %p5029_p10 }
  0x3e   :  { %5037 = shalt.err (!%p5034_p12)
}
  0x3f   :  { %s5038_s5 = scalar_lea.vmem %s26_s23, 1536  ;;  %p5043_p0 = scmp.lt.s32.totalorder %s26_s23, %s26_s23 }
  0x40   :  { %p5039_p13 = scmp.ne.s32.totalorder %s26_s23, %s5038_s5  ;;  %p5044_p1 = scmp.lt.s32.totalorder %s5038_s5, %s5038_s5 }
  0x42   :  { %p5045_p2 = por %p5044_p1, %p5043_p0 }
  0x44   :  { %p5046_p3 = pnand %p5045_p2, %p5039_p13 }
  0x46   :  { %5049 = shalt.err (!%p5046_p3)
}
  0x47   :  { %28 = dma.hbm_to_vmem [thread:$0]  %s5455_s0, 1536, %s26_s23, [#allocation3]  }
  0x48   :  { %s5050_s15 = scalar_lea.hbm %s5457_s2, 2048 }
  0x49   :  { %p5051_p4 = scmp.ne.s32.totalorder %s5457_s2, %s5050_s15  ;;  %p5054_p5 = scmp.lt.u32.totalorder %s5050_s15, %s5457_s2 }
  0x4b   :  { %p5056_p6 = pnand %p5054_p5, %p5051_p4 }
  0x4d   :  { %5059 = shalt.err (!%p5056_p6)
}
  0x4e   :  { %s5060_s3 = scalar_lea.vmem %s47_s25, 2048  ;;  %p5065_p8 = scmp.lt.s32.totalorder %s47_s25, %s47_s25 }
  0x4f   :  { %p5061_p7 = scmp.ne.s32.totalorder %s47_s25, %s5060_s3  ;;  %p5066_p9 = scmp.lt.s32.totalorder %s5060_s3, %s5060_s3 }
  0x51   :  { %p5067_p10 = por %p5066_p9, %p5065_p8 }
  0x53   :  { %p5068_p11 = pnand %p5067_p10, %p5061_p7 }
  0x55   :  { %5071 = shalt.err (!%p5068_p11)
}
  0x56   :  { %52 = dma.hbm_to_vmem [thread:$0]  %s5457_s2, 2048, %s47_s25, [#allocation6], %s5177_s28, %s5177_s28, %s5178_s9  }
  0x57   :  { %s5181_s21 = smov [#allocation10]   ;;  %s5182_s24 = smov [#allocation13]  }
  0x58   :  { %s70_s23 = sshll.u32 %s5181_s21, 4  ;;  %s94_s26 = sshll.u32 %s5182_s24, 4  ;;  %s71_s23 = int_to_ptr.vmem [resolvable:$true] %s70_s23  ;;  %s95_s26 = int_to_ptr.vmem [resolvable:$true] %s94_s26 }
  0x59   :  { %s5072_s30 = scalar_lea.hbm %s5459_s4, 1024 }
  0x5a   :  { %p5073_p12 = scmp.ne.s32.totalorder %s5459_s4, %s5072_s30  ;;  %p5076_p13 = scmp.lt.u32.totalorder %s5072_s30, %s5459_s4 }
  0x5c   :  { %p5078_p0 = pnand %p5076_p13, %p5073_p12 }
  0x5e   :  { %5081 = shalt.err (!%p5078_p0)
}
  0x5f   :  { %s5082_s2 = scalar_lea.vmem %s71_s23, 1024  ;;  %p5087_p2 = scmp.lt.s32.totalorder %s71_s23, %s71_s23 }
  0x60   :  { %p5083_p1 = scmp.ne.s32.totalorder %s71_s23, %s5082_s2  ;;  %p5088_p3 = scmp.lt.s32.totalorder %s5082_s2, %s5082_s2 }
  0x62   :  { %p5089_p4 = por %p5088_p3, %p5087_p2 }
  0x64   :  { %p5090_p5 = pnand %p5089_p4, %p5083_p1 }
  0x66   :  { %5093 = shalt.err (!%p5090_p5)
}
  0x67   :  { %76 = dma.hbm_to_vmem [thread:$0]  %s5459_s4, 1024, %s71_s23, [#allocation9], %s5177_s28, %s5177_s28, %s5178_s9  }
  0x68   :  { %s5094_s14 = scalar_lea.hbm %s5461_s6, 1024 }
  0x69   :  { %p5095_p6 = scmp.ne.s32.totalorder %s5461_s6, %s5094_s14  ;;  %p5098_p7 = scmp.lt.u32.totalorder %s5094_s14, %s5461_s6 }
  0x6b   :  { %p5100_p8 = pnand %p5098_p7, %p5095_p6 }
  0x6d   :  { %5103 = shalt.err (!%p5100_p8)
}
  0x6e   :  { %s5104_s19 = scalar_lea.vmem %s95_s26, 1024  ;;  %p5109_p10 = scmp.lt.s32.totalorder %s95_s26, %s95_s26 }
  0x6f   :  { %p5105_p9 = scmp.ne.s32.totalorder %s95_s26, %s5104_s19  ;;  %p5110_p11 = scmp.lt.s32.totalorder %s5104_s19, %s5104_s19 }
  0x71   :  { %p5111_p12 = por %p5110_p11, %p5109_p10 }
  0x73   :  { %p5112_p13 = pnand %p5111_p12, %p5105_p9 }
  0x75   :  { %5115 = shalt.err (!%p5112_p13)
}
  0x76   :  { %100 = dma.hbm_to_vmem [thread:$0]  %s5461_s6, 1024, %s95_s26, [#allocation12], %s5177_s28, %s5177_s28, %s5178_s9  }
  0x77   :  { %s5183_s0 = smov [#allocation14]   ;;  %s5116_s24 = scalar_lea.hbm %s5462_s7, 256 }
  0x78   :  { %s107_s20 = sshll.u32 %s5183_s0, 4  ;;  %p5117_p0 = scmp.ne.s32.totalorder %s5462_s7, %s5116_s24  ;;  %s108_s20 = int_to_ptr.vmem [resolvable:$true] %s107_s20 }
  0x79   :  { %p5120_p1 = scmp.lt.u32.totalorder %s5116_s24, %s5462_s7 }
  0x7b   :  { %p5122_p2 = pnand %p5120_p1, %p5117_p0 }
  0x7d   :  { %5125 = shalt.err (!%p5122_p2)
}
  0x7e   :  { %s5126_s10 = scalar_lea.vmem %s108_s20, 256  ;;  %p5131_p4 = scmp.lt.s32.totalorder %s108_s20, %s108_s20 }
  0x7f   :  { %p5127_p3 = scmp.ne.s32.totalorder %s108_s20, %s5126_s10  ;;  %p5132_p5 = scmp.lt.s32.totalorder %s5126_s10, %s5126_s10 }
  0x81   :  { %p5133_p6 = por %p5132_p5, %p5131_p4 }
  0x83   :  { %p5134_p7 = pnand %p5133_p6, %p5127_p3 }
  0x85   :  { %5137 = shalt.err (!%p5134_p7)
}
  0x86   :  { %110 = dma.hbm_to_vmem [thread:$0]  %s5462_s7, 256, %s108_s20, [#allocation15]  }
  0x87   :  { %5160 = dma.done.wait [#allocation3], 1536  }
  0x88   :  { %5161 = vsyncadd [#allocation3], 4294965760 }
  0x89   :  { %5162 = dma.done.wait [#allocation6], 51200  }
  0x8a   :  { %5163 = vsyncadd [#allocation6], 4294916096 }
  0x8b   :  { %5164 = dma.done.wait [#allocation9], 2048  }
  0x8c   :  { %5165 = vsyncadd [#allocation9], 4294965248 }
  0x8d   :  { %5166 = dma.done.wait [#allocation12], 2048  }
  0x8e   :  { %5167 = vsyncadd [#allocation12], 4294965248 }
  0x8f   :  { %5168 = dma.done.wait [#allocation15], 256  }
  0x90   :  { %5169 = vsyncadd [#allocation15], 4294967040  ;;  %v4314_v0 = vld [vmem:[#allocation5 + $0x4] ss:$8 sps:$4 sm:$0xff]   ;;  %v4318_v2 = vld [vmem:[#allocation5] ss:$8 sps:$4 sm:$0xff]  }
  0x91   :  { %v4316_v1 = vld [vmem:[#allocation5 + $0x504] ss:$8 sps:$4 sm:$0xff]   ;;  %2548 = vmatprep.subr.bf16.mxu1 %v4314_v0  ;;  %v4319_v3 = vld [vmem:[#allocation5 + $0x500] ss:$8 sps:$4 sm:$0xff]   ;;  %v4320_v4 = vld [vmem:[#allocation5 + $0x14] ss:$8 sps:$4 sm:$0xff]  }
  0x92   :  { %2753 = vmatprep.subr.bf16.mxu0 %v4316_v1  ;;  %2549 = vmatpush1.bf16.msra.mxu1 %v4318_v2  ;;  %v4322_v5 = vld [vmem:[#allocation5 + $0x514] ss:$8 sps:$4 sm:$0xff]   ;;  %v4324_v6 = vld [vmem:[#allocation5 + $0x10] ss:$8 sps:$4 sm:$0xff]   ;;  %v4326_v8 = vld [vmem:[#allocation5 + $0x24] ss:$8 sps:$4 sm:$0xff]  }
  0x93   :  { %2754 = vmatpush1.bf16.msra.mxu0 %v4319_v3  ;;  %2550 = vmatprep.subr.bf16.mxu1 %v4320_v4  ;;  %v4325_v7 = vld [vmem:[#allocation5 + $0x510] ss:$8 sps:$4 sm:$0xff]   ;;  %v4328_v9 = vld [vmem:[#allocation5 + $0x524] ss:$8 sps:$4 sm:$0xff]   ;;  %v4330_v10 = vld [vmem:[#allocation5 + $0x20] ss:$8 sps:$4 sm:$0xff]  }
  0x94   :  { %2755 = vmatprep.subr.bf16.mxu0 %v4322_v5  ;;  %v4331_v11 = vld [vmem:[#allocation5 + $0x520] ss:$8 sps:$4 sm:$0xff]   ;;  %v4332_v12 = vld [vmem:[#allocation5 + $0x34] ss:$8 sps:$4 sm:$0xff]   ;;  %v4336_v14 = vld [vmem:[#allocation5 + $0x30] ss:$8 sps:$4 sm:$0xff]  }
  0x95   :  { %v4334_v13 = vld [vmem:[#allocation5 + $0x534] ss:$8 sps:$4 sm:$0xff]   ;;  %v4337_v15 = vld [vmem:[#allocation5 + $0x530] ss:$8 sps:$4 sm:$0xff]   ;;  %v4338_v16 = vld [vmem:[#allocation5 + $0x44] ss:$8 sps:$4 sm:$0xff]  }
  0x96   :  { %2551 = vmatpush1.bf16.msra.mxu1 %v4324_v6  ;;  %v4340_v17 = vld [vmem:[#allocation5 + $0x544] ss:$8 sps:$4 sm:$0xff]   ;;  %v4342_v18 = vld [vmem:[#allocation5 + $0x40] ss:$8 sps:$4 sm:$0xff]   ;;  %v4344_v20 = vld [vmem:[#allocation5 + $0x54] ss:$8 sps:$4 sm:$0xff]  }
  0x97   :  { %2756 = vmatpush1.bf16.msra.mxu0 %v4325_v7  ;;  %2552 = vmatprep.subr.bf16.mxu1 %v4326_v8  ;;  %v4343_v19 = vld [vmem:[#allocation5 + $0x540] ss:$8 sps:$4 sm:$0xff]   ;;  %v4346_v21 = vld [vmem:[#allocation5 + $0x554] ss:$8 sps:$4 sm:$0xff]   ;;  %v4348_v22 = vld [vmem:[#allocation5 + $0x50] ss:$8 sps:$4 sm:$0xff]  }
  0x98   :  { %2757 = vmatprep.subr.bf16.mxu0 %v4328_v9  ;;  %v4349_v23 = vld [vmem:[#allocation5 + $0x550] ss:$8 sps:$4 sm:$0xff]   ;;  %v4350_v24 = vld [vmem:[#allocation5 + $0x64] ss:$8 sps:$4 sm:$0xff]   ;;  %v4354_v26 = vld [vmem:[#allocation5 + $0x60] ss:$8 sps:$4 sm:$0xff]  }
  0x99   :  { %v4352_v25 = vld [vmem:[#allocation5 + $0x564] ss:$8 sps:$4 sm:$0xff]   ;;  %v4355_v27 = vld [vmem:[#allocation5 + $0x560] ss:$8 sps:$4 sm:$0xff]   ;;  %v4356_v28 = vld [vmem:[#allocation5 + $0x74] ss:$8 sps:$4 sm:$0xff]  }
  0x9a   :  { %2553 = vmatpush1.bf16.msra.mxu1 %v4330_v10  ;;  %v4358_v29 = vld [vmem:[#allocation5 + $0x574] ss:$8 sps:$4 sm:$0xff]   ;;  %v4360_v30 = vld [vmem:[#allocation5 + $0x70] ss:$8 sps:$4 sm:$0xff]   ;;  %v4362_v32 = vld [vmem:[#allocation5 + $0x84] ss:$8 sps:$4 sm:$0xff]  }
  0x9b   :  { %2758 = vmatpush1.bf16.msra.mxu0 %v4331_v11  ;;  %2554 = vmatprep.subr.bf16.mxu1 %v4332_v12  ;;  %v4361_v31 = vld [vmem:[#allocation5 + $0x570] ss:$8 sps:$4 sm:$0xff]   ;;  %v4364_v33 = vld [vmem:[#allocation5 + $0x584] ss:$8 sps:$4 sm:$0xff]   ;;  %v4366_v34 = vld [vmem:[#allocation5 + $0x80] ss:$8 sps:$4 sm:$0xff]  }
  0x9c   :  { %2759 = vmatprep.subr.bf16.mxu0 %v4334_v13  ;;  %v4367_v35 = vld [vmem:[#allocation5 + $0x580] ss:$8 sps:$4 sm:$0xff]   ;;  %v4368_v36 = vld [vmem:[#allocation5 + $0x94] ss:$8 sps:$4 sm:$0xff]   ;;  %v4372_v38 = vld [vmem:[#allocation5 + $0x90] ss:$8 sps:$4 sm:$0xff]  }
  0x9d   :  { %v4370_v37 = vld [vmem:[#allocation5 + $0x594] ss:$8 sps:$4 sm:$0xff]   ;;  %v4373_v39 = vld [vmem:[#allocation5 + $0x590] ss:$8 sps:$4 sm:$0xff]   ;;  %v4374_v40 = vld [vmem:[#allocation5 + $0xa4] ss:$8 sps:$4 sm:$0xff]  }
  0x9e   :  { %2555 = vmatpush1.bf16.msra.mxu1 %v4336_v14  ;;  %v4376_v41 = vld [vmem:[#allocation5 + $0x5a4] ss:$8 sps:$4 sm:$0xff]   ;;  %v4378_v42 = vld [vmem:[#allocation5 + $0xa0] ss:$8 sps:$4 sm:$0xff]   ;;  %v4380_v44 = vld [vmem:[#allocation5 + $0xb4] ss:$8 sps:$4 sm:$0xff]  }
  0x9f   :  { %2760 = vmatpush1.bf16.msra.mxu0 %v4337_v15  ;;  %2556 = vmatprep.subr.bf16.mxu1 %v4338_v16  ;;  %v4379_v43 = vld [vmem:[#allocation5 + $0x5a0] ss:$8 sps:$4 sm:$0xff]   ;;  %v4382_v45 = vld [vmem:[#allocation5 + $0x5b4] ss:$8 sps:$4 sm:$0xff]   ;;  %v4384_v47 = vld [vmem:[#allocation5 + $0xb0] ss:$8 sps:$4 sm:$0xff]  }
  0xa0   :  { %2761 = vmatprep.subr.bf16.mxu0 %v4340_v17  ;;  %v136_v46 = vld [vmem:[#allocation2] sm:$0xff]  ;;  %v4385_v49 = vld [vmem:[#allocation5 + $0x5b0] ss:$8 sps:$4 sm:$0xff]   ;;  %v141_v50 = vld [vmem:[#allocation2 + $0x28] sm:$0xff]  ;;  %vm5185_vm0 = vmmov 0   ;;  %s5186_s7 = smov [#allocation16]  }
  0xa1   :  { %v3662_v48 = vcombine.high %v136_v46, %v136_v46  ;;  %v4386_v51 = vld [vmem:[#allocation5 + $0xc4] ss:$8 sps:$4 sm:$0xff]   ;;  %v3672_v53 = vcombine.high %v141_v50, %v141_v50  ;;  %v4390_v54 = vld [vmem:[#allocation5 + $0xc0] ss:$8 sps:$4 sm:$0xff]   ;;  %v4392_v56 = vld [vmem:[#allocation5 + $0xd4] ss:$8 sps:$4 sm:$0xff]   ;;  %v3661_v6 = vcombine.low %v136_v46, %v136_v46  ;;  %v3671_v7 = vcombine.low %v141_v50, %v141_v50 }
  0xa2   :  { %2557 = vmatpush1.bf16.msra.mxu1 %v4342_v18  ;;  %v4388_v52 = vld [vmem:[#allocation5 + $0x5c4] ss:$8 sps:$4 sm:$0xff]   ;;  %v4391_v55 = vld [vmem:[#allocation5 + $0x5c0] ss:$8 sps:$4 sm:$0xff]   ;;  %v4394_v57 = vld [vmem:[#allocation5 + $0x5d4] ss:$8 sps:$4 sm:$0xff]  }
  0xa3   :  { %2762 = vmatpush1.bf16.msra.mxu0 %v4343_v19  ;;  %2558 = vmatprep.subr.bf16.mxu1 %v4344_v20  ;;  %v4396_v58 = vld [vmem:[#allocation5 + $0xd0] ss:$8 sps:$4 sm:$0xff]   ;;  %v4398_v60 = vld [vmem:[#allocation5 + $0xe4] ss:$8 sps:$4 sm:$0xff]   ;;  %v4402_v62 = vld [vmem:[#allocation5 + $0xe0] ss:$8 sps:$4 sm:$0xff]  }
  0xa4   :  { %2763 = vmatprep.subr.bf16.mxu0 %v4346_v21  ;;  %2580 = vmatprep.mubr.bf16.mxu1 %v3662_v48  ;;  %v4397_v59 = vld [vmem:[#allocation5 + $0x5d0] ss:$8 sps:$4 sm:$0xff]   ;;  %v4400_v61 = vld [vmem:[#allocation5 + $0x5e4] ss:$8 sps:$4 sm:$0xff]   ;;  %v4403_v63 = vld [vmem:[#allocation5 + $0x5e0] ss:$8 sps:$4 sm:$0xff]  }
  0xa5   :  { %2785 = vmatprep.mubr.bf16.mxu0 %v3672_v53  ;;  %v4404_v0 = vld [vmem:[#allocation5 + $0xf4] ss:$8 sps:$4 sm:$0xff]   ;;  %v4408_v2 = vld [vmem:[#allocation5 + $0xf0] ss:$8 sps:$4 sm:$0xff]   ;;  %v4414_v4 = vld [vmem:[#allocation5 + $0x104] ss:$8 sps:$4 sm:$0xff]  }
  0xa6   :  { %2559 = vmatpush1.bf16.msra.mxu1 %v4348_v22  ;;  %v4406_v1 = vld [vmem:[#allocation5 + $0x5f4] ss:$8 sps:$4 sm:$0xff]   ;;  %v4409_v3 = vld [vmem:[#allocation5 + $0x5f0] ss:$8 sps:$4 sm:$0xff]   ;;  %v4419_v5 = vld [vmem:[#allocation5 + $0x604] ss:$8 sps:$4 sm:$0xff]  }
  0xa7   :  { %2764 = vmatpush1.bf16.msra.mxu0 %v4349_v23  ;;  %2560 = vmatprep.subr.bf16.mxu1 %v4350_v24  ;;  %v4412_v8 = vld [vmem:[#allocation5 + $0x100] ss:$8 sps:$4 sm:$0xff]   ;;  %v4422_v10 = vld [vmem:[#allocation5 + $0x114] ss:$8 sps:$4 sm:$0xff]   ;;  %v4420_v12 = vld [vmem:[#allocation5 + $0x110] ss:$8 sps:$4 sm:$0xff]  }
  0xa8   :  { %2765 = vmatprep.subr.bf16.mxu0 %v4352_v25  ;;  %v4417_v9 = vld [vmem:[#allocation5 + $0x600] ss:$8 sps:$4 sm:$0xff]   ;;  %v4425_v11 = vld [vmem:[#allocation5 + $0x614] ss:$8 sps:$4 sm:$0xff]   ;;  %v4423_v13 = vld [vmem:[#allocation5 + $0x610] ss:$8 sps:$4 sm:$0xff]  }
  0xa9   :  { %v4428_v14 = vld [vmem:[#allocation5 + $0x124] ss:$8 sps:$4 sm:$0xff]   ;;  %v4426_v16 = vld [vmem:[#allocation5 + $0x120] ss:$8 sps:$4 sm:$0xff]   ;;  %v4434_v18 = vld [vmem:[#allocation5 + $0x134] ss:$8 sps:$4 sm:$0xff]  }
  0xaa   :  { %2561 = vmatpush1.bf16.msra.mxu1 %v4354_v26  ;;  %v4431_v15 = vld [vmem:[#allocation5 + $0x624] ss:$8 sps:$4 sm:$0xff]   ;;  %v4429_v17 = vld [vmem:[#allocation5 + $0x620] ss:$8 sps:$4 sm:$0xff]   ;;  %v4437_v19 = vld [vmem:[#allocation5 + $0x634] ss:$8 sps:$4 sm:$0xff]  }
  0xab   :  { %2766 = vmatpush1.bf16.msra.mxu0 %v4355_v27  ;;  %2562 = vmatprep.subr.bf16.mxu1 %v4356_v28  ;;  %v4432_v20 = vld [vmem:[#allocation5 + $0x130] ss:$8 sps:$4 sm:$0xff]   ;;  %v4440_v22 = vld [vmem:[#allocation5 + $0x144] ss:$8 sps:$4 sm:$0xff]   ;;  %v4438_v24 = vld [vmem:[#allocation5 + $0x140] ss:$8 sps:$4 sm:$0xff]  }
  0xac   :  { %2767 = vmatprep.subr.bf16.mxu0 %v4358_v29  ;;  %v4435_v21 = vld [vmem:[#allocation5 + $0x630] ss:$8 sps:$4 sm:$0xff]   ;;  %v4443_v23 = vld [vmem:[#allocation5 + $0x644] ss:$8 sps:$4 sm:$0xff]   ;;  %v4441_v25 = vld [vmem:[#allocation5 + $0x640] ss:$8 sps:$4 sm:$0xff]  }
  0xad   :  { %v4446_v26 = vld [vmem:[#allocation5 + $0x154] ss:$8 sps:$4 sm:$0xff]   ;;  %v4444_v28 = vld [vmem:[#allocation5 + $0x150] ss:$8 sps:$4 sm:$0xff]   ;;  %v4476_v50 = vld [vmem:[#allocation5 + $0x1a4] ss:$8 sps:$4 sm:$0xff]  }
  0xae   :  { %2563 = vmatpush1.bf16.msra.mxu1 %v4360_v30  ;;  %v4449_v27 = vld [vmem:[#allocation5 + $0x654] ss:$8 sps:$4 sm:$0xff]   ;;  %v4447_v29 = vld [vmem:[#allocation5 + $0x650] ss:$8 sps:$4 sm:$0xff]   ;;  %v4452_v30 = vld [vmem:[#allocation5 + $0x164] ss:$8 sps:$4 sm:$0xff]  }
  0xaf   :  { %2768 = vmatpush1.bf16.msra.mxu0 %v4361_v31  ;;  %2564 = vmatprep.subr.bf16.mxu1 %v4362_v32  ;;  %v4455_v31 = vld [vmem:[#allocation5 + $0x664] ss:$8 sps:$4 sm:$0xff]   ;;  %v4470_v46 = vld [vmem:[#allocation5 + $0x194] ss:$8 sps:$4 sm:$0xff]   ;;  %v4468_v48 = vld [vmem:[#allocation5 + $0x190] ss:$8 sps:$4 sm:$0xff]  }
  0xb0   :  { %2769 = vmatprep.subr.bf16.mxu0 %v4364_v33  ;;  %v5343_v32 = vld [vmem:[#allocation2 + $0x8] sm:$0xff]  ;;  %s3648_s9 = sshll.u32 %s5186_s7, 4  ;;  %s3649_s9 = int_to_ptr.vmem [resolvable:$true] %s3648_s9 }
  0xb1   :  { %v4450_v33 = vld [vmem:[#allocation5 + $0x160] ss:$8 sps:$4 sm:$0xff]   ;;  %s5138_s26 = scalar_lea.vmem %s3649_s9, 128  ;;  %p5143_p9 = scmp.lt.s32.totalorder %s3649_s9, %s3649_s9 }
  0xb2   :  { %2565 = vmatpush1.bf16.msra.mxu1 %v4366_v34  ;;  %v4453_v34 = vld [vmem:[#allocation5 + $0x660] ss:$8 sps:$4 sm:$0xff]   ;;  %p5139_p8 = scmp.ne.s32.totalorder %s3649_s9, %s5138_s26  ;;  %p5144_p10 = scmp.lt.s32.totalorder %s5138_s26, %s5138_s26 }
  0xb3   :  { %2770 = vmatpush1.bf16.msra.mxu0 %v4367_v35  ;;  %2566 = vmatprep.subr.bf16.mxu1 %v4368_v36  ;;  %v3664_v35 = vcombine.high %v5343_v32, %v5343_v32  ;;  %v5347_v36 = vld [vmem:[#allocation2 + $0x30] sm:$0xff]  ;;  %v4477_v53 = vld [vmem:[#allocation5 + $0x6a0] ss:$8 sps:$4 sm:$0xff]  }
  0xb4   :  { %2771 = vmatprep.subr.bf16.mxu0 %v4370_v37  ;;  %v4458_v37 = vld [vmem:[#allocation5 + $0x174] ss:$8 sps:$4 sm:$0xff]   ;;  %p5145_p11 = por %p5144_p10, %p5143_p9 }
  0xb6   :  { %2567 = vmatpush1.bf16.msra.mxu1 %v4372_v38  ;;  %v3674_v38 = vcombine.high %v5347_v36, %v5347_v36  ;;  %p5146_p12 = pnand %p5145_p11, %p5139_p8 }
  0xb7   :  { %2772 = vmatpush1.bf16.msra.mxu0 %v4373_v39  ;;  %2568 = vmatprep.subr.bf16.mxu1 %v4374_v40  ;;  %v4461_v39 = vld [vmem:[#allocation5 + $0x674] ss:$8 sps:$4 sm:$0xff]   ;;  %v4456_v40 = vld [vmem:[#allocation5 + $0x170] ss:$8 sps:$4 sm:$0xff]  }
  0xb8   :  { %2773 = vmatprep.subr.bf16.mxu0 %v4376_v41  ;;  %v4459_v41 = vld [vmem:[#allocation5 + $0x670] ss:$8 sps:$4 sm:$0xff]  }
  0xba   :  { %2569 = vmatpush1.bf16.msra.mxu1 %v4378_v42  ;;  %v4464_v42 = vld [vmem:[#allocation5 + $0x184] ss:$8 sps:$4 sm:$0xff]  }
  0xbb   :  { %2774 = vmatpush1.bf16.msra.mxu0 %v4379_v43  ;;  %2570 = vmatprep.subr.bf16.mxu1 %v4380_v44  ;;  %v4467_v43 = vld [vmem:[#allocation5 + $0x684] ss:$8 sps:$4 sm:$0xff]   ;;  %v4462_v44 = vld [vmem:[#allocation5 + $0x180] ss:$8 sps:$4 sm:$0xff]  }
  0xbc   :  { %2775 = vmatprep.subr.bf16.mxu0 %v4382_v45  ;;  %v4465_v45 = vld [vmem:[#allocation5 + $0x680] ss:$8 sps:$4 sm:$0xff]  }
  0xbe   :  { %2571 = vmatpush1.bf16.msra.mxu1 %v4384_v47  ;;  %v4473_v47 = vld [vmem:[#allocation5 + $0x694] ss:$8 sps:$4 sm:$0xff]  }
  0xbf   :  { %2776 = vmatpush1.bf16.msra.mxu0 %v4385_v49  ;;  %2572 = vmatprep.subr.bf16.mxu1 %v4386_v51  ;;  %v4471_v49 = vld [vmem:[#allocation5 + $0x690] ss:$8 sps:$4 sm:$0xff]   ;;  %v4479_v51 = vld [vmem:[#allocation5 + $0x6a4] ss:$8 sps:$4 sm:$0xff]  }
  0xc0   :  { %2777 = vmatprep.subr.bf16.mxu0 %v4388_v52  ;;  %v4474_v52 = vld [vmem:[#allocation5 + $0x1a0] ss:$8 sps:$4 sm:$0xff]  }
  0xc2   :  { %2573 = vmatpush1.bf16.msra.mxu1 %v4390_v54  ;;  %v4482_v54 = vld [vmem:[#allocation5 + $0x1b4] ss:$8 sps:$4 sm:$0xff]  }
  0xc3   :  { %2778 = vmatpush1.bf16.msra.mxu0 %v4391_v55  ;;  %2574 = vmatprep.subr.bf16.mxu1 %v4392_v56  ;;  %v4485_v55 = vld [vmem:[#allocation5 + $0x6b4] ss:$8 sps:$4 sm:$0xff]   ;;  %v4480_v56 = vld [vmem:[#allocation5 + $0x1b0] ss:$8 sps:$4 sm:$0xff]  }
  0xc4   :  { %2779 = vmatprep.subr.bf16.mxu0 %v4394_v57  ;;  %v4483_v57 = vld [vmem:[#allocation5 + $0x6b0] ss:$8 sps:$4 sm:$0xff]  }
  0xc6   :  { %2575 = vmatpush1.bf16.msra.mxu1 %v4396_v58  ;;  %v4488_v58 = vld [vmem:[#allocation5 + $0x1c4] ss:$8 sps:$4 sm:$0xff]  }
  0xc7   :  { %2780 = vmatpush1.bf16.msra.mxu0 %v4397_v59  ;;  %2576 = vmatprep.subr.bf16.mxu1 %v4398_v60  ;;  %v4491_v59 = vld [vmem:[#allocation5 + $0x6c4] ss:$8 sps:$4 sm:$0xff]   ;;  %v4486_v60 = vld [vmem:[#allocation5 + $0x1c0] ss:$8 sps:$4 sm:$0xff]  }
  0xc8   :  { %2781 = vmatprep.subr.bf16.mxu0 %v4400_v61  ;;  %v4489_v61 = vld [vmem:[#allocation5 + $0x6c0] ss:$8 sps:$4 sm:$0xff]  }
  0xca   :  { %2577 = vmatpush1.bf16.msra.mxu1 %v4402_v62  ;;  %v4494_v62 = vld [vmem:[#allocation5 + $0x1d4] ss:$8 sps:$4 sm:$0xff]  }
  0xcb   :  { %2782 = vmatpush1.bf16.msra.mxu0 %v4403_v63  ;;  %2578 = vmatprep.subr.bf16.mxu1 %v4404_v0  ;;  %v4497_v63 = vld [vmem:[#allocation5 + $0x6d4] ss:$8 sps:$4 sm:$0xff]   ;;  %v4492_v0 = vld [vmem:[#allocation5 + $0x1d0] ss:$8 sps:$4 sm:$0xff]  }
  0xcc   :  { %2783 = vmatprep.subr.bf16.mxu0 %v4406_v1  ;;  %v4495_v1 = vld [vmem:[#allocation5 + $0x6d0] ss:$8 sps:$4 sm:$0xff]  }
  0xce   :  { %2579 = vmatpush1.bf16.msra.mxu1 %v4408_v2  ;;  %v4500_v2 = vld [vmem:[#allocation5 + $0x1e4] ss:$8 sps:$4 sm:$0xff]  }
  0xcf   :  { %2784 = vmatpush1.bf16.msra.mxu0 %v4409_v3  ;;  %2589 = vmatprep.subr.bf16.mxu1 %v4414_v4  ;;  %v4503_v3 = vld [vmem:[#allocation5 + $0x6e4] ss:$8 sps:$4 sm:$0xff]   ;;  %v4498_v4 = vld [vmem:[#allocation5 + $0x1e0] ss:$8 sps:$4 sm:$0xff]  }
  0xd0   :  { %2794 = vmatprep.subr.bf16.mxu0 %v4419_v5  ;;  %v4501_v5 = vld [vmem:[#allocation5 + $0x6e0] ss:$8 sps:$4 sm:$0xff]  }
  0xd1   :  { %2581 = vmatmul.mubr.bf16.vlgmr.msra.gmra.mrb[0].mxu1 %v3661_v6  ;;  %v4506_v6 = vld [vmem:[#allocation5 + $0x1f4] ss:$8 sps:$4 sm:$0xff]  }
  0xd2   :  { %2786 = vmatmul.mubr.bf16.vlgmr.msra.gmra.mrb[0].mxu0 %v3671_v7  ;;  %2590 = vmatpush1.bf16.msra.mxu1 %v4412_v8  ;;  %v4509_v7 = vld [vmem:[#allocation5 + $0x6f4] ss:$8 sps:$4 sm:$0xff]   ;;  %v4504_v8 = vld [vmem:[#allocation5 + $0x1f0] ss:$8 sps:$4 sm:$0xff]  }
  0xd3   :  { %2795 = vmatpush1.bf16.msra.mxu0 %v4417_v9  ;;  %2591 = vmatprep.subr.bf16.mxu1 %v4422_v10  ;;  %v4507_v9 = vld [vmem:[#allocation5 + $0x6f0] ss:$8 sps:$4 sm:$0xff]   ;;  %v4514_v10 = vld [vmem:[#allocation5 + $0x204] ss:$8 sps:$4 sm:$0xff]  }
  0xd4   :  { %2796 = vmatprep.subr.bf16.mxu0 %v4425_v11  ;;  %2621 = vmatprep.mubr.bf16.mxu1 %v3664_v35  ;;  %v4519_v11 = vld [vmem:[#allocation5 + $0x704] ss:$8 sps:$4 sm:$0xff]   ;;  %v4541_v35 = vld [vmem:[#allocation5 + $0x740] ss:$8 sps:$4 sm:$0xff]  }
  0xd5   :  { %2826 = vmatprep.mubr.bf16.mxu0 %v3674_v38  ;;  %v4544_v38 = vld [vmem:[#allocation5 + $0x250] ss:$8 sps:$4 sm:$0xff]  }
  0xd6   :  { %2592 = vmatpush1.bf16.msra.mxu1 %v4420_v12  ;;  %v3663_v12 = vcombine.low %v5343_v32, %v5343_v32  ;;  %v4540_v32 = vld [vmem:[#allocation5 + $0x244] ss:$8 sps:$4 sm:$0xff]  }
  0xd7   :  { %2797 = vmatpush1.bf16.msra.mxu0 %v4423_v13  ;;  %2593 = vmatprep.subr.bf16.mxu1 %v4428_v14  ;;  %v4512_v13 = vld [vmem:[#allocation5 + $0x200] ss:$8 sps:$4 sm:$0xff]   ;;  %v3673_v14 = vcombine.low %v5347_v36, %v5347_v36  ;;  %v4546_v36 = vld [vmem:[#allocation5 + $0x254] ss:$8 sps:$4 sm:$0xff]  }
  0xd8   :  { %2798 = vmatprep.subr.bf16.mxu0 %v4431_v15  ;;  %v4517_v15 = vld [vmem:[#allocation5 + $0x700] ss:$8 sps:$4 sm:$0xff]  }
  0xda   :  { %2594 = vmatpush1.bf16.msra.mxu1 %v4426_v16  ;;  %v4522_v16 = vld [vmem:[#allocation5 + $0x214] ss:$8 sps:$4 sm:$0xff]  }
  0xdb   :  { %2799 = vmatpush1.bf16.msra.mxu0 %v4429_v17  ;;  %2595 = vmatprep.subr.bf16.mxu1 %v4434_v18  ;;  %v4525_v17 = vld [vmem:[#allocation5 + $0x714] ss:$8 sps:$4 sm:$0xff]  }
  0xdc   :  { %2800 = vmatprep.subr.bf16.mxu0 %v4437_v19  ;;  %v5355_v18 = vld [vmem:[#allocation2 + $0x10] sm:$0xff] }
  0xdd   :  { %v3666_v19 = vcombine.high %v5355_v18, %v5355_v18 }
  0xde   :  { %2596 = vmatpush1.bf16.msra.mxu1 %v4432_v20  ;;  %v5359_v20 = vld [vmem:[#allocation2 + $0x38] sm:$0xff] }
  0xdf   :  { %2801 = vmatpush1.bf16.msra.mxu0 %v4435_v21  ;;  %2597 = vmatprep.subr.bf16.mxu1 %v4440_v22  ;;  %v4520_v21 = vld [vmem:[#allocation5 + $0x210] ss:$8 sps:$4 sm:$0xff]  }
  0xe0   :  { %2802 = vmatprep.subr.bf16.mxu0 %v4443_v23  ;;  %v4523_v22 = vld [vmem:[#allocation5 + $0x710] ss:$8 sps:$4 sm:$0xff]   ;;  %v3676_v23 = vcombine.high %v5359_v20, %v5359_v20 }
  0xe2   :  { %2598 = vmatpush1.bf16.msra.mxu1 %v4438_v24  ;;  %v4528_v24 = vld [vmem:[#allocation5 + $0x224] ss:$8 sps:$4 sm:$0xff]  }
  0xe3   :  { %2803 = vmatpush1.bf16.msra.mxu0 %v4441_v25  ;;  %2599 = vmatprep.subr.bf16.mxu1 %v4446_v26  ;;  %v4531_v25 = vld [vmem:[#allocation5 + $0x724] ss:$8 sps:$4 sm:$0xff]   ;;  %v4526_v26 = vld [vmem:[#allocation5 + $0x220] ss:$8 sps:$4 sm:$0xff]  }
  0xe4   :  { %2804 = vmatprep.subr.bf16.mxu0 %v4449_v27  ;;  %v4529_v27 = vld [vmem:[#allocation5 + $0x720] ss:$8 sps:$4 sm:$0xff]  }
  0xe6   :  { %2600 = vmatpush1.bf16.msra.mxu1 %v4444_v28  ;;  %v4534_v28 = vld [vmem:[#allocation5 + $0x234] ss:$8 sps:$4 sm:$0xff]  }
  0xe7   :  { %2805 = vmatpush1.bf16.msra.mxu0 %v4447_v29  ;;  %2601 = vmatprep.subr.bf16.mxu1 %v4452_v30  ;;  %v4537_v29 = vld [vmem:[#allocation5 + $0x734] ss:$8 sps:$4 sm:$0xff]   ;;  %v4532_v30 = vld [vmem:[#allocation5 + $0x230] ss:$8 sps:$4 sm:$0xff]  }
  0xe8   :  { %2806 = vmatprep.subr.bf16.mxu0 %v4455_v31  ;;  %v4535_v31 = vld [vmem:[#allocation5 + $0x730] ss:$8 sps:$4 sm:$0xff]  }
  0xea   :  { %2602 = vmatpush1.bf16.msra.mxu1 %v4450_v33  ;;  %v4543_v33 = vld [vmem:[#allocation5 + $0x744] ss:$8 sps:$4 sm:$0xff]  }
  0xeb   :  { %2807 = vmatpush1.bf16.msra.mxu0 %v4453_v34  ;;  %2603 = vmatprep.subr.bf16.mxu1 %v4458_v37  ;;  %v4538_v34 = vld [vmem:[#allocation5 + $0x240] ss:$8 sps:$4 sm:$0xff]   ;;  %v4549_v37 = vld [vmem:[#allocation5 + $0x754] ss:$8 sps:$4 sm:$0xff]  }
  0xec   :  { %2808 = vmatprep.subr.bf16.mxu0 %v4461_v39  ;;  %v4547_v39 = vld [vmem:[#allocation5 + $0x750] ss:$8 sps:$4 sm:$0xff]  }
  0xee   :  { %2604 = vmatpush1.bf16.msra.mxu1 %v4456_v40  ;;  %v4552_v40 = vld [vmem:[#allocation5 + $0x264] ss:$8 sps:$4 sm:$0xff]  }
  0xef   :  { %2809 = vmatpush1.bf16.msra.mxu0 %v4459_v41  ;;  %2605 = vmatprep.subr.bf16.mxu1 %v4464_v42  ;;  %v4555_v41 = vld [vmem:[#allocation5 + $0x764] ss:$8 sps:$4 sm:$0xff]   ;;  %v4550_v42 = vld [vmem:[#allocation5 + $0x260] ss:$8 sps:$4 sm:$0xff]  }
  0xf0   :  { %2810 = vmatprep.subr.bf16.mxu0 %v4467_v43  ;;  %v4553_v43 = vld [vmem:[#allocation5 + $0x760] ss:$8 sps:$4 sm:$0xff]  }
  0xf2   :  { %2606 = vmatpush1.bf16.msra.mxu1 %v4462_v44  ;;  %v4558_v44 = vld [vmem:[#allocation5 + $0x274] ss:$8 sps:$4 sm:$0xff]  }
  0xf3   :  { %2811 = vmatpush1.bf16.msra.mxu0 %v4465_v45  ;;  %2607 = vmatprep.subr.bf16.mxu1 %v4470_v46  ;;  %v4561_v45 = vld [vmem:[#allocation5 + $0x774] ss:$8 sps:$4 sm:$0xff]   ;;  %v4556_v46 = vld [vmem:[#allocation5 + $0x270] ss:$8 sps:$4 sm:$0xff]  }
  0xf4   :  { %2812 = vmatprep.subr.bf16.mxu0 %v4473_v47  ;;  %v4559_v47 = vld [vmem:[#allocation5 + $0x770] ss:$8 sps:$4 sm:$0xff]  }
  0xf6   :  { %2608 = vmatpush1.bf16.msra.mxu1 %v4468_v48  ;;  %v4564_v48 = vld [vmem:[#allocation5 + $0x284] ss:$8 sps:$4 sm:$0xff]  }
  0xf7   :  { %2813 = vmatpush1.bf16.msra.mxu0 %v4471_v49  ;;  %2609 = vmatprep.subr.bf16.mxu1 %v4476_v50  ;;  %v4567_v49 = vld [vmem:[#allocation5 + $0x784] ss:$8 sps:$4 sm:$0xff]   ;;  %v4562_v50 = vld [vmem:[#allocation5 + $0x280] ss:$8 sps:$4 sm:$0xff]  }
  0xf8   :  { %2814 = vmatprep.subr.bf16.mxu0 %v4479_v51  ;;  %v4565_v51 = vld [vmem:[#allocation5 + $0x780] ss:$8 sps:$4 sm:$0xff]  }
  0xfa   :  { %2610 = vmatpush1.bf16.msra.mxu1 %v4474_v52  ;;  %v4570_v52 = vld [vmem:[#allocation5 + $0x294] ss:$8 sps:$4 sm:$0xff]  }
  0xfb   :  { %2815 = vmatpush1.bf16.msra.mxu0 %v4477_v53  ;;  %2611 = vmatprep.subr.bf16.mxu1 %v4482_v54  ;;  %v4573_v53 = vld [vmem:[#allocation5 + $0x794] ss:$8 sps:$4 sm:$0xff]   ;;  %v4568_v54 = vld [vmem:[#allocation5 + $0x290] ss:$8 sps:$4 sm:$0xff]  }
  0xfc   :  { %2816 = vmatprep.subr.bf16.mxu0 %v4485_v55  ;;  %v4571_v55 = vld [vmem:[#allocation5 + $0x790] ss:$8 sps:$4 sm:$0xff]  }
  0xfe   :  { %2612 = vmatpush1.bf16.msra.mxu1 %v4480_v56  ;;  %v4576_v56 = vld [vmem:[#allocation5 + $0x2a4] ss:$8 sps:$4 sm:$0xff]  }
  0xff   :  { %2817 = vmatpush1.bf16.msra.mxu0 %v4483_v57  ;;  %2613 = vmatprep.subr.bf16.mxu1 %v4488_v58  ;;  %v4579_v57 = vld [vmem:[#allocation5 + $0x7a4] ss:$8 sps:$4 sm:$0xff]   ;;  %v4574_v58 = vld [vmem:[#allocation5 + $0x2a0] ss:$8 sps:$4 sm:$0xff]  }
 0x100   :  { %2818 = vmatprep.subr.bf16.mxu0 %v4491_v59  ;;  %v4577_v59 = vld [vmem:[#allocation5 + $0x7a0] ss:$8 sps:$4 sm:$0xff]  }
 0x102   :  { %2614 = vmatpush1.bf16.msra.mxu1 %v4486_v60  ;;  %v4582_v60 = vld [vmem:[#allocation5 + $0x2b4] ss:$8 sps:$4 sm:$0xff]  }
 0x103   :  { %2819 = vmatpush1.bf16.msra.mxu0 %v4489_v61  ;;  %2615 = vmatprep.subr.bf16.mxu1 %v4494_v62  ;;  %v4585_v61 = vld [vmem:[#allocation5 + $0x7b4] ss:$8 sps:$4 sm:$0xff]   ;;  %v4580_v62 = vld [vmem:[#allocation5 + $0x2b0] ss:$8 sps:$4 sm:$0xff]  }
 0x104   :  { %2820 = vmatprep.subr.bf16.mxu0 %v4497_v63  ;;  %v4583_v63 = vld [vmem:[#allocation5 + $0x7b0] ss:$8 sps:$4 sm:$0xff]  }
 0x106   :  { %2616 = vmatpush1.bf16.msra.mxu1 %v4492_v0  ;;  %v4588_v0 = vld [vmem:[#allocation5 + $0x2c4] ss:$8 sps:$4 sm:$0xff]  }
 0x107   :  { %2821 = vmatpush1.bf16.msra.mxu0 %v4495_v1  ;;  %2617 = vmatprep.subr.bf16.mxu1 %v4500_v2  ;;  %v4591_v1 = vld [vmem:[#allocation5 + $0x7c4] ss:$8 sps:$4 sm:$0xff]   ;;  %v4586_v2 = vld [vmem:[#allocation5 + $0x2c0] ss:$8 sps:$4 sm:$0xff]  }
 0x108   :  { %2822 = vmatprep.subr.bf16.mxu0 %v4503_v3  ;;  %v4589_v3 = vld [vmem:[#allocation5 + $0x7c0] ss:$8 sps:$4 sm:$0xff]  }
 0x10a   :  { %2618 = vmatpush1.bf16.msra.mxu1 %v4498_v4  ;;  %v4594_v4 = vld [vmem:[#allocation5 + $0x2d4] ss:$8 sps:$4 sm:$0xff]  }
 0x10b   :  { %2823 = vmatpush1.bf16.msra.mxu0 %v4501_v5  ;;  %2619 = vmatprep.subr.bf16.mxu1 %v4506_v6  ;;  %v4597_v5 = vld [vmem:[#allocation5 + $0x7d4] ss:$8 sps:$4 sm:$0xff]   ;;  %v4592_v6 = vld [vmem:[#allocation5 + $0x2d0] ss:$8 sps:$4 sm:$0xff]  }
 0x10c   :  { %2824 = vmatprep.subr.bf16.mxu0 %v4509_v7  ;;  %v4595_v7 = vld [vmem:[#allocation5 + $0x7d0] ss:$8 sps:$4 sm:$0xff]  }
 0x10e   :  { %2620 = vmatpush1.bf16.msra.mxu1 %v4504_v8  ;;  %v4600_v8 = vld [vmem:[#allocation5 + $0x2e4] ss:$8 sps:$4 sm:$0xff]  }
 0x10f   :  { %2825 = vmatpush1.bf16.msra.mxu0 %v4507_v9  ;;  %2630 = vmatprep.subr.bf16.mxu1 %v4514_v10  ;;  %v4603_v9 = vld [vmem:[#allocation5 + $0x7e4] ss:$8 sps:$4 sm:$0xff]   ;;  %v4598_v10 = vld [vmem:[#allocation5 + $0x2e0] ss:$8 sps:$4 sm:$0xff]  }
 0x110   :  { %2835 = vmatprep.subr.bf16.mxu0 %v4519_v11  ;;  %v4601_v11 = vld [vmem:[#allocation5 + $0x7e0] ss:$8 sps:$4 sm:$0xff]  }
 0x111   :  { %2622 = vmatmul.mubr.bf16.vlgmr.msra.gmra.mrb[0].mxu1 %v3663_v12  ;;  %v4606_v12 = vld [vmem:[#allocation5 + $0x2f4] ss:$8 sps:$4 sm:$0xff]  }
 0x112   :  { %2827 = vmatmul.mubr.bf16.vlgmr.msra.gmra.mrb[0].mxu0 %v3673_v14  ;;  %2631 = vmatpush1.bf16.msra.mxu1 %v4512_v13  ;;  %v4609_v13 = vld [vmem:[#allocation5 + $0x7f4] ss:$8 sps:$4 sm:$0xff]   ;;  %v4604_v14 = vld [vmem:[#allocation5 + $0x2f0] ss:$8 sps:$4 sm:$0xff]  }
 0x113   :  { %2836 = vmatpush1.bf16.msra.mxu0 %v4517_v15  ;;  %2632 = vmatprep.subr.bf16.mxu1 %v4522_v16  ;;  %v4607_v15 = vld [vmem:[#allocation5 + $0x7f0] ss:$8 sps:$4 sm:$0xff]   ;;  %v4614_v16 = vld [vmem:[#allocation5 + $0x304] ss:$8 sps:$4 sm:$0xff]  }
 0x114   :  { %2837 = vmatprep.subr.bf16.mxu0 %v4525_v17  ;;  %2662 = vmatprep.mubr.bf16.mxu1 %v3666_v19  ;;  %v4619_v17 = vld [vmem:[#allocation5 + $0x804] ss:$8 sps:$4 sm:$0xff]   ;;  %v4612_v19 = vld [vmem:[#allocation5 + $0x300] ss:$8 sps:$4 sm:$0xff]  }
 0x115   :  { %2867 = vmatprep.mubr.bf16.mxu0 %v3676_v23  ;;  %v3675_v23 = vcombine.low %v5359_v20, %v5359_v20  ;;  %v4623_v20 = vld [vmem:[#allocation5 + $0x810] ss:$8 sps:$4 sm:$0xff]  }
 0x116   :  { %2633 = vmatpush1.bf16.msra.mxu1 %v4520_v21  ;;  %v4617_v21 = vld [vmem:[#allocation5 + $0x800] ss:$8 sps:$4 sm:$0xff]  }
 0x117   :  { %2838 = vmatpush1.bf16.msra.mxu0 %v4523_v22  ;;  %2634 = vmatprep.subr.bf16.mxu1 %v4528_v24  ;;  %v3665_v22 = vcombine.low %v5355_v18, %v5355_v18  ;;  %v5367_v24 = vld [vmem:[#allocation2 + $0x18] sm:$0xff] }
 0x118   :  { %2839 = vmatprep.subr.bf16.mxu0 %v4531_v25  ;;  %v5369_v25 = vld [vmem:[#allocation2 + $0x40] sm:$0xff]  ;;  %v4620_v18 = vld [vmem:[#allocation5 + $0x310] ss:$8 sps:$4 sm:$0xff]  }
 0x11a   :  { %2635 = vmatpush1.bf16.msra.mxu1 %v4526_v26  ;;  %v4622_v26 = vld [vmem:[#allocation5 + $0x314] ss:$8 sps:$4 sm:$0xff]  }
 0x11b   :  { %2840 = vmatpush1.bf16.msra.mxu0 %v4529_v27  ;;  %2636 = vmatprep.subr.bf16.mxu1 %v4534_v28  ;;  %v4625_v27 = vld [vmem:[#allocation5 + $0x814] ss:$8 sps:$4 sm:$0xff]   ;;  %v3668_v28 = vcombine.high %v5367_v24, %v5367_v24 }
 0x11c   :  { %2841 = vmatprep.subr.bf16.mxu0 %v4537_v29  ;;  %v3678_v29 = vcombine.high %v5369_v25, %v5369_v25 }
 0x11e   :  { %2637 = vmatpush1.bf16.msra.mxu1 %v4532_v30  ;;  %v4628_v30 = vld [vmem:[#allocation5 + $0x324] ss:$8 sps:$4 sm:$0xff]  }
 0x11f   :  { %2842 = vmatpush1.bf16.msra.mxu0 %v4535_v31  ;;  %2638 = vmatprep.subr.bf16.mxu1 %v4540_v32  ;;  %v4631_v31 = vld [vmem:[#allocation5 + $0x824] ss:$8 sps:$4 sm:$0xff]   ;;  %v4626_v32 = vld [vmem:[#allocation5 + $0x320] ss:$8 sps:$4 sm:$0xff]  }
 0x120   :  { %2843 = vmatprep.subr.bf16.mxu0 %v4543_v33  ;;  %v4629_v33 = vld [vmem:[#allocation5 + $0x820] ss:$8 sps:$4 sm:$0xff]  }
 0x122   :  { %2639 = vmatpush1.bf16.msra.mxu1 %v4538_v34  ;;  %v4634_v34 = vld [vmem:[#allocation5 + $0x334] ss:$8 sps:$4 sm:$0xff]  }
 0x123   :  { %2844 = vmatpush1.bf16.msra.mxu0 %v4541_v35  ;;  %2640 = vmatprep.subr.bf16.mxu1 %v4546_v36  ;;  %v4637_v35 = vld [vmem:[#allocation5 + $0x834] ss:$8 sps:$4 sm:$0xff]   ;;  %v4632_v36 = vld [vmem:[#allocation5 + $0x330] ss:$8 sps:$4 sm:$0xff]  }
 0x124   :  { %2845 = vmatprep.subr.bf16.mxu0 %v4549_v37  ;;  %v4635_v37 = vld [vmem:[#allocation5 + $0x830] ss:$8 sps:$4 sm:$0xff]  }
 0x126   :  { %2641 = vmatpush1.bf16.msra.mxu1 %v4544_v38  ;;  %v4640_v38 = vld [vmem:[#allocation5 + $0x344] ss:$8 sps:$4 sm:$0xff]  }
 0x127   :  { %2846 = vmatpush1.bf16.msra.mxu0 %v4547_v39  ;;  %2642 = vmatprep.subr.bf16.mxu1 %v4552_v40  ;;  %v4643_v39 = vld [vmem:[#allocation5 + $0x844] ss:$8 sps:$4 sm:$0xff]   ;;  %v4638_v40 = vld [vmem:[#allocation5 + $0x340] ss:$8 sps:$4 sm:$0xff]  }
 0x128   :  { %2847 = vmatprep.subr.bf16.mxu0 %v4555_v41  ;;  %v4641_v41 = vld [vmem:[#allocation5 + $0x840] ss:$8 sps:$4 sm:$0xff]  }
 0x12a   :  { %2643 = vmatpush1.bf16.msra.mxu1 %v4550_v42  ;;  %v4646_v42 = vld [vmem:[#allocation5 + $0x354] ss:$8 sps:$4 sm:$0xff]  }
 0x12b   :  { %2848 = vmatpush1.bf16.msra.mxu0 %v4553_v43  ;;  %2644 = vmatprep.subr.bf16.mxu1 %v4558_v44  ;;  %v4649_v43 = vld [vmem:[#allocation5 + $0x854] ss:$8 sps:$4 sm:$0xff]   ;;  %v4644_v44 = vld [vmem:[#allocation5 + $0x350] ss:$8 sps:$4 sm:$0xff]  }
 0x12c   :  { %2849 = vmatprep.subr.bf16.mxu0 %v4561_v45  ;;  %v4647_v45 = vld [vmem:[#allocation5 + $0x850] ss:$8 sps:$4 sm:$0xff]  }
 0x12e   :  { %2645 = vmatpush1.bf16.msra.mxu1 %v4556_v46  ;;  %v4652_v46 = vld [vmem:[#allocation5 + $0x364] ss:$8 sps:$4 sm:$0xff]  }
 0x12f   :  { %2850 = vmatpush1.bf16.msra.mxu0 %v4559_v47  ;;  %2646 = vmatprep.subr.bf16.mxu1 %v4564_v48  ;;  %v4655_v47 = vld [vmem:[#allocation5 + $0x864] ss:$8 sps:$4 sm:$0xff]   ;;  %v4650_v48 = vld [vmem:[#allocation5 + $0x360] ss:$8 sps:$4 sm:$0xff]  }
 0x130   :  { %2851 = vmatprep.subr.bf16.mxu0 %v4567_v49  ;;  %v4653_v49 = vld [vmem:[#allocation5 + $0x860] ss:$8 sps:$4 sm:$0xff]  }
 0x132   :  { %2647 = vmatpush1.bf16.msra.mxu1 %v4562_v50  ;;  %v4658_v50 = vld [vmem:[#allocation5 + $0x374] ss:$8 sps:$4 sm:$0xff]  }
 0x133   :  { %2852 = vmatpush1.bf16.msra.mxu0 %v4565_v51  ;;  %2648 = vmatprep.subr.bf16.mxu1 %v4570_v52  ;;  %v4661_v51 = vld [vmem:[#allocation5 + $0x874] ss:$8 sps:$4 sm:$0xff]   ;;  %v4656_v52 = vld [vmem:[#allocation5 + $0x370] ss:$8 sps:$4 sm:$0xff]  }
 0x134   :  { %2853 = vmatprep.subr.bf16.mxu0 %v4573_v53  ;;  %v4659_v53 = vld [vmem:[#allocation5 + $0x870] ss:$8 sps:$4 sm:$0xff]  }
 0x136   :  { %2649 = vmatpush1.bf16.msra.mxu1 %v4568_v54  ;;  %v4664_v54 = vld [vmem:[#allocation5 + $0x384] ss:$8 sps:$4 sm:$0xff]  }
 0x137   :  { %2854 = vmatpush1.bf16.msra.mxu0 %v4571_v55  ;;  %2650 = vmatprep.subr.bf16.mxu1 %v4576_v56  ;;  %v4667_v55 = vld [vmem:[#allocation5 + $0x884] ss:$8 sps:$4 sm:$0xff]   ;;  %v4662_v56 = vld [vmem:[#allocation5 + $0x380] ss:$8 sps:$4 sm:$0xff]  }
 0x138   :  { %2855 = vmatprep.subr.bf16.mxu0 %v4579_v57  ;;  %v4665_v57 = vld [vmem:[#allocation5 + $0x880] ss:$8 sps:$4 sm:$0xff]  }
 0x13a   :  { %2651 = vmatpush1.bf16.msra.mxu1 %v4574_v58  ;;  %v4670_v58 = vld [vmem:[#allocation5 + $0x394] ss:$8 sps:$4 sm:$0xff]  }
 0x13b   :  { %2856 = vmatpush1.bf16.msra.mxu0 %v4577_v59  ;;  %2652 = vmatprep.subr.bf16.mxu1 %v4582_v60  ;;  %v4673_v59 = vld [vmem:[#allocation5 + $0x894] ss:$8 sps:$4 sm:$0xff]   ;;  %v4668_v60 = vld [vmem:[#allocation5 + $0x390] ss:$8 sps:$4 sm:$0xff]  }
 0x13c   :  { %2857 = vmatprep.subr.bf16.mxu0 %v4585_v61  ;;  %v4671_v61 = vld [vmem:[#allocation5 + $0x890] ss:$8 sps:$4 sm:$0xff]  }
 0x13e   :  { %2653 = vmatpush1.bf16.msra.mxu1 %v4580_v62  ;;  %v4676_v62 = vld [vmem:[#allocation5 + $0x3a4] ss:$8 sps:$4 sm:$0xff]  }
 0x13f   :  { %2858 = vmatpush1.bf16.msra.mxu0 %v4583_v63  ;;  %2654 = vmatprep.subr.bf16.mxu1 %v4588_v0  ;;  %v4679_v63 = vld [vmem:[#allocation5 + $0x8a4] ss:$8 sps:$4 sm:$0xff]   ;;  %v4674_v0 = vld [vmem:[#allocation5 + $0x3a0] ss:$8 sps:$4 sm:$0xff]  }
 0x140   :  { %2859 = vmatprep.subr.bf16.mxu0 %v4591_v1  ;;  %v4677_v1 = vld [vmem:[#allocation5 + $0x8a0] ss:$8 sps:$4 sm:$0xff]  }
 0x142   :  { %2655 = vmatpush1.bf16.msra.mxu1 %v4586_v2  ;;  %v4682_v2 = vld [vmem:[#allocation5 + $0x3b4] ss:$8 sps:$4 sm:$0xff]  }
 0x143   :  { %2860 = vmatpush1.bf16.msra.mxu0 %v4589_v3  ;;  %2656 = vmatprep.subr.bf16.mxu1 %v4594_v4  ;;  %v4685_v3 = vld [vmem:[#allocation5 + $0x8b4] ss:$8 sps:$4 sm:$0xff]   ;;  %v4680_v4 = vld [vmem:[#allocation5 + $0x3b0] ss:$8 sps:$4 sm:$0xff]  }
 0x144   :  { %2861 = vmatprep.subr.bf16.mxu0 %v4597_v5  ;;  %v4683_v5 = vld [vmem:[#allocation5 + $0x8b0] ss:$8 sps:$4 sm:$0xff]  }
 0x146   :  { %2657 = vmatpush1.bf16.msra.mxu1 %v4592_v6  ;;  %v4688_v6 = vld [vmem:[#allocation5 + $0x3c4] ss:$8 sps:$4 sm:$0xff]  }
 0x147   :  { %2862 = vmatpush1.bf16.msra.mxu0 %v4595_v7  ;;  %2658 = vmatprep.subr.bf16.mxu1 %v4600_v8  ;;  %v4691_v7 = vld [vmem:[#allocation5 + $0x8c4] ss:$8 sps:$4 sm:$0xff]   ;;  %v4686_v8 = vld [vmem:[#allocation5 + $0x3c0] ss:$8 sps:$4 sm:$0xff]  }
 0x148   :  { %2863 = vmatprep.subr.bf16.mxu0 %v4603_v9  ;;  %v4689_v9 = vld [vmem:[#allocation5 + $0x8c0] ss:$8 sps:$4 sm:$0xff]  }
 0x14a   :  { %2659 = vmatpush1.bf16.msra.mxu1 %v4598_v10  ;;  %v4694_v10 = vld [vmem:[#allocation5 + $0x3d4] ss:$8 sps:$4 sm:$0xff]  }
 0x14b   :  { %2864 = vmatpush1.bf16.msra.mxu0 %v4601_v11  ;;  %2660 = vmatprep.subr.bf16.mxu1 %v4606_v12  ;;  %v4697_v11 = vld [vmem:[#allocation5 + $0x8d4] ss:$8 sps:$4 sm:$0xff]   ;;  %v4692_v12 = vld [vmem:[#allocation5 + $0x3d0] ss:$8 sps:$4 sm:$0xff]  }
 0x14c   :  { %2865 = vmatprep.subr.bf16.mxu0 %v4609_v13  ;;  %v4695_v13 = vld [vmem:[#allocation5 + $0x8d0] ss:$8 sps:$4 sm:$0xff]  }
 0x14e   :  { %2661 = vmatpush1.bf16.msra.mxu1 %v4604_v14  ;;  %v4700_v14 = vld [vmem:[#allocation5 + $0x3e4] ss:$8 sps:$4 sm:$0xff]  }
 0x14f   :  { %2866 = vmatpush1.bf16.msra.mxu0 %v4607_v15  ;;  %2671 = vmatprep.subr.bf16.mxu1 %v4614_v16  ;;  %v4703_v15 = vld [vmem:[#allocation5 + $0x8e4] ss:$8 sps:$4 sm:$0xff]   ;;  %v4698_v16 = vld [vmem:[#allocation5 + $0x3e0] ss:$8 sps:$4 sm:$0xff]  }
 0x150   :  { %2876 = vmatprep.subr.bf16.mxu0 %v4619_v17  ;;  %v4701_v17 = vld [vmem:[#allocation5 + $0x8e0] ss:$8 sps:$4 sm:$0xff]  }
 0x151   :  { %2663 = vmatmul.mubr.bf16.vlgmr.msra.gmra.mrb[0].mxu1 %v3665_v22  ;;  %v4704_v22 = vld [vmem:[#allocation5 + $0x3f0] ss:$8 sps:$4 sm:$0xff]  }
 0x152   :  { %2868 = vmatmul.mubr.bf16.vlgmr.msra.gmra.mrb[0].mxu0 %v3675_v23  ;;  %2672 = vmatpush1.bf16.msra.mxu1 %v4612_v19  ;;  %v4706_v19 = vld [vmem:[#allocation5 + $0x3f4] ss:$8 sps:$4 sm:$0xff]   ;;  %v4707_v23 = vld [vmem:[#allocation5 + $0x8f0] ss:$8 sps:$4 sm:$0xff]  }
 0x153   :  { %2877 = vmatpush1.bf16.msra.mxu0 %v4617_v21  ;;  %2673 = vmatprep.subr.bf16.mxu1 %v4622_v26  ;;  %v4709_v21 = vld [vmem:[#allocation5 + $0x8f4] ss:$8 sps:$4 sm:$0xff]   ;;  %v4714_v26 = vld [vmem:[#allocation5 + $0x404] ss:$8 sps:$4 sm:$0xff]  }
 0x154   :  { %2878 = vmatprep.subr.bf16.mxu0 %v4625_v27  ;;  %2703 = vmatprep.mubr.bf16.mxu1 %v3668_v28  ;;  %v4719_v27 = vld [vmem:[#allocation5 + $0x904] ss:$8 sps:$4 sm:$0xff]  }
 0x155   :  { %2908 = vmatprep.mubr.bf16.mxu0 %v3678_v29  ;;  %v5375_v28 = vld [vmem:[#allocation2 + $0x20] sm:$0xff]  ;;  %v5377_v29 = vld [vmem:[#allocation2 + $0x48] sm:$0xff] }
 0x156   :  { %2674 = vmatpush1.bf16.msra.mxu1 %v4620_v18  ;;  %v4712_v18 = vld [vmem:[#allocation5 + $0x400] ss:$8 sps:$4 sm:$0xff]  }
 0x157   :  { %2879 = vmatpush1.bf16.msra.mxu0 %v4623_v20  ;;  %2675 = vmatprep.subr.bf16.mxu1 %v4628_v30  ;;  %v3667_v20 = vcombine.low %v5367_v24, %v5367_v24  ;;  %v3677_v30 = vcombine.low %v5369_v25, %v5369_v25  ;;  %v4728_v24 = vld [vmem:[#allocation5 + $0x424] ss:$8 sps:$4 sm:$0xff]  }
 0x158   :  { %2880 = vmatprep.subr.bf16.mxu0 %v4631_v31  ;;  %v4717_v31 = vld [vmem:[#allocation5 + $0x900] ss:$8 sps:$4 sm:$0xff]   ;;  %v4731_v25 = vld [vmem:[#allocation5 + $0x924] ss:$8 sps:$4 sm:$0xff]  }
 0x15a   :  { %2676 = vmatpush1.bf16.msra.mxu1 %v4626_v32  ;;  %v4722_v32 = vld [vmem:[#allocation5 + $0x414] ss:$8 sps:$4 sm:$0xff]  }
 0x15b   :  { %2881 = vmatpush1.bf16.msra.mxu0 %v4629_v33  ;;  %2677 = vmatprep.subr.bf16.mxu1 %v4634_v34  ;;  %v4725_v33 = vld [vmem:[#allocation5 + $0x914] ss:$8 sps:$4 sm:$0xff]   ;;  %v4720_v34 = vld [vmem:[#allocation5 + $0x410] ss:$8 sps:$4 sm:$0xff]  }
 0x15c   :  { %2882 = vmatprep.subr.bf16.mxu0 %v4637_v35  ;;  %v4723_v35 = vld [vmem:[#allocation5 + $0x910] ss:$8 sps:$4 sm:$0xff]  }
 0x15e   :  { %2678 = vmatpush1.bf16.msra.mxu1 %v4632_v36  ;;  %v3670_v36 = vcombine.high %v5375_v28, %v5375_v28 }
 0x15f   :  { %2883 = vmatpush1.bf16.msra.mxu0 %v4635_v37  ;;  %2679 = vmatprep.subr.bf16.mxu1 %v4640_v38  ;;  %v3680_v37 = vcombine.high %v5377_v29, %v5377_v29  ;;  %v4726_v38 = vld [vmem:[#allocation5 + $0x420] ss:$8 sps:$4 sm:$0xff]  }
 0x160   :  { %2884 = vmatprep.subr.bf16.mxu0 %v4643_v39  ;;  %v4729_v39 = vld [vmem:[#allocation5 + $0x920] ss:$8 sps:$4 sm:$0xff]  }
 0x162   :  { %2680 = vmatpush1.bf16.msra.mxu1 %v4638_v40  ;;  %v4734_v40 = vld [vmem:[#allocation5 + $0x434] ss:$8 sps:$4 sm:$0xff]  }
 0x163   :  { %2885 = vmatpush1.bf16.msra.mxu0 %v4641_v41  ;;  %2681 = vmatprep.subr.bf16.mxu1 %v4646_v42  ;;  %v4737_v41 = vld [vmem:[#allocation5 + $0x934] ss:$8 sps:$4 sm:$0xff]   ;;  %v4732_v42 = vld [vmem:[#allocation5 + $0x430] ss:$8 sps:$4 sm:$0xff]  }
 0x164   :  { %2886 = vmatprep.subr.bf16.mxu0 %v4649_v43  ;;  %v4735_v43 = vld [vmem:[#allocation5 + $0x930] ss:$8 sps:$4 sm:$0xff]  }
 0x166   :  { %2682 = vmatpush1.bf16.msra.mxu1 %v4644_v44  ;;  %v4740_v44 = vld [vmem:[#allocation5 + $0x444] ss:$8 sps:$4 sm:$0xff]  }
 0x167   :  { %2887 = vmatpush1.bf16.msra.mxu0 %v4647_v45  ;;  %2683 = vmatprep.subr.bf16.mxu1 %v4652_v46  ;;  %v4743_v45 = vld [vmem:[#allocation5 + $0x944] ss:$8 sps:$4 sm:$0xff]   ;;  %v4738_v46 = vld [vmem:[#allocation5 + $0x440] ss:$8 sps:$4 sm:$0xff]  }
 0x168   :  { %2888 = vmatprep.subr.bf16.mxu0 %v4655_v47  ;;  %v4741_v47 = vld [vmem:[#allocation5 + $0x940] ss:$8 sps:$4 sm:$0xff]  }
 0x16a   :  { %2684 = vmatpush1.bf16.msra.mxu1 %v4650_v48  ;;  %v4746_v48 = vld [vmem:[#allocation5 + $0x454] ss:$8 sps:$4 sm:$0xff]  }
 0x16b   :  { %2889 = vmatpush1.bf16.msra.mxu0 %v4653_v49  ;;  %2685 = vmatprep.subr.bf16.mxu1 %v4658_v50  ;;  %v4749_v49 = vld [vmem:[#allocation5 + $0x954] ss:$8 sps:$4 sm:$0xff]   ;;  %v4744_v50 = vld [vmem:[#allocation5 + $0x450] ss:$8 sps:$4 sm:$0xff]  }
 0x16c   :  { %2890 = vmatprep.subr.bf16.mxu0 %v4661_v51  ;;  %v4747_v51 = vld [vmem:[#allocation5 + $0x950] ss:$8 sps:$4 sm:$0xff]  }
 0x16e   :  { %2686 = vmatpush1.bf16.msra.mxu1 %v4656_v52  ;;  %v4752_v52 = vld [vmem:[#allocation5 + $0x464] ss:$8 sps:$4 sm:$0xff]  }
 0x16f   :  { %2891 = vmatpush1.bf16.msra.mxu0 %v4659_v53  ;;  %2687 = vmatprep.subr.bf16.mxu1 %v4664_v54  ;;  %v4755_v53 = vld [vmem:[#allocation5 + $0x964] ss:$8 sps:$4 sm:$0xff]   ;;  %v4750_v54 = vld [vmem:[#allocation5 + $0x460] ss:$8 sps:$4 sm:$0xff]  }
 0x170   :  { %2892 = vmatprep.subr.bf16.mxu0 %v4667_v55  ;;  %v4753_v55 = vld [vmem:[#allocation5 + $0x960] ss:$8 sps:$4 sm:$0xff]  }
 0x172   :  { %2688 = vmatpush1.bf16.msra.mxu1 %v4662_v56  ;;  %v4758_v56 = vld [vmem:[#allocation5 + $0x474] ss:$8 sps:$4 sm:$0xff]  }
 0x173   :  { %2893 = vmatpush1.bf16.msra.mxu0 %v4665_v57  ;;  %2689 = vmatprep.subr.bf16.mxu1 %v4670_v58  ;;  %v4761_v57 = vld [vmem:[#allocation5 + $0x974] ss:$8 sps:$4 sm:$0xff]   ;;  %v4756_v58 = vld [vmem:[#allocation5 + $0x470] ss:$8 sps:$4 sm:$0xff]  }
 0x174   :  { %2894 = vmatprep.subr.bf16.mxu0 %v4673_v59  ;;  %v4759_v59 = vld [vmem:[#allocation5 + $0x970] ss:$8 sps:$4 sm:$0xff]  }
 0x176   :  { %2690 = vmatpush1.bf16.msra.mxu1 %v4668_v60  ;;  %v4764_v60 = vld [vmem:[#allocation5 + $0x484] ss:$8 sps:$4 sm:$0xff]  }
 0x177   :  { %2895 = vmatpush1.bf16.msra.mxu0 %v4671_v61  ;;  %2691 = vmatprep.subr.bf16.mxu1 %v4676_v62  ;;  %v4767_v61 = vld [vmem:[#allocation5 + $0x984] ss:$8 sps:$4 sm:$0xff]   ;;  %v4762_v62 = vld [vmem:[#allocation5 + $0x480] ss:$8 sps:$4 sm:$0xff]  }
 0x178   :  { %2896 = vmatprep.subr.bf16.mxu0 %v4679_v63  ;;  %v4765_v63 = vld [vmem:[#allocation5 + $0x980] ss:$8 sps:$4 sm:$0xff]  }
 0x17a   :  { %2692 = vmatpush1.bf16.msra.mxu1 %v4674_v0  ;;  %v4770_v0 = vld [vmem:[#allocation5 + $0x494] ss:$8 sps:$4 sm:$0xff]  }
 0x17b   :  { %2897 = vmatpush1.bf16.msra.mxu0 %v4677_v1  ;;  %2693 = vmatprep.subr.bf16.mxu1 %v4682_v2  ;;  %v4773_v1 = vld [vmem:[#allocation5 + $0x994] ss:$8 sps:$4 sm:$0xff]   ;;  %v4768_v2 = vld [vmem:[#allocation5 + $0x490] ss:$8 sps:$4 sm:$0xff]  }
 0x17c   :  { %2898 = vmatprep.subr.bf16.mxu0 %v4685_v3  ;;  %v4771_v3 = vld [vmem:[#allocation5 + $0x990] ss:$8 sps:$4 sm:$0xff]  }
 0x17e   :  { %2694 = vmatpush1.bf16.msra.mxu1 %v4680_v4  ;;  %v4776_v4 = vld [vmem:[#allocation5 + $0x4a4] ss:$8 sps:$4 sm:$0xff]  }
 0x17f   :  { %2899 = vmatpush1.bf16.msra.mxu0 %v4683_v5  ;;  %2695 = vmatprep.subr.bf16.mxu1 %v4688_v6  ;;  %v4779_v5 = vld [vmem:[#allocation5 + $0x9a4] ss:$8 sps:$4 sm:$0xff]   ;;  %v4774_v6 = vld [vmem:[#allocation5 + $0x4a0] ss:$8 sps:$4 sm:$0xff]  }
 0x180   :  { %2900 = vmatprep.subr.bf16.mxu0 %v4691_v7  ;;  %v4777_v7 = vld [vmem:[#allocation5 + $0x9a0] ss:$8 sps:$4 sm:$0xff]  }
 0x182   :  { %2696 = vmatpush1.bf16.msra.mxu1 %v4686_v8  ;;  %v4782_v8 = vld [vmem:[#allocation5 + $0x4b4] ss:$8 sps:$4 sm:$0xff]  }
 0x183   :  { %2901 = vmatpush1.bf16.msra.mxu0 %v4689_v9  ;;  %2697 = vmatprep.subr.bf16.mxu1 %v4694_v10  ;;  %v4785_v9 = vld [vmem:[#allocation5 + $0x9b4] ss:$8 sps:$4 sm:$0xff]   ;;  %v4780_v10 = vld [vmem:[#allocation5 + $0x4b0] ss:$8 sps:$4 sm:$0xff]  }
 0x184   :  { %2902 = vmatprep.subr.bf16.mxu0 %v4697_v11  ;;  %v4783_v11 = vld [vmem:[#allocation5 + $0x9b0] ss:$8 sps:$4 sm:$0xff]  }
 0x186   :  { %2698 = vmatpush1.bf16.msra.mxu1 %v4692_v12  ;;  %v4788_v12 = vld [vmem:[#allocation5 + $0x4c4] ss:$8 sps:$4 sm:$0xff]  }
 0x187   :  { %2903 = vmatpush1.bf16.msra.mxu0 %v4695_v13  ;;  %2699 = vmatprep.subr.bf16.mxu1 %v4700_v14  ;;  %v4791_v13 = vld [vmem:[#allocation5 + $0x9c4] ss:$8 sps:$4 sm:$0xff]   ;;  %v4786_v14 = vld [vmem:[#allocation5 + $0x4c0] ss:$8 sps:$4 sm:$0xff]  }
 0x188   :  { %2904 = vmatprep.subr.bf16.mxu0 %v4703_v15  ;;  %v4789_v15 = vld [vmem:[#allocation5 + $0x9c0] ss:$8 sps:$4 sm:$0xff]  }
 0x18a   :  { %2700 = vmatpush1.bf16.msra.mxu1 %v4698_v16  ;;  %v4794_v16 = vld [vmem:[#allocation5 + $0x4d4] ss:$8 sps:$4 sm:$0xff]  }
 0x18b   :  { %2905 = vmatpush1.bf16.msra.mxu0 %v4701_v17  ;;  %2701 = vmatprep.subr.bf16.mxu1 %v4706_v19  ;;  %v4797_v17 = vld [vmem:[#allocation5 + $0x9d4] ss:$8 sps:$4 sm:$0xff]   ;;  %v4792_v19 = vld [vmem:[#allocation5 + $0x4d0] ss:$8 sps:$4 sm:$0xff]  }
 0x18c   :  { %2906 = vmatprep.subr.bf16.mxu0 %v4709_v21  ;;  %v4795_v21 = vld [vmem:[#allocation5 + $0x9d0] ss:$8 sps:$4 sm:$0xff]  }
 0x18e   :  { %2702 = vmatpush1.bf16.msra.mxu1 %v4704_v22  ;;  %v4800_v22 = vld [vmem:[#allocation5 + $0x4e4] ss:$8 sps:$4 sm:$0xff]  }
 0x18f   :  { %2907 = vmatpush1.bf16.msra.mxu0 %v4707_v23  ;;  %2712 = vmatprep.subr.bf16.mxu1 %v4714_v26  ;;  %v4803_v23 = vld [vmem:[#allocation5 + $0x9e4] ss:$8 sps:$4 sm:$0xff]   ;;  %v4798_v26 = vld [vmem:[#allocation5 + $0x4e0] ss:$8 sps:$4 sm:$0xff]  }
 0x190   :  { %2917 = vmatprep.subr.bf16.mxu0 %v4719_v27  ;;  %v4801_v27 = vld [vmem:[#allocation5 + $0x9e0] ss:$8 sps:$4 sm:$0xff]  }
 0x191   :  { %2704 = vmatmul.mubr.bf16.vlgmr.msra.gmra.mrb[0].mxu1 %v3667_v20  ;;  %v4809_v20 = vld [vmem:[#allocation5 + $0x9f4] ss:$8 sps:$4 sm:$0xff]  }
 0x192   :  { %2909 = vmatmul.mubr.bf16.vlgmr.msra.gmra.mrb[0].mxu0 %v3677_v30  ;;  %2713 = vmatpush1.bf16.msra.mxu1 %v4712_v18  ;;  %v4806_v18 = vld [vmem:[#allocation5 + $0x4f4] ss:$8 sps:$4 sm:$0xff]   ;;  %v4804_v30 = vld [vmem:[#allocation5 + $0x4f0] ss:$8 sps:$4 sm:$0xff]  }
 0x193   :  { %2918 = vmatpush1.bf16.msra.mxu0 %v4717_v31  ;;  %2714 = vmatprep.subr.bf16.mxu1 %v4722_v32  ;;  %v4807_v31 = vld [vmem:[#allocation5 + $0x9f0] ss:$8 sps:$4 sm:$0xff]   ;;  %v4816_v32 = vld [vmem:[#allocation5 + $0xa04] ss:$8 sps:$4 sm:$0xff]  }
 0x194   :  { %2919 = vmatprep.subr.bf16.mxu0 %v4725_v33  ;;  %2744 = vmatprep.mubr.bf16.mxu1 %v3670_v36  ;;  %v5387_v33 = vld [vmem:[#allocation2 + $0x50] sm:$0xff]  ;;  %v4814_v36 = vld [vmem:[#allocation5 + $0xa00] ss:$8 sps:$4 sm:$0xff]  }
 0x195   :  { %2949 = vmatprep.mubr.bf16.mxu0 %v3680_v37  ;;  %v3682_v37 = vcombine.high %v5387_v33, %v5387_v33 }
 0x196   :  { %2715 = vmatpush1.bf16.msra.mxu1 %v4720_v34  ;;  %v3669_v34 = vcombine.low %v5375_v28, %v5375_v28  ;;  %v4820_v28 = vld [vmem:[#allocation5 + $0xa20] ss:$8 sps:$4 sm:$0xff]  }
 0x197   :  { %2920 = vmatpush1.bf16.msra.mxu0 %v4723_v35  ;;  %2716 = vmatprep.subr.bf16.mxu1 %v4728_v24  ;;  %v3679_v35 = vcombine.low %v5377_v29, %v5377_v29  ;;  %v4819_v24 = vld [vmem:[#allocation5 + $0xa14] ss:$8 sps:$4 sm:$0xff]   ;;  %v4823_v29 = vld [vmem:[#allocation5 + $0xa30] ss:$8 sps:$4 sm:$0xff]  }
 0x198   :  { %2921 = vmatprep.subr.bf16.mxu0 %v4731_v25  ;;  %v4817_v25 = vld [vmem:[#allocation5 + $0xa10] ss:$8 sps:$4 sm:$0xff]  }
 0x19a   :  { %2717 = vmatpush1.bf16.msra.mxu1 %v4726_v38  ;;  %v4822_v38 = vld [vmem:[#allocation5 + $0xa24] ss:$8 sps:$4 sm:$0xff]  }
 0x19b   :  { %2922 = vmatpush1.bf16.msra.mxu0 %v4729_v39  ;;  %2718 = vmatprep.subr.bf16.mxu1 %v4734_v40  ;;  %v4825_v39 = vld [vmem:[#allocation5 + $0xa34] ss:$8 sps:$4 sm:$0xff]   ;;  %v4828_v40 = vld [vmem:[#allocation5 + $0xa44] ss:$8 sps:$4 sm:$0xff]  }
 0x19c   :  { %2923 = vmatprep.subr.bf16.mxu0 %v4737_v41  ;;  %v4826_v41 = vld [vmem:[#allocation5 + $0xa40] ss:$8 sps:$4 sm:$0xff]  }
 0x19e   :  { %2719 = vmatpush1.bf16.msra.mxu1 %v4732_v42  ;;  %v4831_v42 = vld [vmem:[#allocation5 + $0xa54] ss:$8 sps:$4 sm:$0xff]  }
 0x19f   :  { %2924 = vmatpush1.bf16.msra.mxu0 %v4735_v43  ;;  %2720 = vmatprep.subr.bf16.mxu1 %v4740_v44  ;;  %v4829_v43 = vld [vmem:[#allocation5 + $0xa50] ss:$8 sps:$4 sm:$0xff]   ;;  %v4834_v44 = vld [vmem:[#allocation5 + $0xa64] ss:$8 sps:$4 sm:$0xff]  }
 0x1a0   :  { %2925 = vmatprep.subr.bf16.mxu0 %v4743_v45  ;;  %v4832_v45 = vld [vmem:[#allocation5 + $0xa60] ss:$8 sps:$4 sm:$0xff]  }
 0x1a2   :  { %2721 = vmatpush1.bf16.msra.mxu1 %v4738_v46  ;;  %v4837_v46 = vld [vmem:[#allocation5 + $0xa74] ss:$8 sps:$4 sm:$0xff]  }
 0x1a3   :  { %2926 = vmatpush1.bf16.msra.mxu0 %v4741_v47  ;;  %2722 = vmatprep.subr.bf16.mxu1 %v4746_v48  ;;  %v4835_v47 = vld [vmem:[#allocation5 + $0xa70] ss:$8 sps:$4 sm:$0xff]   ;;  %v4840_v48 = vld [vmem:[#allocation5 + $0xa84] ss:$8 sps:$4 sm:$0xff]  }
 0x1a4   :  { %2927 = vmatprep.subr.bf16.mxu0 %v4749_v49  ;;  %v4838_v49 = vld [vmem:[#allocation5 + $0xa80] ss:$8 sps:$4 sm:$0xff]  }
 0x1a6   :  { %2723 = vmatpush1.bf16.msra.mxu1 %v4744_v50  ;;  %v4843_v50 = vld [vmem:[#allocation5 + $0xa94] ss:$8 sps:$4 sm:$0xff]  }
 0x1a7   :  { %2928 = vmatpush1.bf16.msra.mxu0 %v4747_v51  ;;  %2724 = vmatprep.subr.bf16.mxu1 %v4752_v52  ;;  %v4841_v51 = vld [vmem:[#allocation5 + $0xa90] ss:$8 sps:$4 sm:$0xff]   ;;  %v4846_v52 = vld [vmem:[#allocation5 + $0xaa4] ss:$8 sps:$4 sm:$0xff]  }
 0x1a8   :  { %2929 = vmatprep.subr.bf16.mxu0 %v4755_v53  ;;  %v4844_v53 = vld [vmem:[#allocation5 + $0xaa0] ss:$8 sps:$4 sm:$0xff]  }
 0x1aa   :  { %2725 = vmatpush1.bf16.msra.mxu1 %v4750_v54  ;;  %v4849_v54 = vld [vmem:[#allocation5 + $0xab4] ss:$8 sps:$4 sm:$0xff]  }
 0x1ab   :  { %2930 = vmatpush1.bf16.msra.mxu0 %v4753_v55  ;;  %2726 = vmatprep.subr.bf16.mxu1 %v4758_v56  ;;  %v4847_v55 = vld [vmem:[#allocation5 + $0xab0] ss:$8 sps:$4 sm:$0xff]   ;;  %v4852_v56 = vld [vmem:[#allocation5 + $0xac4] ss:$8 sps:$4 sm:$0xff]  }
 0x1ac   :  { %2931 = vmatprep.subr.bf16.mxu0 %v4761_v57  ;;  %v4850_v57 = vld [vmem:[#allocation5 + $0xac0] ss:$8 sps:$4 sm:$0xff]  }
 0x1ae   :  { %2727 = vmatpush1.bf16.msra.mxu1 %v4756_v58  ;;  %v4855_v58 = vld [vmem:[#allocation5 + $0xad4] ss:$8 sps:$4 sm:$0xff]  }
 0x1af   :  { %2932 = vmatpush1.bf16.msra.mxu0 %v4759_v59  ;;  %2728 = vmatprep.subr.bf16.mxu1 %v4764_v60  ;;  %v4853_v59 = vld [vmem:[#allocation5 + $0xad0] ss:$8 sps:$4 sm:$0xff]   ;;  %v4858_v60 = vld [vmem:[#allocation5 + $0xae4] ss:$8 sps:$4 sm:$0xff]  }
 0x1b0   :  { %2933 = vmatprep.subr.bf16.mxu0 %v4767_v61  ;;  %v4856_v61 = vld [vmem:[#allocation5 + $0xae0] ss:$8 sps:$4 sm:$0xff]  }
 0x1b2   :  { %2729 = vmatpush1.bf16.msra.mxu1 %v4762_v62  ;;  %v4861_v62 = vld [vmem:[#allocation5 + $0xaf4] ss:$8 sps:$4 sm:$0xff]  }
 0x1b3   :  { %2934 = vmatpush1.bf16.msra.mxu0 %v4765_v63  ;;  %2730 = vmatprep.subr.bf16.mxu1 %v4770_v0  ;;  %v4859_v63 = vld [vmem:[#allocation5 + $0xaf0] ss:$8 sps:$4 sm:$0xff]   ;;  %v4866_v0 = vld [vmem:[#allocation5 + $0xb04] ss:$8 sps:$4 sm:$0xff]  }
 0x1b4   :  { %2935 = vmatprep.subr.bf16.mxu0 %v4773_v1  ;;  %v5395_v1 = vld [vmem:[#allocation2 + $0x58] sm:$0xff] }
 0x1b6   :  { %2731 = vmatpush1.bf16.msra.mxu1 %v4768_v2  ;;  %v3681_v2 = vcombine.low %v5387_v33, %v5387_v33  ;;  %v4891_v33 = vld [vmem:[#allocation5 + $0xb90] ss:$8 sps:$4 sm:$0xff]  }
 0x1b7   :  { %2936 = vmatpush1.bf16.msra.mxu0 %v4771_v3  ;;  %2732 = vmatprep.subr.bf16.mxu1 %v4776_v4  ;;  %v4864_v3 = vld [vmem:[#allocation5 + $0xb00] ss:$8 sps:$4 sm:$0xff]   ;;  %v3684_v4 = vcombine.high %v5395_v1, %v5395_v1 }
 0x1b8   :  { %2937 = vmatprep.subr.bf16.mxu0 %v4779_v5  ;;  %v4869_v5 = vld [vmem:[#allocation5 + $0xb14] ss:$8 sps:$4 sm:$0xff]  }
 0x1ba   :  { %2733 = vmatpush1.bf16.msra.mxu1 %v4774_v6  ;;  %v4867_v6 = vld [vmem:[#allocation5 + $0xb10] ss:$8 sps:$4 sm:$0xff]  }
 0x1bb   :  { %2938 = vmatpush1.bf16.msra.mxu0 %v4777_v7  ;;  %2734 = vmatprep.subr.bf16.mxu1 %v4782_v8  ;;  %v4872_v7 = vld [vmem:[#allocation5 + $0xb24] ss:$8 sps:$4 sm:$0xff]   ;;  %v4870_v8 = vld [vmem:[#allocation5 + $0xb20] ss:$8 sps:$4 sm:$0xff]  }
 0x1bc   :  { %2939 = vmatprep.subr.bf16.mxu0 %v4785_v9  ;;  %v4875_v9 = vld [vmem:[#allocation5 + $0xb34] ss:$8 sps:$4 sm:$0xff]  }
 0x1be   :  { %2735 = vmatpush1.bf16.msra.mxu1 %v4780_v10  ;;  %v4873_v10 = vld [vmem:[#allocation5 + $0xb30] ss:$8 sps:$4 sm:$0xff]  }
 0x1bf   :  { %2940 = vmatpush1.bf16.msra.mxu0 %v4783_v11  ;;  %2736 = vmatprep.subr.bf16.mxu1 %v4788_v12  ;;  %v4878_v11 = vld [vmem:[#allocation5 + $0xb44] ss:$8 sps:$4 sm:$0xff]   ;;  %v4876_v12 = vld [vmem:[#allocation5 + $0xb40] ss:$8 sps:$4 sm:$0xff]  }
 0x1c0   :  { %2941 = vmatprep.subr.bf16.mxu0 %v4791_v13  ;;  %v4881_v13 = vld [vmem:[#allocation5 + $0xb54] ss:$8 sps:$4 sm:$0xff]  }
 0x1c2   :  { %2737 = vmatpush1.bf16.msra.mxu1 %v4786_v14  ;;  %v4879_v14 = vld [vmem:[#allocation5 + $0xb50] ss:$8 sps:$4 sm:$0xff]  }
 0x1c3   :  { %2942 = vmatpush1.bf16.msra.mxu0 %v4789_v15  ;;  %2738 = vmatprep.subr.bf16.mxu1 %v4794_v16  ;;  %v4884_v15 = vld [vmem:[#allocation5 + $0xb64] ss:$8 sps:$4 sm:$0xff]   ;;  %v4882_v16 = vld [vmem:[#allocation5 + $0xb60] ss:$8 sps:$4 sm:$0xff]  }
 0x1c4   :  { %2943 = vmatprep.subr.bf16.mxu0 %v4797_v17  ;;  %v4887_v17 = vld [vmem:[#allocation5 + $0xb74] ss:$8 sps:$4 sm:$0xff]  }
 0x1c6   :  { %2739 = vmatpush1.bf16.msra.mxu1 %v4792_v19  ;;  %v4914_v19 = vld [vmem:[#allocation7 + $0x40] sm:$0xff]  }
 0x1c7   :  { %2944 = vmatpush1.bf16.msra.mxu0 %v4795_v21  ;;  %2740 = vmatprep.subr.bf16.mxu1 %v4800_v22  ;;  %v4915_v21 = vld [vmem:[#allocation7] sm:$0xff]   ;;  %v4916_v22 = vld [vmem:[#allocation7 + $0x48] sm:$0xff]  }
 0x1c8   :  { %2945 = vmatprep.subr.bf16.mxu0 %v4803_v23  ;;  %v4885_v23 = vld [vmem:[#allocation5 + $0xb70] ss:$8 sps:$4 sm:$0xff]  }
 0x1ca   :  { %2741 = vmatpush1.bf16.msra.mxu1 %v4798_v26  ;;  %v4917_v26 = vld [vmem:[#allocation7 + $0x8] sm:$0xff]  }
 0x1cb   :  { %2946 = vmatpush1.bf16.msra.mxu0 %v4801_v27  ;;  %2742 = vmatprep.subr.bf16.mxu1 %v4806_v18  ;;  %v4890_v27 = vld [vmem:[#allocation5 + $0xb84] ss:$8 sps:$4 sm:$0xff]   ;;  %v4918_v18 = vld [vmem:[#allocation7 + $0x50] sm:$0xff]  }
 0x1cc   :  { %2947 = vmatprep.subr.bf16.mxu0 %v4809_v20  ;;  %v4888_v20 = vld [vmem:[#allocation5 + $0xb80] ss:$8 sps:$4 sm:$0xff]  }
 0x1ce   :  { %2743 = vmatpush1.bf16.msra.mxu1 %v4804_v30  ;;  %v4919_v30 = vld [vmem:[#allocation7 + $0x10] sm:$0xff]  }
 0x1cf   :  { %2948 = vmatpush1.bf16.msra.mxu0 %v4807_v31  ;;  %4117 = vmatprep.subr.bf16.mxu1 %v4914_v19  ;;  %v4893_v31 = vld [vmem:[#allocation5 + $0xb94] ss:$8 sps:$4 sm:$0xff]  }
 0x1d0   :  { %2958 = vmatprep.subr.bf16.mxu0 %v4816_v32  ;;  %v4920_v32 = vld [vmem:[#allocation7 + $0x58] sm:$0xff]   ;;  %v4936_v19 = vld [vmem:[#allocation8 + $0x30] sm:$0xff]  }
 0x1d1   :  { %2745 = vmatmul.mubr.bf16.vlgmr.msra.gmra.mrb[0].mxu1 %v3669_v34  ;;  %v4921_v34 = vld [vmem:[#allocation7 + $0x18] sm:$0xff]  }
 0x1d2   :  { %2950 = vmatmul.mubr.bf16.vlgmr.msra.gmra.mrb[0].mxu0 %v3679_v35  ;;  %4118 = vmatpush3.bf16.msra.mxu1 %v4915_v21  ;;  %v4896_v35 = vld [vmem:[#allocation5 + $0xba4] ss:$8 sps:$4 sm:$0xff]   ;;  %v4937_v21 = vld [vmem:[#allocation8 + $0x38] sm:$0xff]  }
 0x1d3   :  { %2959 = vmatpush1.bf16.msra.mxu0 %v4814_v36  ;;  %2990 = vmatprep.mubr.bf16.mxu0 %v3682_v37  ;;  %v4922_v36 = vld [vmem:[#allocation7 + $0x60] sm:$0xff]  }
 0x1d4   :  { %2960 = vmatprep.subr.bf16.mxu0 %v4819_v24  ;;  %4119 = vmatprep.subr.bf16.mxu1 %v4916_v22  ;;  %v4894_v37 = vld [vmem:[#allocation5 + $0xba0] ss:$8 sps:$4 sm:$0xff]  }
 0x1d5   :  { %v4923_v24 = vld [vmem:[#allocation7 + $0x20] sm:$0xff]  }
 0x1d6   :  { %4120 = vmatpush3.bf16.msra.mxu1 %v4917_v26 }
 0x1d7   :  { %2961 = vmatpush1.bf16.msra.mxu0 %v4817_v25  ;;  %4121 = vmatprep.subr.bf16.mxu1 %v4918_v18  ;;  %v4899_v25 = vld [vmem:[#allocation5 + $0xbb4] ss:$8 sps:$4 sm:$0xff]  }
 0x1d8   :  { %2962 = vmatprep.subr.bf16.mxu0 %v4822_v38  ;;  %v4924_v38 = vld [vmem:[#allocation7 + $0x68] sm:$0xff]  }
 0x1da   :  { %4122 = vmatpush3.bf16.msra.mxu1 %v4919_v30 }
 0x1db   :  { %2963 = vmatpush1.bf16.msra.mxu0 %v4820_v28  ;;  %4123 = vmatprep.subr.bf16.mxu1 %v4920_v32  ;;  %v4897_v28 = vld [vmem:[#allocation5 + $0xbb0] ss:$8 sps:$4 sm:$0xff]   ;;  %v4938_v32 = vld [vmem:[#allocation10] sm:$0xff]  }
 0x1dc   :  { %2964 = vmatprep.subr.bf16.mxu0 %v4825_v39  ;;  %v4925_v39 = vld [vmem:[#allocation7 + $0x28] sm:$0xff]  }
 0x1de   :  { %4124 = vmatpush3.bf16.msra.mxu1 %v4921_v34  ;;  %v4939_v34 = vld [vmem:[#allocation10 + $0x8] sm:$0xff]  }
 0x1df   :  { %2965 = vmatpush1.bf16.msra.mxu0 %v4823_v29  ;;  %4125 = vmatprep.subr.bf16.mxu1 %v4922_v36  ;;  %v4902_v29 = vld [vmem:[#allocation5 + $0xbc4] ss:$8 sps:$4 sm:$0xff]   ;;  %v4941_v36 = vld [vmem:[#allocation10 + $0x18] sm:$0xff]  }
 0x1e0   :  { %2966 = vmatprep.subr.bf16.mxu0 %v4828_v40  ;;  %v4900_v40 = vld [vmem:[#allocation5 + $0xbc0] ss:$8 sps:$4 sm:$0xff]  }
 0x1e2   :  { %4126 = vmatpush3.bf16.msra.mxu1 %v4923_v24  ;;  %v4943_v24 = vld [vmem:[#allocation10 + $0x28] sm:$0xff]  }
 0x1e3   :  { %2967 = vmatpush1.bf16.msra.mxu0 %v4826_v41  ;;  %4127 = vmatprep.subr.bf16.mxu1 %v4924_v38  ;;  %v4905_v41 = vld [vmem:[#allocation5 + $0xbd4] ss:$8 sps:$4 sm:$0xff]  }
 0x1e4   :  { %2968 = vmatprep.subr.bf16.mxu0 %v4831_v42  ;;  %v4903_v42 = vld [vmem:[#allocation5 + $0xbd0] ss:$8 sps:$4 sm:$0xff]  }
 0x1e5   :  { %v4945_v38 = vld [vmem:[#allocation10 + $0x38] sm:$0xff]  }
 0x1e6   :  { %4128 = vmatpush3.bf16.msra.mxu1 %v4925_v39 }
 0x1e7   :  { %2969 = vmatpush1.bf16.msra.mxu0 %v4829_v43  ;;  %v4908_v43 = vld [vmem:[#allocation5 + $0xbe4] ss:$8 sps:$4 sm:$0xff]  }
 0x1e8   :  { %2970 = vmatprep.subr.bf16.mxu0 %v4834_v44  ;;  %v4906_v44 = vld [vmem:[#allocation5 + $0xbe0] ss:$8 sps:$4 sm:$0xff]  }
 0x1eb   :  { %2971 = vmatpush1.bf16.msra.mxu0 %v4832_v45  ;;  %v4911_v45 = vld [vmem:[#allocation5 + $0xbf4] ss:$8 sps:$4 sm:$0xff]  }
 0x1ec   :  { %2972 = vmatprep.subr.bf16.mxu0 %v4837_v46  ;;  %v4909_v46 = vld [vmem:[#allocation5 + $0xbf0] ss:$8 sps:$4 sm:$0xff]  }
 0x1ef   :  { %2973 = vmatpush1.bf16.msra.mxu0 %v4835_v47  ;;  %v3683_v47 = vcombine.low %v5395_v1, %v5395_v1 }
 0x1f0   :  { %2974 = vmatprep.subr.bf16.mxu0 %v4840_v48  ;;  %v4926_v48 = vld [vmem:[#allocation7 + $0x70] sm:$0xff]  }
 0x1f1   :  { %4129 = vmatprep.subr.bf16.mxu1 %v4926_v48  ;;  %v4949_v48 = vld [vmem:[#allocation11 + $0x18] sm:$0xff]  }
 0x1f3   :  { %2975 = vmatpush1.bf16.msra.mxu0 %v4838_v49 }
 0x1f4   :  { %2976 = vmatprep.subr.bf16.mxu0 %v4843_v50  ;;  %v4927_v50 = vld [vmem:[#allocation7 + $0x30] sm:$0xff]  }
 0x1f5   :  { %4130 = vmatpush3.bf16.msra.mxu1 %v4927_v50  ;;  %v4951_v50 = vld [vmem:[#allocation11 + $0x28] sm:$0xff]  }
 0x1f7   :  { %2977 = vmatpush1.bf16.msra.mxu0 %v4841_v51 }
 0x1f8   :  { %2978 = vmatprep.subr.bf16.mxu0 %v4846_v52 }
 0x1fb   :  { %2979 = vmatpush1.bf16.msra.mxu0 %v4844_v53 }
 0x1fc   :  { %2980 = vmatprep.subr.bf16.mxu0 %v4849_v54  ;;  %v4928_v54 = vld [vmem:[#allocation7 + $0x78] sm:$0xff]  }
 0x1fd   :  { %4131 = vmatprep.subr.bf16.mxu1 %v4928_v54 }
 0x1ff   :  { %2981 = vmatpush1.bf16.msra.mxu0 %v4847_v55  ;;  %v4929_v55 = vld [vmem:[#allocation7 + $0x38] sm:$0xff]  }
 0x200   :  { %2982 = vmatprep.subr.bf16.mxu0 %v4852_v56  ;;  %4132 = vmatpush3.bf16.msra.mxu1 %v4929_v55  ;;  %v5184_v56 = vmov 0.0  }
 0x201   :  { %4175 = vmatprep.subr.bf16.mxu1 %v5184_v56 }
 0x203   :  { %2983 = vmatpush1.bf16.msra.mxu0 %v4850_v57  ;;  %v534_v57 = vlaneseq }
 0x204   :  { %2984 = vmatprep.subr.bf16.mxu0 %v4855_v58 }
 0x205   :  { %v535_v58 = vshrl.u32 %v534_v57, 7 }
 0x207   :  { %2985 = vmatpush1.bf16.msra.mxu0 %v4853_v59  ;;  %v536_v59 = vsub.s32 0, %v535_v58 }
 0x208   :  { %2986 = vmatprep.subr.bf16.mxu0 %v4858_v60  ;;  %v532_v60 = vld [vmem:[#allocation14] ss:$8 sm:$0x3] }
 0x20b   :  { %2987 = vmatpush1.bf16.msra.mxu0 %v4856_v61  ;;  %v540_v61 = vsub.s32 1, %v535_v58 }
 0x20c   :  { %2988 = vmatprep.subr.bf16.mxu0 %v4861_v62  ;;  %v537_v62 = vrot.slane %v532_v60, %v536_v59 }
 0x20f   :  { %2989 = vmatpush1.bf16.msra.mxu0 %v4859_v63  ;;  %v541_v63 = vrot.slane %v532_v60, %v540_v61  ;;  %v4954_v61 = vld [vmem:[#allocation13] sm:$0xff]  }
 0x210   :  { %2999 = vmatprep.subr.bf16.mxu0 %v4866_v0 }
 0x212   :  { %2991 = vmatmul.mubr.bf16.vlgmr.msra.gmra.mrb[0].mxu0 %v3681_v2 }
 0x213   :  { %3000 = vmatpush1.bf16.msra.mxu0 %v4864_v3  ;;  %3031 = vmatprep.mubr.bf16.mxu0 %v3684_v4 }
 0x214   :  { %3001 = vmatprep.subr.bf16.mxu0 %v4869_v5 }
 0x217   :  { %3002 = vmatpush1.bf16.msra.mxu0 %v4867_v6 }
 0x218   :  { %3003 = vmatprep.subr.bf16.mxu0 %v4872_v7 }
 0x21b   :  { %3004 = vmatpush1.bf16.msra.mxu0 %v4870_v8 }
 0x21c   :  { %3005 = vmatprep.subr.bf16.mxu0 %v4875_v9 }
 0x21f   :  { %3006 = vmatpush1.bf16.msra.mxu0 %v4873_v10 }
 0x220   :  { %3007 = vmatprep.subr.bf16.mxu0 %v4878_v11  ;;  %v4930_v11 = vld [vmem:[#allocation8] sm:$0xff]  }
 0x223   :  { %3008 = vmatpush1.bf16.msra.mxu0 %v4876_v12 }
 0x224   :  { %3009 = vmatprep.subr.bf16.mxu0 %v4881_v13  ;;  %v4931_v13 = vld [vmem:[#allocation8 + $0x8] sm:$0xff]  }
 0x227   :  { %3010 = vmatpush1.bf16.msra.mxu0 %v4879_v14  ;;  %v4932_v14 = vld [vmem:[#allocation8 + $0x10] sm:$0xff]  }
 0x228   :  { %3011 = vmatprep.subr.bf16.mxu0 %v4884_v15  ;;  %v4933_v15 = vld [vmem:[#allocation8 + $0x18] sm:$0xff]  }
 0x22b   :  { %3012 = vmatpush1.bf16.msra.mxu0 %v4882_v16  ;;  %v4934_v16 = vld [vmem:[#allocation8 + $0x20] sm:$0xff]  }
 0x22c   :  { %3013 = vmatprep.subr.bf16.mxu0 %v4887_v17  ;;  %v4935_v17 = vld [vmem:[#allocation8 + $0x28] sm:$0xff]  }
 0x22f   :  { %3014 = vmatpush1.bf16.msra.mxu0 %v4885_v23  ;;  %v3076_v23 = vld [vmem:[#allocation14 + $0x1] ss:$0 sm:$0xff] }
 0x230   :  { %3015 = vmatprep.subr.bf16.mxu0 %v4890_v27 }
 0x233   :  { %3016 = vmatpush1.bf16.msra.mxu0 %v4888_v20 }
 0x234   :  { %3017 = vmatprep.subr.bf16.mxu0 %v4893_v31 }
 0x237   :  { %3018 = vmatpush1.bf16.msra.mxu0 %v4891_v33 }
 0x238   :  { %3019 = vmatprep.subr.bf16.mxu0 %v4896_v35  ;;  %v4940_v35 = vld [vmem:[#allocation10 + $0x10] sm:$0xff]  }
 0x23b   :  { %3020 = vmatpush1.bf16.msra.mxu0 %v4894_v37  ;;  %v4942_v37 = vld [vmem:[#allocation10 + $0x20] sm:$0xff]  }
 0x23c   :  { %3021 = vmatprep.subr.bf16.mxu0 %v4899_v25  ;;  %v4944_v25 = vld [vmem:[#allocation10 + $0x30] sm:$0xff]  }
 0x23f   :  { %3022 = vmatpush1.bf16.msra.mxu0 %v4897_v28  ;;  %v3231_v28 = vld [vmem:[#allocation14 + $0x2] ss:$0 sm:$0xff] }
 0x240   :  { %3023 = vmatprep.subr.bf16.mxu0 %v4902_v29 }
 0x243   :  { %3024 = vmatpush1.bf16.msra.mxu0 %v4900_v40 }
 0x244   :  { %3025 = vmatprep.subr.bf16.mxu0 %v4905_v41 }
 0x247   :  { %3026 = vmatpush1.bf16.msra.mxu0 %v4903_v42 }
 0x248   :  { %3027 = vmatprep.subr.bf16.mxu0 %v4908_v43 }
 0x24b   :  { %3028 = vmatpush1.bf16.msra.mxu0 %v4906_v44  ;;  %v4946_v44 = vld [vmem:[#allocation11] sm:$0xff]  }
 0x24c   :  { %3029 = vmatprep.subr.bf16.mxu0 %v4911_v45 }
 0x24f   :  { %3030 = vmatpush1.bf16.msra.mxu0 %v4909_v46  ;;  %v4947_v46 = vld [vmem:[#allocation11 + $0x8] sm:$0xff]  }
 0x252   :  { %3032 = vmatmul.mubr.bf16.vlgmr.msra.gmra.mrb[0].mxu0 %v3683_v47  ;;  %v4948_v47 = vld [vmem:[#allocation11 + $0x10] sm:$0xff]  }
 0x2a4   :  { %v2746_v49 = vpop.f32.mrb[0].mxu1 }
 0x2a5   :  { %v2748_v51 = vpop.f32.mrb[1].mxu1  ;;  %v4255_v0 = vadd.f32 %v2746_v49, %v537_v62  ;;  %v4950_v49 = vld [vmem:[#allocation11 + $0x20] sm:$0xff]  }
 0x2a6   :  { %v2750_v52 = vpop.f32.mrb[2].mxu1  ;;  %v4257_v1 = vadd.f32 %v2748_v51, %v541_v63  ;;  %v4952_v51 = vld [vmem:[#allocation11 + $0x30] sm:$0xff]   ;;  %v4955_v63 = vld [vmem:[#allocation13 + $0x8] sm:$0xff]  }
 0x2a7   :  { %v2751_v53 = vpop.f32.mrb[3].mxu1  ;;  %v4953_v52 = vld [vmem:[#allocation11 + $0x38] sm:$0xff]  }
 0x2a8   :  { %v3338_v53 = vld [vmem:[#allocation14 + $0x3] ss:$0 sm:$0xff] }
 0x325   :  { %v3033_v2 = vpop.f32.mrb[0].mxu0 }
 0x326   :  { %v4256_v3 = vadd.f32 %v4255_v0, %v3033_v2  ;;  %v3035_v4 = vpop.f32.mrb[1].mxu0  ;;  %v4956_v0 = vld [vmem:[#allocation13 + $0x10] sm:$0xff]   ;;  %v4958_v2 = vld [vmem:[#allocation13 + $0x20] sm:$0xff]  }
 0x327   :  { %v4258_v5 = vadd.f32 %v4257_v1, %v3035_v4  ;;  %v3037_v6 = vpop.f32.mrb[2].mxu0  ;;  %v4957_v1 = vld [vmem:[#allocation13 + $0x18] sm:$0xff]   ;;  %v4960_v4 = vld [vmem:[#allocation13 + $0x30] sm:$0xff]  }
 0x328   :  { %v3040_v7 = vmax.f32 %v4256_v3, 0.0  ;;  %v3038_v8 = vpop.f32.mrb[3].mxu0  ;;  %v4959_v3 = vld [vmem:[#allocation13 + $0x28] sm:$0xff]   ;;  %v3445_v6 = vld [vmem:[#allocation14 + $0x4] ss:$0 sm:$0xff] }
 0x329   :  { %v3041_v9 = vmax.f32 %v4258_v5, 0.0  ;;  %v4961_v5 = vld [vmem:[#allocation13 + $0x38] sm:$0xff]  }
 0x32a   :  { %v3042_v12 = vpack.c.bf16 %v3040_v7, %v3040_v7 }
 0x32b   :  { %v3043_v10 = vpack.c.bf16 %v3041_v9, %v3041_v9 }
 0x32d   :  { %3205 = vmatprep.mubr.bf16.mxu1 %v3043_v10 }
 0x32e   :  { %3206 = vmatmul.mubr.bf16.vlgmr.msra.gmra.mrb[4].mxu1 %v3042_v12 }
 0x32f   :  { %4176 = vmatpush3.bf16.msra.mxu1 %v4930_v11  ;;  %4191 = vmatprep.mubr.msk.bf16.mxu1 %vm5185_vm0, %v5184_v56 }
 0x330   :  { %4177 = vmatprep.subr.bf16.mxu1 %v5184_v56 }
 0x333   :  { %4178 = vmatpush3.bf16.msra.mxu1 %v4931_v13 }
 0x334   :  { %4179 = vmatprep.subr.bf16.mxu1 %v5184_v56 }
 0x337   :  { %4180 = vmatpush3.bf16.msra.mxu1 %v4932_v14  ;;  %v3552_v14 = vld [vmem:[#allocation14 + $0x5] ss:$0 sm:$0xff] }
 0x338   :  { %4181 = vmatprep.subr.bf16.mxu1 %v5184_v56 }
 0x33b   :  { %4182 = vmatpush3.bf16.msra.mxu1 %v4933_v15 }
 0x33c   :  { %4183 = vmatprep.subr.bf16.mxu1 %v5184_v56 }
 0x33f   :  { %4184 = vmatpush3.bf16.msra.mxu1 %v4934_v16 }
 0x340   :  { %4185 = vmatprep.subr.bf16.mxu1 %v5184_v56 }
 0x343   :  { %4186 = vmatpush3.bf16.msra.mxu1 %v4935_v17 }
 0x344   :  { %4187 = vmatprep.subr.bf16.mxu1 %v5184_v56 }
 0x347   :  { %4188 = vmatpush3.bf16.msra.mxu1 %v4936_v19 }
 0x348   :  { %4189 = vmatprep.subr.bf16.mxu1 %v5184_v56 }
 0x34b   :  { %4190 = vmatpush3.bf16.msra.mxu1 %v4937_v21 }
 0x34c   :  { %4195 = vmatprep.subr.bf16.mxu1 %v5184_v56 }
 0x401   :  { %v4133_v22 = vpop.f32.mrb[4].mxu1 }
 0x402   :  { %v4134_v26 = vpop.f32.mrb[5].mxu1 }
 0x403   :  { %v4135_v27 = vadd.f32 %v4134_v26, %v4133_v22  ;;  %v4136_v18 = vpop.f32.mrb[6].mxu1 }
 0x404   :  { %v4137_v20 = vpop.f32.mrb[7].mxu1 }
 0x405   :  { %v3208_v30 = vadd.f32 %v4135_v27, %v3076_v23 }
 0x407   :  { %v3213_v31 = vmax.f32 %v3208_v30, 0.0 }
 0x409   :  { %v3214_v33 = vpack.c.bf16 %v3213_v31, %v3213_v31 }
 0x40b   :  { %4192 = vmatmul.mubr.bf16.vlgmr.msra.gmra.mrb[8].mxu1 %v3214_v33 }
 0x40c   :  { %4196 = vmatpush3.bf16.msra.mxu1 %v4938_v32  ;;  %4211 = vmatprep.mubr.msk.bf16.mxu1 %vm5185_vm0, %v5184_v56 }
 0x40d   :  { %4197 = vmatprep.subr.bf16.mxu1 %v5184_v56 }
 0x410   :  { %4198 = vmatpush3.bf16.msra.mxu1 %v4939_v34 }
 0x411   :  { %4199 = vmatprep.subr.bf16.mxu1 %v5184_v56 }
 0x414   :  { %4200 = vmatpush3.bf16.msra.mxu1 %v4940_v35 }
 0x415   :  { %4201 = vmatprep.subr.bf16.mxu1 %v5184_v56 }
 0x418   :  { %4202 = vmatpush3.bf16.msra.mxu1 %v4941_v36 }
 0x419   :  { %4203 = vmatprep.subr.bf16.mxu1 %v5184_v56 }
 0x41c   :  { %4204 = vmatpush3.bf16.msra.mxu1 %v4942_v37 }
 0x41d   :  { %4205 = vmatprep.subr.bf16.mxu1 %v5184_v56 }
 0x420   :  { %4206 = vmatpush3.bf16.msra.mxu1 %v4943_v24 }
 0x421   :  { %4207 = vmatprep.subr.bf16.mxu1 %v5184_v56 }
 0x424   :  { %4208 = vmatpush3.bf16.msra.mxu1 %v4944_v25 }
 0x425   :  { %4209 = vmatprep.subr.bf16.mxu1 %v5184_v56 }
 0x428   :  { %4210 = vmatpush3.bf16.msra.mxu1 %v4945_v38 }
 0x429   :  { %4215 = vmatprep.subr.bf16.mxu1 %v5184_v56 }
 0x4de   :  { %v3314_v39 = vpop.f32.mrb[8].mxu1 }
 0x4df   :  { %v3315_v29 = vadd.f32 %v3314_v39, %v3231_v28  ;;  %v4193_v40 = vpop.f32.mrb[9].mxu1 }
 0x4e0   :  { %v3317_v41 = vpop.f32.mrb[10].mxu1 }
 0x4e1   :  { %v3320_v42 = vmax.f32 %v3315_v29, 0.0  ;;  %v4194_v43 = vpop.f32.mrb[11].mxu1 }
 0x4e3   :  { %v3321_v45 = vpack.c.bf16 %v3320_v42, %v3320_v42 }
 0x4e5   :  { %4212 = vmatmul.mubr.bf16.vlgmr.msra.gmra.mrb[12].mxu1 %v3321_v45 }
 0x4e6   :  { %4216 = vmatpush3.bf16.msra.mxu1 %v4946_v44  ;;  %4231 = vmatprep.mubr.msk.bf16.mxu1 %vm5185_vm0, %v5184_v56 }
 0x4e7   :  { %4217 = vmatprep.subr.bf16.mxu1 %v5184_v56 }
 0x4ea   :  { %4218 = vmatpush3.bf16.msra.mxu1 %v4947_v46 }
 0x4eb   :  { %4219 = vmatprep.subr.bf16.mxu1 %v5184_v56 }
 0x4ee   :  { %4220 = vmatpush3.bf16.msra.mxu1 %v4948_v47 }
 0x4ef   :  { %4221 = vmatprep.subr.bf16.mxu1 %v5184_v56 }
 0x4f2   :  { %4222 = vmatpush3.bf16.msra.mxu1 %v4949_v48 }
 0x4f3   :  { %4223 = vmatprep.subr.bf16.mxu1 %v5184_v56 }
 0x4f6   :  { %4224 = vmatpush3.bf16.msra.mxu1 %v4950_v49 }
 0x4f7   :  { %4225 = vmatprep.subr.bf16.mxu1 %v5184_v56 }
 0x4fa   :  { %4226 = vmatpush3.bf16.msra.mxu1 %v4951_v50 }
 0x4fb   :  { %4227 = vmatprep.subr.bf16.mxu1 %v5184_v56 }
 0x4fe   :  { %4228 = vmatpush3.bf16.msra.mxu1 %v4952_v51 }
 0x4ff   :  { %4229 = vmatprep.subr.bf16.mxu1 %v5184_v56 }
 0x502   :  { %4230 = vmatpush3.bf16.msra.mxu1 %v4953_v52 }
 0x503   :  { %4235 = vmatprep.subr.bf16.mxu1 %v5184_v56 }
 0x5b8   :  { %v3421_v54 = vpop.f32.mrb[12].mxu1 }
 0x5b9   :  { %v3422_v55 = vadd.f32 %v3421_v54, %v3338_v53  ;;  %v4213_v57 = vpop.f32.mrb[13].mxu1 }
 0x5ba   :  { %v3424_v58 = vpop.f32.mrb[14].mxu1 }
 0x5bb   :  { %v3427_v59 = vmax.f32 %v3422_v55, 0.0  ;;  %v4214_v60 = vpop.f32.mrb[15].mxu1 }
 0x5bd   :  { %v3428_v62 = vpack.c.bf16 %v3427_v59, %v3427_v59 }
 0x5bf   :  { %4232 = vmatmul.mubr.bf16.vlgmr.msra.gmra.mrb[16].mxu1 %v3428_v62 }
 0x5c0   :  { %4236 = vmatpush3.bf16.msra.mxu1 %v4954_v61  ;;  %4251 = vmatprep.mubr.msk.bf16.mxu1 %vm5185_vm0, %v5184_v56 }
 0x5c1   :  { %4237 = vmatprep.subr.bf16.mxu1 %v5184_v56 }
 0x5c4   :  { %4238 = vmatpush3.bf16.msra.mxu1 %v4955_v63 }
 0x5c5   :  { %4239 = vmatprep.subr.bf16.mxu1 %v5184_v56 }
 0x5c8   :  { %4240 = vmatpush3.bf16.msra.mxu1 %v4956_v0 }
 0x5c9   :  { %4241 = vmatprep.subr.bf16.mxu1 %v5184_v56 }
 0x5cc   :  { %4242 = vmatpush3.bf16.msra.mxu1 %v4957_v1 }
 0x5cd   :  { %4243 = vmatprep.subr.bf16.mxu1 %v5184_v56 }
 0x5d0   :  { %4244 = vmatpush3.bf16.msra.mxu1 %v4958_v2 }
 0x5d1   :  { %4245 = vmatprep.subr.bf16.mxu1 %v5184_v56 }
 0x5d4   :  { %4246 = vmatpush3.bf16.msra.mxu1 %v4959_v3 }
 0x5d5   :  { %4247 = vmatprep.subr.bf16.mxu1 %v5184_v56 }
 0x5d8   :  { %4248 = vmatpush3.bf16.msra.mxu1 %v4960_v4 }
 0x5d9   :  { %4249 = vmatprep.subr.bf16.mxu1 %v5184_v56 }
 0x5dc   :  { %4250 = vmatpush3.bf16.msra.mxu1 %v4961_v5 }
 0x692   :  { %v3528_v7 = vpop.f32.mrb[16].mxu1 }
 0x693   :  { %v3529_v8 = vadd.f32 %v3528_v7, %v3445_v6  ;;  %v4233_v9 = vpop.f32.mrb[17].mxu1 }
 0x694   :  { %v3531_v10 = vpop.f32.mrb[18].mxu1 }
 0x695   :  { %v3534_v11 = vmax.f32 %v3529_v8, 0.0  ;;  %v4234_v12 = vpop.f32.mrb[19].mxu1 }
 0x697   :  { %v3535_v13 = vpack.c.bf16 %v3534_v11, %v3534_v11 }
 0x699   :  { %4252 = vmatmul.mubr.bf16.vlgmr.msra.gmra.mrb[20].mxu1 %v3535_v13 }
 0x76c   :  { %v3635_v15 = vpop.f32.mrb[20].mxu1 }
 0x76d   :  { %v3636_v16 = vadd.f32 %v3635_v15, %v3552_v14  ;;  %v4253_v17 = vpop.f32.mrb[21].mxu1 }
 0x76e   :  { %v3638_v19 = vpop.f32.mrb[22].mxu1 }
 0x76f   :  { %3641 = vst [vmem:[#allocation16] sm:$0xff] %v3636_v16  ;;  %v4254_v56 = vpop.f32.mrb[23].mxu1 }
 0x770   :  { %5149 = shalt.err (!%p5146_p12)
}
 0x771   :  { %s5150_s2 = scalar_lea.hbm %s5463_s8, 128 }
 0x772   :  { %p5151_p13 = scmp.ne.s32.totalorder %s5463_s8, %s5150_s2  ;;  %p5154_p0 = scmp.lt.u32.totalorder %s5150_s2, %s5463_s8 }
 0x774   :  { %p5156_p1 = pnand %p5154_p0, %p5151_p13 }
 0x776   :  { %5159 = shalt.err (!%p5156_p1)
}
 0x777   :  { %3651 = dma.vmem_to_hbm [thread:$0]  %s3649_s9, 128, %s5463_s8, [#allocation4]  }
 0x778   :  { %5170 = dma.done.wait [#allocation4], 128  }
 0x779   :  { %5171 = vsyncadd [#allocation4], 4294967168 }
 0x77a   :  { %3655 = vsyncpa [#allocation3], 1 }
 0x77b   :  { %3656 = vsyncpa [#allocation6], 1 }
 0x77c   :  { %3657 = vsyncpa [#allocation9], 1 }
 0x77d   :  { %3658 = vsyncpa [#allocation12], 1 }
 0x77e   :  { %3659 = vsyncpa [#allocation15], 1 }
 0x77f   :  { %3660 = vsyncpa [#allocation4], 1 }

</bundles_post_ra>
